<compile_context>
chip_gen: v6e
topology: v6e:2x2x1
jax: 0.10.0
libtpu: 0.0.40
codegen_flags: <defaults>
</compile_context>

<pallas_src>
import functools

import jax
import jax.numpy as jnp
from jax.experimental import pallas as pl
from jax.experimental.pallas import tpu as pltpu

SAMPLE_LEN = 180                 # per-sample sequence length (module constant)
SEG = 256                        # per-sample lane stride in-kernel (2 vregs)
NN_SIZE = (59, 19, 5, 1)         # conv output channels
NUM_CLASSES = 5                  # {0:'null',1:'freestyle',2:'breaststroke',3:'backstroke',4:'butterfly'}
FC_IN = SAMPLE_LEN - len(NN_SIZE) * 4   # 164
FC_HID = 128
BN_EPS = 1e-5


def _round8(n):
    return -(-n // 8) * 8


FC_IN_PAD = _round8(FC_IN)       # 168 (8-sublane aligned FC gather / weight band)


def _cp_layout(in_ch):
    """Layout of the single packed conv-parameter buffer.

    One row-band per conv block (band start padded to a multiple of 8 rows):
      * Co > 1 blocks store the tap-major (Co, 3*Ci) weight at cols [0, 3*Ci)
      * the Co == 1 block stores the transposed (3*Ci, 1) weight at col 0
      * bias / gamma / beta live at cols wcols / wcols+1 / wcols+2, rows [r0, r0+Co)
    """
    chans = (in_ch,) + NN_SIZE
    offs, r = [], 0
    for k in range(4):
        ci, co = chans[k], chans[k + 1]
        offs.append(r)
        need = 3 * ci if co == 1 else co
        r += _round8(need)
    wcols = max(3 * chans[k] for k in range(4))
    return tuple(offs), r, wcols


# ----------------------------- kernel helpers -------------------------------

def _elu(x):
    # ELU(alpha=1): x if x>0 else exp(x)-1  (clamp exp arg so both branches are finite)
    return jnp.where(x > 0, x, jnp.exp(jnp.minimum(x, 0.0)) - 1.0)


def _im2col3(x):
    """(Ci, N) -> (3*Ci, N-2); rows are [tap0 | tap1 | tap2] (tap-major)."""
    n = x.shape[1] - 2
    return jnp.concatenate([x[:, 0:n], x[:, 1:1 + n], x[:, 2:2 + n]], axis=0)


def _maxpool3(y):
    n = y.shape[1] - 2
    return jnp.maximum(y[:, 0:n], jnp.maximum(y[:, 1:1 + n], y[:, 2:2 + n]))


def _batchnorm(y, gamma, beta, valid, n_valid):
    """Training-mode BatchNorm over the valid lanes of every SEG-strided segment.

    Single fused cross-lane reduce for (sum, sum-of-squares); biased variance,
    eps=1e-5 (PyTorch nn.BatchNorm1d batch statistics, gamma/beta applied).
    """
    co, w = y.shape
    # In-kernel validity mask (replaces 4 HBM mask inputs): lane index within
    # its 256-lane segment; & is free because SEG is a power of two.
    pos = jax.lax.broadcasted_iota(jnp.int32, (1, w), 1) & (SEG - 1)
    ym = y * (pos < valid).astype(y.dtype)
    stacked = jnp.concatenate([ym, ym * ym], axis=0)     # (2*Co, W)
    s = jnp.sum(stacked, axis=1, keepdims=True)          # ONE XLU lane reduce
    inv_n = 1.0 / float(n_valid)                         # fold 1/n at compile time
    mean = s[:co] * inv_n
    var = s[co:] * inv_n - mean * mean                   # biased variance (PyTorch BN)
    scale = gamma * jax.lax.rsqrt(var + BN_EPS)
    # NOTE invariant: lanes >= `valid` now hold (beta - mean*scale), not zero.
    # This is safe because the valid window shrinks by 4 per block while the
    # conv+pool read reach is exactly +4, so later VALID outputs never read
    # those lanes; they are masked out of the next block's statistics again.
    return (ym - mean) * scale + beta


def _conv_block_mxu(x, w, b, gamma, beta, valid, n_valid):
    # w: (Co, 3*Ci) tap-major -> one wide MXU matmul for the whole folded batch.
    xunf = _im2col3(x)
    y = jnp.dot(w, xunf, preferred_element_type=jnp.float32) + b
    y = _maxpool3(_elu(y))
    return _batchnorm(y, gamma, beta, valid, n_valid)


def _conv_block_vpu1(x, w_t, b, gamma, beta, valid, n_valid):
    # Co == 1: broadcast-multiply + one sublane reduce; keeps a degenerate
    # 1-row matmul off the MXU push/drain path.
    xunf = _im2col3(x)
    y = jnp.sum(w_t * xunf, axis=0, keepdims=True) + b
    y = _maxpool3(_elu(y))
    return _batchnorm(y, gamma, beta, valid, n_valid)


def _make_kernel(in_ch, batch, num_classes):
    chans = (in_ch,) + NN_SIZE
    row_offs, _, wcols = _cp_layout(in_ch)
    col_b, col_g, col_be = wcols, wcols + 1, wcols + 2

    def kernel(x_ref, cp_ref, fcw_ref, fcb_ref, out_ref):
        # x_ref: (in_ch, batch*SEG) f32, batch folded into lanes, each sample at
        # a 128-aligned offset s*SEG with lanes [SAMPLE_LEN, SEG) zero-padded.
        y = x_ref[...]

        for k in range(4):
            ci, co = chans[k], chans[k + 1]
            r0 = row_offs[k]
            b = cp_ref[r0:r0 + co, col_b:col_b + 1]        # (Co, 1)
            g = cp_ref[r0:r0 + co, col_g:col_g + 1]
            be = cp_ref[r0:r0 + co, col_be:col_be + 1]
            valid = SAMPLE_LEN - 4 * (k + 1)
            n_valid = batch * valid
            if co == 1:
                w_t = cp_ref[r0:r0 + 3 * ci, 0:1]          # (3*Ci, 1)
                y = _conv_block_vpu1(y, w_t, b, g, be, valid, n_valid)
            else:
                w = cp_ref[r0:r0 + co, 0:3 * ci]           # (Co, 3*Ci)
                y = _conv_block_mxu(y, w, b, g, be, valid, n_valid)

        # Flatten: sample s's 164 valid lanes start at the 128-aligned offset
        # s*SEG.  Gather FC_IN_PAD=168 lanes; the 4 garbage lanes hit the
        # zero-padded fc weight rows [164,168) and contribute nothing.
        flat = jnp.concatenate(
            [y[:, s * SEG: s * SEG + FC_IN_PAD] for s in range(batch)], axis=0)

        h = _elu(jnp.dot(flat, fcw_ref[0:FC_IN_PAD, :],
                         preferred_element_type=jnp.float32) + fcb_ref[0:1, :])
        logits = (jnp.dot(h, fcw_ref[FC_IN_PAD:FC_IN_PAD + FC_HID, 0:num_classes],
                          preferred_element_type=jnp.float32)
                  + fcb_ref[1:2, 0:num_classes])
        m = jnp.max(logits, axis=1, keepdims=True)
        e = jnp.exp(logits - m)
        out_ref[...] = e / jnp.sum(e, axis=1, keepdims=True)   # exact softmax

    return kernel


# ----------------------------- host-side wrapper -----------------------------

def _vmem_limit_bytes(batch):
    # Peak live f32 per sample ~ block-1 output (~42 KB) + block-2 im2col
    # (~180 KB) plus headroom; clamp so the request stays generation-safe
    # (v7x physical VMEM is 64 MiB; v5e/v6e have 128 MiB).
    est = 256 * 1024 * batch + (4 << 20)
    return int(min(56 << 20, max(32 << 20, est)))


@functools.partial(jax.jit, static_argnames=("num_classes",))
def cnn_forward(x, cp, fcw_all, fcb_all, num_classes=NUM_CLASSES):
    """x: (B, in_ch, SAMPLE_LEN) f32 -> (B, num_classes) softmax probabilities."""
    b, cin, length = x.shape
    assert length == SAMPLE_LEN
    # Layout plumbing: pad each sample to a 256-lane segment, fold batch into lanes.
    xp = jnp.pad(x, ((0, 0), (0, 0), (0, SEG - length)))
    x2 = jnp.transpose(xp, (1, 0, 2)).reshape(cin, b * SEG)
    kernel = _make_kernel(cin, b, num_classes)
    return pl.pallas_call(
        kernel,
        out_shape=jax.ShapeDtypeStruct((b, num_classes), jnp.float32),
        in_specs=[pl.BlockSpec(memory_space=pltpu.MemorySpace.VMEM)] * 4,
        out_specs=pl.BlockSpec(memory_space=pltpu.MemorySpace.VMEM),
        compiler_params=pltpu.CompilerParams(
            vmem_limit_bytes=_vmem_limit_bytes(b)),
    )(x2, cp, fcw_all, fcb_all)


# --------------------------- parameters & packing ----------------------------

def init_params(key, in_ch, num_classes=NUM_CLASSES):
    """Deterministic PyTorch-style uniform init; returns logical parameters."""
    chans = (in_ch,) + NN_SIZE
    keys = jax.random.split(key, 6)
    conv = []
    for li in range(4):
        ci, co = chans[li], chans[li + 1]
        kw, kb = jax.random.split(keys[li])
        bound = (1.0 / (ci * 3)) ** 0.5
        w = jax.random.uniform(kw, (co, ci, 3), jnp.float32, -bound, bound)
        b = jax.random.uniform(kb, (co,), jnp.float32, -bound, bound)
        conv.append((w, b, jnp.ones((co,), jnp.float32), jnp.zeros((co,), jnp.float32)))
    kw, kb = jax.random.split(keys[4])
    bound = (1.0 / FC_IN) ** 0.5
    fcw = jax.random.uniform(kw, (FC_HID, FC_IN), jnp.float32, -bound, bound)
    fcb = jax.random.uniform(kb, (FC_HID,), jnp.float32, -bound, bound)
    kw, kb = jax.random.split(keys[5])
    bound = (1.0 / FC_HID) ** 0.5
    fc2w = jax.random.uniform(kw, (num_classes, FC_HID), jnp.float32, -bound, bound)
    fc2b = jax.random.uniform(kb, (num_classes,), jnp.float32, -bound, bound)
    return conv, (fcw, fcb, fc2w, fc2b)


def pack_params(conv, fc, in_ch, num_classes=NUM_CLASSES):
    """Pack all parameters into 3 dense kernel inputs (3 DMAs instead of 24)."""
    row_offs, total_rows, wcols = _cp_layout(in_ch)
    chans = (in_ch,) + NN_SIZE
    cp = jnp.zeros((total_rows, wcols + 3), jnp.float32)
    for k, (w, b, gamma, beta) in enumerate(conv):
        ci, co = chans[k], chans[k + 1]
        r0 = row_offs[k]
        # tap-major 2-D weight: w2d[o, j*Ci + c] == W_torch[o, c, j]
        w2d = jnp.transpose(w, (0, 2, 1)).reshape(co, 3 * ci)
        if co == 1:
            cp = cp.at[r0:r0 + 3 * ci, 0:1].set(jnp.transpose(w2d))
        else:
            cp = cp.at[r0:r0 + co, 0:3 * ci].set(w2d)
        cp = cp.at[r0:r0 + co, wcols].set(b)
        cp = cp.at[r0:r0 + co, wcols + 1].set(gamma)
        cp = cp.at[r0:r0 + co, wcols + 2].set(beta)
    fcw, fcb, fc2w, fc2b = fc
    fcw_all = jnp.zeros((FC_IN_PAD + FC_HID, FC_HID), jnp.float32)
    fcw_all = fcw_all.at[0:FC_IN, :].set(jnp.transpose(fcw))                       # (164,128)
    fcw_all = fcw_all.at[FC_IN_PAD:FC_IN_PAD + FC_HID, 0:num_classes].set(jnp.transpose(fc2w))
    fcb_all = jnp.zeros((2, FC_HID), jnp.float32)
    fcb_all = fcb_all.at[0, :].set(fcb)
    fcb_all = fcb_all.at[1, 0:num_classes].set(fc2b)
    return cp, fcw_all, fcb_all


# ------------------------------ JAX reference --------------------------------

def ref_forward(x, conv, fc):
    """Pure-JAX reference with PyTorch forward semantics (training-mode BN)."""
    hi = jax.lax.Precision.HIGHEST
    act = x
    for (w, b, gamma, beta) in conv:
        lc = act.shape[2] - 2
        y = jnp.zeros((act.shape[0], w.shape[0], lc), jnp.float32)
        for j in range(3):
            y = y + jnp.einsum('oc,bcl->bol', w[:, :, j], act[:, :, j:j + lc],
                               precision=hi)
        y = y + b[None, :, None]
        y = jnp.where(y > 0, y, jnp.exp(jnp.minimum(y, 0.0)) - 1.0)
        lp = lc - 2
        y = jnp.maximum(y[:, :, 0:lp],
                        jnp.maximum(y[:, :, 1:1 + lp], y[:, :, 2:2 + lp]))
        mean = jnp.mean(y, axis=(0, 2), keepdims=True)
        var = jnp.mean((y - mean) ** 2, axis=(0, 2), keepdims=True)
        act = (y - mean) / jnp.sqrt(var + BN_EPS) * gamma[None, :, None] + beta[None, :, None]
    flat = act.reshape(act.shape[0], -1)
    fcw, fcb, fc2w, fc2b = fc
    h = jnp.dot(flat, jnp.transpose(fcw), precision=hi) + fcb
    h = jnp.where(h > 0, h, jnp.exp(jnp.minimum(h, 0.0)) - 1.0)
    logits = jnp.dot(h, jnp.transpose(fc2w), precision=hi) + fc2b
    return jax.nn.softmax(logits, axis=1)


if __name__ == "__main__":
    key = jax.random.PRNGKey(0)
    kx, kp = jax.random.split(key)

    B, in_ch = 2, 4
    x = jax.random.normal(kx, (B, in_ch, SAMPLE_LEN), dtype=jnp.float32)
    conv, fc = init_params(kp, in_ch, NUM_CLASSES)
    cp, fcw_all, fcb_all = pack_params(conv, fc, in_ch, NUM_CLASSES)

    probs = jax.block_until_ready(cnn_forward(x, cp, fcw_all, fcb_all))

    assert probs.shape == (B, NUM_CLASSES), probs.shape
    assert bool(jnp.all(jnp.isfinite(probs)))
    # Exact softmax division -> rows sum to 1 to f32 accuracy.
    assert bool(jnp.all(jnp.abs(jnp.sum(probs, axis=1) - 1.0) < 1e-3))
    # Cross-check against the pure-JAX reference (tightened tolerance).
    ref = ref_forward(x, conv, fc)
    err = float(jnp.max(jnp.abs(probs - ref)))
    assert err < 2e-3, err

    print("KERNEL_OK")
</pallas_src>

<mosaic_0001>
module attributes {stable_mosaic.version = 11 : i64} {
  func.func @kernel(%arg0: memref<4x512xf32, #tpu.memory_space<vmem>>, %arg1: memref<112x180xf32, #tpu.memory_space<vmem>>, %arg2: memref<296x128xf32, #tpu.memory_space<vmem>>, %arg3: memref<2x128xf32, #tpu.memory_space<vmem>>, %arg4: memref<2x5xf32, #tpu.memory_space<vmem>>) attributes {dimension_semantics = [], scalar_prefetch = 0 : i64, scratch_operands = 0 : i64, tpu.core_type = #tpu.core_type<tc>} {
    %c0 = arith.constant 0 : index
    %c0_0 = arith.constant 0 : index
    %0 = vector.load %arg0[%c0, %c0_0] : memref<4x512xf32, #tpu.memory_space<vmem>>, vector<4x512xf32>
    %c0_1 = arith.constant 0 : index
    %c177 = arith.constant 177 : index
    %1 = vector.load %arg1[%c0_1, %c177] : memref<112x180xf32, #tpu.memory_space<vmem>>, vector<59x1xf32>
    %c0_2 = arith.constant 0 : index
    %c178 = arith.constant 178 : index
    %2 = vector.load %arg1[%c0_2, %c178] : memref<112x180xf32, #tpu.memory_space<vmem>>, vector<59x1xf32>
    %c0_3 = arith.constant 0 : index
    %c179 = arith.constant 179 : index
    %3 = vector.load %arg1[%c0_3, %c179] : memref<112x180xf32, #tpu.memory_space<vmem>>, vector<59x1xf32>
    %c0_4 = arith.constant 0 : index
    %c0_5 = arith.constant 0 : index
    %4 = vector.load %arg1[%c0_4, %c0_5] : memref<112x180xf32, #tpu.memory_space<vmem>>, vector<59x12xf32>
    %5 = vector.extract_strided_slice %0 {offsets = [0, 0], sizes = [4, 510], strides = [1, 1]} : vector<4x512xf32> to vector<4x510xf32>
    %6 = vector.extract_strided_slice %0 {offsets = [0, 1], sizes = [4, 510], strides = [1, 1]} : vector<4x512xf32> to vector<4x510xf32>
    %7 = vector.extract_strided_slice %0 {offsets = [0, 2], sizes = [4, 510], strides = [1, 1]} : vector<4x512xf32> to vector<4x510xf32>
    %8 = tpu.concatenate %5, %6, %7 in 0 : vector<4x510xf32>, vector<4x510xf32>, vector<4x510xf32> -> vector<12x510xf32>
    %cst = arith.constant dense<0.000000e+00> : vector<59x510xf32>
    %9 = tpu.matmul %4, %8, %cst {dimension_numbers = #tpu.dot_dimension_numbers<[1], [0], [0], [1], [0, 0, 1, 1], [], []>} : vector<59x12xf32>, vector<12x510xf32>, vector<59x510xf32> -> vector<59x510xf32>
    %10 = vector.broadcast %1 : vector<59x1xf32> to vector<59x510xf32>
    %11 = arith.addf %9, %10 : vector<59x510xf32>
    %cst_6 = arith.constant 0.000000e+00 : f32
    %12 = vector.broadcast %cst_6 : f32 to vector<59x510xf32>
    %13 = arith.cmpf ogt, %11, %12 : vector<59x510xf32>
    %cst_7 = arith.constant 0.000000e+00 : f32
    %14 = vector.broadcast %cst_7 : f32 to vector<59x510xf32>
    %15 = arith.minimumf %11, %14 : vector<59x510xf32>
    %16 = math.exp %15 : vector<59x510xf32>
    %cst_8 = arith.constant 1.000000e+00 : f32
    %17 = vector.broadcast %cst_8 : f32 to vector<59x510xf32>
    %18 = arith.subf %16, %17 : vector<59x510xf32>
    %19 = arith.select %13, %11, %18 : vector<59x510xi1>, vector<59x510xf32>
    %20 = vector.extract_strided_slice %19 {offsets = [0, 0], sizes = [59, 508], strides = [1, 1]} : vector<59x510xf32> to vector<59x508xf32>
    %21 = vector.extract_strided_slice %19 {offsets = [0, 1], sizes = [59, 508], strides = [1, 1]} : vector<59x510xf32> to vector<59x508xf32>
    %22 = vector.extract_strided_slice %19 {offsets = [0, 2], sizes = [59, 508], strides = [1, 1]} : vector<59x510xf32> to vector<59x508xf32>
    %23 = arith.maximumf %21, %22 : vector<59x508xf32>
    %24 = arith.maximumf %20, %23 : vector<59x508xf32>
    %25 = tpu.iota {dimensions = array<i32: 1>} : vector<1x508xi32>
    %c255_i32 = arith.constant 255 : i32
    %26 = vector.broadcast %c255_i32 : i32 to vector<1x508xi32>
    %27 = arith.andi %25, %26 : vector<1x508xi32>
    %c176_i32 = arith.constant 176 : i32
    %28 = vector.broadcast %c176_i32 : i32 to vector<1x508xi32>
    %29 = arith.cmpi slt, %27, %28 : vector<1x508xi32>
    %30 = arith.extui %29 : vector<1x508xi1> to vector<1x508xi32>
    %31 = arith.sitofp %30 : vector<1x508xi32> to vector<1x508xf32>
    %32 = vector.broadcast %31 : vector<1x508xf32> to vector<59x508xf32>
    %33 = arith.mulf %24, %32 : vector<59x508xf32>
    %34 = arith.mulf %33, %33 : vector<59x508xf32>
    %35 = tpu.concatenate %33, %34 in 0 : vector<59x508xf32>, vector<59x508xf32> -> vector<118x508xf32>
    %cst_9 = arith.constant dense<0.000000e+00> : vector<118xf32>
    %36 = vector.multi_reduction <add>, %35, %cst_9 [1] : vector<118x508xf32> to vector<118xf32>
    %37 = vector.shape_cast %36 : vector<118xf32> to vector<118x1xf32>
    %38 = vector.extract_strided_slice %37 {offsets = [0, 0], sizes = [59, 1], strides = [1, 1]} : vector<118x1xf32> to vector<59x1xf32>
    %cst_10 = arith.constant 0.00284090918 : f32
    %39 = vector.broadcast %cst_10 : f32 to vector<59x1xf32>
    %40 = arith.mulf %38, %39 : vector<59x1xf32>
    %41 = vector.extract_strided_slice %37 {offsets = [59, 0], sizes = [59, 1], strides = [1, 1]} : vector<118x1xf32> to vector<59x1xf32>
    %cst_11 = arith.constant 0.00284090918 : f32
    %42 = vector.broadcast %cst_11 : f32 to vector<59x1xf32>
    %43 = arith.mulf %41, %42 : vector<59x1xf32>
    %44 = arith.mulf %40, %40 : vector<59x1xf32>
    %45 = arith.subf %43, %44 : vector<59x1xf32>
    %cst_12 = arith.constant 9.99999974E-6 : f32
    %46 = vector.broadcast %cst_12 : f32 to vector<59x1xf32>
    %47 = arith.addf %45, %46 : vector<59x1xf32>
    %48 = math.rsqrt %47 : vector<59x1xf32>
    %49 = arith.mulf %2, %48 : vector<59x1xf32>
    %50 = vector.broadcast %40 : vector<59x1xf32> to vector<59x508xf32>
    %51 = arith.subf %33, %50 : vector<59x508xf32>
    %52 = vector.broadcast %49 : vector<59x1xf32> to vector<59x508xf32>
    %53 = arith.mulf %51, %52 : vector<59x508xf32>
    %54 = vector.broadcast %3 : vector<59x1xf32> to vector<59x508xf32>
    %55 = arith.addf %53, %54 : vector<59x508xf32>
    %c64 = arith.constant 64 : index
    %c177_13 = arith.constant 177 : index
    %56 = vector.load %arg1[%c64, %c177_13] : memref<112x180xf32, #tpu.memory_space<vmem>>, vector<19x1xf32>
    %c64_14 = arith.constant 64 : index
    %c178_15 = arith.constant 178 : index
    %57 = vector.load %arg1[%c64_14, %c178_15] : memref<112x180xf32, #tpu.memory_space<vmem>>, vector<19x1xf32>
    %c64_16 = arith.constant 64 : index
    %c179_17 = arith.constant 179 : index
    %58 = vector.load %arg1[%c64_16, %c179_17] : memref<112x180xf32, #tpu.memory_space<vmem>>, vector<19x1xf32>
    %c64_18 = arith.constant 64 : index
    %c0_19 = arith.constant 0 : index
    %59 = vector.load %arg1[%c64_18, %c0_19] : memref<112x180xf32, #tpu.memory_space<vmem>>, vector<19x177xf32>
    %60 = vector.extract_strided_slice %55 {offsets = [0, 0], sizes = [59, 506], strides = [1, 1]} : vector<59x508xf32> to vector<59x506xf32>
    %61 = vector.extract_strided_slice %55 {offsets = [0, 1], sizes = [59, 506], strides = [1, 1]} : vector<59x508xf32> to vector<59x506xf32>
    %62 = vector.extract_strided_slice %55 {offsets = [0, 2], sizes = [59, 506], strides = [1, 1]} : vector<59x508xf32> to vector<59x506xf32>
    %63 = tpu.concatenate %60, %61, %62 in 0 : vector<59x506xf32>, vector<59x506xf32>, vector<59x506xf32> -> vector<177x506xf32>
    %cst_20 = arith.constant dense<0.000000e+00> : vector<19x506xf32>
    %64 = tpu.matmul %59, %63, %cst_20 {dimension_numbers = #tpu.dot_dimension_numbers<[1], [0], [0], [1], [0, 0, 1, 1], [], []>} : vector<19x177xf32>, vector<177x506xf32>, vector<19x506xf32> -> vector<19x506xf32>
    %65 = vector.broadcast %56 : vector<19x1xf32> to vector<19x506xf32>
    %66 = arith.addf %64, %65 : vector<19x506xf32>
    %cst_21 = arith.constant 0.000000e+00 : f32
    %67 = vector.broadcast %cst_21 : f32 to vector<19x506xf32>
    %68 = arith.cmpf ogt, %66, %67 : vector<19x506xf32>
    %cst_22 = arith.constant 0.000000e+00 : f32
    %69 = vector.broadcast %cst_22 : f32 to vector<19x506xf32>
    %70 = arith.minimumf %66, %69 : vector<19x506xf32>
    %71 = math.exp %70 : vector<19x506xf32>
    %cst_23 = arith.constant 1.000000e+00 : f32
    %72 = vector.broadcast %cst_23 : f32 to vector<19x506xf32>
    %73 = arith.subf %71, %72 : vector<19x506xf32>
    %74 = arith.select %68, %66, %73 : vector<19x506xi1>, vector<19x506xf32>
    %75 = vector.extract_strided_slice %74 {offsets = [0, 0], sizes = [19, 504], strides = [1, 1]} : vector<19x506xf32> to vector<19x504xf32>
    %76 = vector.extract_strided_slice %74 {offsets = [0, 1], sizes = [19, 504], strides = [1, 1]} : vector<19x506xf32> to vector<19x504xf32>
    %77 = vector.extract_strided_slice %74 {offsets = [0, 2], sizes = [19, 504], strides = [1, 1]} : vector<19x506xf32> to vector<19x504xf32>
    %78 = arith.maximumf %76, %77 : vector<19x504xf32>
    %79 = arith.maximumf %75, %78 : vector<19x504xf32>
    %80 = tpu.iota {dimensions = array<i32: 1>} : vector<1x504xi32>
    %c255_i32_24 = arith.constant 255 : i32
    %81 = vector.broadcast %c255_i32_24 : i32 to vector<1x504xi32>
    %82 = arith.andi %80, %81 : vector<1x504xi32>
    %c172_i32 = arith.constant 172 : i32
    %83 = vector.broadcast %c172_i32 : i32 to vector<1x504xi32>
    %84 = arith.cmpi slt, %82, %83 : vector<1x504xi32>
    %85 = arith.extui %84 : vector<1x504xi1> to vector<1x504xi32>
    %86 = arith.sitofp %85 : vector<1x504xi32> to vector<1x504xf32>
    %87 = vector.broadcast %86 : vector<1x504xf32> to vector<19x504xf32>
    %88 = arith.mulf %79, %87 : vector<19x504xf32>
    %89 = arith.mulf %88, %88 : vector<19x504xf32>
    %90 = tpu.concatenate %88, %89 in 0 : vector<19x504xf32>, vector<19x504xf32> -> vector<38x504xf32>
    %cst_25 = arith.constant dense<0.000000e+00> : vector<38xf32>
    %91 = vector.multi_reduction <add>, %90, %cst_25 [1] : vector<38x504xf32> to vector<38xf32>
    %92 = vector.shape_cast %91 : vector<38xf32> to vector<38x1xf32>
    %93 = vector.extract_strided_slice %92 {offsets = [0, 0], sizes = [19, 1], strides = [1, 1]} : vector<38x1xf32> to vector<19x1xf32>
    %cst_26 = arith.constant 0.00290697673 : f32
    %94 = vector.broadcast %cst_26 : f32 to vector<19x1xf32>
    %95 = arith.mulf %93, %94 : vector<19x1xf32>
    %96 = vector.extract_strided_slice %92 {offsets = [19, 0], sizes = [19, 1], strides = [1, 1]} : vector<38x1xf32> to vector<19x1xf32>
    %cst_27 = arith.constant 0.00290697673 : f32
    %97 = vector.broadcast %cst_27 : f32 to vector<19x1xf32>
    %98 = arith.mulf %96, %97 : vector<19x1xf32>
    %99 = arith.mulf %95, %95 : vector<19x1xf32>
    %100 = arith.subf %98, %99 : vector<19x1xf32>
    %cst_28 = arith.constant 9.99999974E-6 : f32
    %101 = vector.broadcast %cst_28 : f32 to vector<19x1xf32>
    %102 = arith.addf %100, %101 : vector<19x1xf32>
    %103 = math.rsqrt %102 : vector<19x1xf32>
    %104 = arith.mulf %57, %103 : vector<19x1xf32>
    %105 = vector.broadcast %95 : vector<19x1xf32> to vector<19x504xf32>
    %106 = arith.subf %88, %105 : vector<19x504xf32>
    %107 = vector.broadcast %104 : vector<19x1xf32> to vector<19x504xf32>
    %108 = arith.mulf %106, %107 : vector<19x504xf32>
    %109 = vector.broadcast %58 : vector<19x1xf32> to vector<19x504xf32>
    %110 = arith.addf %108, %109 : vector<19x504xf32>
    %c88 = arith.constant 88 : index
    %c177_29 = arith.constant 177 : index
    %111 = vector.load %arg1[%c88, %c177_29] : memref<112x180xf32, #tpu.memory_space<vmem>>, vector<5x1xf32>
    %c88_30 = arith.constant 88 : index
    %c178_31 = arith.constant 178 : index
    %112 = vector.load %arg1[%c88_30, %c178_31] : memref<112x180xf32, #tpu.memory_space<vmem>>, vector<5x1xf32>
    %c88_32 = arith.constant 88 : index
    %c179_33 = arith.constant 179 : index
    %113 = vector.load %arg1[%c88_32, %c179_33] : memref<112x180xf32, #tpu.memory_space<vmem>>, vector<5x1xf32>
    %c88_34 = arith.constant 88 : index
    %c0_35 = arith.constant 0 : index
    %114 = vector.load %arg1[%c88_34, %c0_35] : memref<112x180xf32, #tpu.memory_space<vmem>>, vector<5x57xf32>
    %115 = vector.extract_strided_slice %110 {offsets = [0, 0], sizes = [19, 502], strides = [1, 1]} : vector<19x504xf32> to vector<19x502xf32>
    %116 = vector.extract_strided_slice %110 {offsets = [0, 1], sizes = [19, 502], strides = [1, 1]} : vector<19x504xf32> to vector<19x502xf32>
    %117 = vector.extract_strided_slice %110 {offsets = [0, 2], sizes = [19, 502], strides = [1, 1]} : vector<19x504xf32> to vector<19x502xf32>
    %118 = tpu.concatenate %115, %116, %117 in 0 : vector<19x502xf32>, vector<19x502xf32>, vector<19x502xf32> -> vector<57x502xf32>
    %cst_36 = arith.constant dense<0.000000e+00> : vector<5x502xf32>
    %119 = tpu.matmul %114, %118, %cst_36 {dimension_numbers = #tpu.dot_dimension_numbers<[1], [0], [0], [1], [0, 0, 1, 1], [], []>} : vector<5x57xf32>, vector<57x502xf32>, vector<5x502xf32> -> vector<5x502xf32>
    %120 = vector.broadcast %111 : vector<5x1xf32> to vector<5x502xf32>
    %121 = arith.addf %119, %120 : vector<5x502xf32>
    %cst_37 = arith.constant 0.000000e+00 : f32
    %122 = vector.broadcast %cst_37 : f32 to vector<5x502xf32>
    %123 = arith.cmpf ogt, %121, %122 : vector<5x502xf32>
    %cst_38 = arith.constant 0.000000e+00 : f32
    %124 = vector.broadcast %cst_38 : f32 to vector<5x502xf32>
    %125 = arith.minimumf %121, %124 : vector<5x502xf32>
    %126 = math.exp %125 : vector<5x502xf32>
    %cst_39 = arith.constant 1.000000e+00 : f32
    %127 = vector.broadcast %cst_39 : f32 to vector<5x502xf32>
    %128 = arith.subf %126, %127 : vector<5x502xf32>
    %129 = arith.select %123, %121, %128 : vector<5x502xi1>, vector<5x502xf32>
    %130 = vector.extract_strided_slice %129 {offsets = [0, 0], sizes = [5, 500], strides = [1, 1]} : vector<5x502xf32> to vector<5x500xf32>
    %131 = vector.extract_strided_slice %129 {offsets = [0, 1], sizes = [5, 500], strides = [1, 1]} : vector<5x502xf32> to vector<5x500xf32>
    %132 = vector.extract_strided_slice %129 {offsets = [0, 2], sizes = [5, 500], strides = [1, 1]} : vector<5x502xf32> to vector<5x500xf32>
    %133 = arith.maximumf %131, %132 : vector<5x500xf32>
    %134 = arith.maximumf %130, %133 : vector<5x500xf32>
    %135 = tpu.iota {dimensions = array<i32: 1>} : vector<1x500xi32>
    %c255_i32_40 = arith.constant 255 : i32
    %136 = vector.broadcast %c255_i32_40 : i32 to vector<1x500xi32>
    %137 = arith.andi %135, %136 : vector<1x500xi32>
    %c168_i32 = arith.constant 168 : i32
    %138 = vector.broadcast %c168_i32 : i32 to vector<1x500xi32>
    %139 = arith.cmpi slt, %137, %138 : vector<1x500xi32>
    %140 = arith.extui %139 : vector<1x500xi1> to vector<1x500xi32>
    %141 = arith.sitofp %140 : vector<1x500xi32> to vector<1x500xf32>
    %142 = vector.broadcast %141 : vector<1x500xf32> to vector<5x500xf32>
    %143 = arith.mulf %134, %142 : vector<5x500xf32>
    %144 = arith.mulf %143, %143 : vector<5x500xf32>
    %145 = tpu.concatenate %143, %144 in 0 : vector<5x500xf32>, vector<5x500xf32> -> vector<10x500xf32>
    %cst_41 = arith.constant dense<0.000000e+00> : vector<10xf32>
    %146 = vector.multi_reduction <add>, %145, %cst_41 [1] : vector<10x500xf32> to vector<10xf32>
    %147 = vector.shape_cast %146 : vector<10xf32> to vector<10x1xf32>
    %148 = vector.extract_strided_slice %147 {offsets = [0, 0], sizes = [5, 1], strides = [1, 1]} : vector<10x1xf32> to vector<5x1xf32>
    %cst_42 = arith.constant 0.00297619053 : f32
    %149 = vector.broadcast %cst_42 : f32 to vector<5x1xf32>
    %150 = arith.mulf %148, %149 : vector<5x1xf32>
    %151 = vector.extract_strided_slice %147 {offsets = [5, 0], sizes = [5, 1], strides = [1, 1]} : vector<10x1xf32> to vector<5x1xf32>
    %cst_43 = arith.constant 0.00297619053 : f32
    %152 = vector.broadcast %cst_43 : f32 to vector<5x1xf32>
    %153 = arith.mulf %151, %152 : vector<5x1xf32>
    %154 = arith.mulf %150, %150 : vector<5x1xf32>
    %155 = arith.subf %153, %154 : vector<5x1xf32>
    %cst_44 = arith.constant 9.99999974E-6 : f32
    %156 = vector.broadcast %cst_44 : f32 to vector<5x1xf32>
    %157 = arith.addf %155, %156 : vector<5x1xf32>
    %158 = math.rsqrt %157 : vector<5x1xf32>
    %159 = arith.mulf %112, %158 : vector<5x1xf32>
    %160 = vector.broadcast %150 : vector<5x1xf32> to vector<5x500xf32>
    %161 = arith.subf %143, %160 : vector<5x500xf32>
    %162 = vector.broadcast %159 : vector<5x1xf32> to vector<5x500xf32>
    %163 = arith.mulf %161, %162 : vector<5x500xf32>
    %164 = vector.broadcast %113 : vector<5x1xf32> to vector<5x500xf32>
    %165 = arith.addf %163, %164 : vector<5x500xf32>
    %c96 = arith.constant 96 : index
    %c177_45 = arith.constant 177 : index
    %166 = vector.load %arg1[%c96, %c177_45] : memref<112x180xf32, #tpu.memory_space<vmem>>, vector<1x1xf32>
    %c96_46 = arith.constant 96 : index
    %c178_47 = arith.constant 178 : index
    %167 = vector.load %arg1[%c96_46, %c178_47] : memref<112x180xf32, #tpu.memory_space<vmem>>, vector<1x1xf32>
    %c96_48 = arith.constant 96 : index
    %c179_49 = arith.constant 179 : index
    %168 = vector.load %arg1[%c96_48, %c179_49] : memref<112x180xf32, #tpu.memory_space<vmem>>, vector<1x1xf32>
    %c96_50 = arith.constant 96 : index
    %c0_51 = arith.constant 0 : index
    %169 = vector.load %arg1[%c96_50, %c0_51] : memref<112x180xf32, #tpu.memory_space<vmem>>, vector<15x1xf32>
    %170 = vector.extract_strided_slice %165 {offsets = [0, 0], sizes = [5, 498], strides = [1, 1]} : vector<5x500xf32> to vector<5x498xf32>
    %171 = vector.extract_strided_slice %165 {offsets = [0, 1], sizes = [5, 498], strides = [1, 1]} : vector<5x500xf32> to vector<5x498xf32>
    %172 = vector.extract_strided_slice %165 {offsets = [0, 2], sizes = [5, 498], strides = [1, 1]} : vector<5x500xf32> to vector<5x498xf32>
    %173 = tpu.concatenate %170, %171, %172 in 0 : vector<5x498xf32>, vector<5x498xf32>, vector<5x498xf32> -> vector<15x498xf32>
    %174 = vector.broadcast %169 : vector<15x1xf32> to vector<15x498xf32>
    %175 = arith.mulf %174, %173 : vector<15x498xf32>
    %cst_52 = arith.constant dense<0.000000e+00> : vector<498xf32>
    %176 = vector.multi_reduction <add>, %175, %cst_52 [0] : vector<15x498xf32> to vector<498xf32>
    %177 = vector.shape_cast %176 : vector<498xf32> to vector<1x498xf32>
    %178 = vector.broadcast %166 : vector<1x1xf32> to vector<1x498xf32>
    %179 = arith.addf %177, %178 : vector<1x498xf32>
    %cst_53 = arith.constant 0.000000e+00 : f32
    %180 = vector.broadcast %cst_53 : f32 to vector<1x498xf32>
    %181 = arith.cmpf ogt, %179, %180 : vector<1x498xf32>
    %cst_54 = arith.constant 0.000000e+00 : f32
    %182 = vector.broadcast %cst_54 : f32 to vector<1x498xf32>
    %183 = arith.minimumf %179, %182 : vector<1x498xf32>
    %184 = math.exp %183 : vector<1x498xf32>
    %cst_55 = arith.constant 1.000000e+00 : f32
    %185 = vector.broadcast %cst_55 : f32 to vector<1x498xf32>
    %186 = arith.subf %184, %185 : vector<1x498xf32>
    %187 = arith.select %181, %179, %186 : vector<1x498xi1>, vector<1x498xf32>
    %188 = vector.extract_strided_slice %187 {offsets = [0, 0], sizes = [1, 496], strides = [1, 1]} : vector<1x498xf32> to vector<1x496xf32>
    %189 = vector.extract_strided_slice %187 {offsets = [0, 1], sizes = [1, 496], strides = [1, 1]} : vector<1x498xf32> to vector<1x496xf32>
    %190 = vector.extract_strided_slice %187 {offsets = [0, 2], sizes = [1, 496], strides = [1, 1]} : vector<1x498xf32> to vector<1x496xf32>
    %191 = arith.maximumf %189, %190 : vector<1x496xf32>
    %192 = arith.maximumf %188, %191 : vector<1x496xf32>
    %193 = tpu.iota {dimensions = array<i32: 1>} : vector<1x496xi32>
    %c255_i32_56 = arith.constant 255 : i32
    %194 = vector.broadcast %c255_i32_56 : i32 to vector<1x496xi32>
    %195 = arith.andi %193, %194 : vector<1x496xi32>
    %c164_i32 = arith.constant 164 : i32
    %196 = vector.broadcast %c164_i32 : i32 to vector<1x496xi32>
    %197 = arith.cmpi slt, %195, %196 : vector<1x496xi32>
    %198 = arith.extui %197 : vector<1x496xi1> to vector<1x496xi32>
    %199 = arith.sitofp %198 : vector<1x496xi32> to vector<1x496xf32>
    %200 = arith.mulf %192, %199 : vector<1x496xf32>
    %201 = arith.mulf %200, %200 : vector<1x496xf32>
    %202 = tpu.concatenate %200, %201 in 0 : vector<1x496xf32>, vector<1x496xf32> -> vector<2x496xf32>
    %cst_57 = arith.constant dense<0.000000e+00> : vector<2xf32>
    %203 = vector.multi_reduction <add>, %202, %cst_57 [1] : vector<2x496xf32> to vector<2xf32>
    %204 = vector.shape_cast %203 : vector<2xf32> to vector<2x1xf32>
    %205 = vector.extract_strided_slice %204 {offsets = [0, 0], sizes = [1, 1], strides = [1, 1]} : vector<2x1xf32> to vector<1x1xf32>
    %cst_58 = arith.constant 0.00304878037 : f32
    %206 = vector.broadcast %cst_58 : f32 to vector<1x1xf32>
    %207 = arith.mulf %205, %206 : vector<1x1xf32>
    %208 = vector.extract_strided_slice %204 {offsets = [1, 0], sizes = [1, 1], strides = [1, 1]} : vector<2x1xf32> to vector<1x1xf32>
    %cst_59 = arith.constant 0.00304878037 : f32
    %209 = vector.broadcast %cst_59 : f32 to vector<1x1xf32>
    %210 = arith.mulf %208, %209 : vector<1x1xf32>
    %211 = arith.mulf %207, %207 : vector<1x1xf32>
    %212 = arith.subf %210, %211 : vector<1x1xf32>
    %cst_60 = arith.constant 9.99999974E-6 : f32
    %213 = vector.broadcast %cst_60 : f32 to vector<1x1xf32>
    %214 = arith.addf %212, %213 : vector<1x1xf32>
    %215 = math.rsqrt %214 : vector<1x1xf32>
    %216 = arith.mulf %167, %215 : vector<1x1xf32>
    %217 = vector.broadcast %207 : vector<1x1xf32> to vector<1x496xf32>
    %218 = arith.subf %200, %217 : vector<1x496xf32>
    %219 = vector.broadcast %216 : vector<1x1xf32> to vector<1x496xf32>
    %220 = arith.mulf %218, %219 : vector<1x496xf32>
    %221 = vector.broadcast %168 : vector<1x1xf32> to vector<1x496xf32>
    %222 = arith.addf %220, %221 : vector<1x496xf32>
    %223 = vector.extract_strided_slice %222 {offsets = [0, 0], sizes = [1, 168], strides = [1, 1]} : vector<1x496xf32> to vector<1x168xf32>
    %224 = vector.extract_strided_slice %222 {offsets = [0, 256], sizes = [1, 168], strides = [1, 1]} : vector<1x496xf32> to vector<1x168xf32>
    %225 = tpu.concatenate %223, %224 in 0 : vector<1x168xf32>, vector<1x168xf32> -> vector<2x168xf32>
    %c0_61 = arith.constant 0 : index
    %c0_62 = arith.constant 0 : index
    %226 = vector.load %arg2[%c0_61, %c0_62] : memref<296x128xf32, #tpu.memory_space<vmem>>, vector<168x128xf32>
    %cst_63 = arith.constant dense<0.000000e+00> : vector<2x128xf32>
    %227 = tpu.matmul %225, %226, %cst_63 {dimension_numbers = #tpu.dot_dimension_numbers<[1], [0], [0], [1], [0, 0, 1, 1], [], []>} : vector<2x168xf32>, vector<168x128xf32>, vector<2x128xf32> -> vector<2x128xf32>
    %c0_64 = arith.constant 0 : index
    %c0_65 = arith.constant 0 : index
    %228 = vector.load %arg3[%c0_64, %c0_65] : memref<2x128xf32, #tpu.memory_space<vmem>>, vector<1x128xf32>
    %229 = vector.broadcast %228 : vector<1x128xf32> to vector<2x128xf32>
    %230 = arith.addf %227, %229 : vector<2x128xf32>
    %cst_66 = arith.constant 0.000000e+00 : f32
    %231 = vector.broadcast %cst_66 : f32 to vector<2x128xf32>
    %232 = arith.cmpf ogt, %230, %231 : vector<2x128xf32>
    %cst_67 = arith.constant 0.000000e+00 : f32
    %233 = vector.broadcast %cst_67 : f32 to vector<2x128xf32>
    %234 = arith.minimumf %230, %233 : vector<2x128xf32>
    %235 = math.exp %234 : vector<2x128xf32>
    %cst_68 = arith.constant 1.000000e+00 : f32
    %236 = vector.broadcast %cst_68 : f32 to vector<2x128xf32>
    %237 = arith.subf %235, %236 : vector<2x128xf32>
    %238 = arith.select %232, %230, %237 : vector<2x128xi1>, vector<2x128xf32>
    %c168 = arith.constant 168 : index
    %c0_69 = arith.constant 0 : index
    %239 = vector.load %arg2[%c168, %c0_69] : memref<296x128xf32, #tpu.memory_space<vmem>>, vector<128x5xf32>
    %cst_70 = arith.constant dense<0.000000e+00> : vector<2x5xf32>
    %240 = tpu.matmul %238, %239, %cst_70 {dimension_numbers = #tpu.dot_dimension_numbers<[1], [0], [0], [1], [0, 0, 1, 1], [], []>} : vector<2x128xf32>, vector<128x5xf32>, vector<2x5xf32> -> vector<2x5xf32>
    %c1 = arith.constant 1 : index
    %c0_71 = arith.constant 0 : index
    %241 = vector.load %arg3[%c1, %c0_71] : memref<2x128xf32, #tpu.memory_space<vmem>>, vector<1x5xf32>
    %242 = vector.broadcast %241 : vector<1x5xf32> to vector<2x5xf32>
    %243 = arith.addf %240, %242 : vector<2x5xf32>
    %cst_72 = arith.constant dense<0xFF800000> : vector<2xf32>
    %244 = vector.multi_reduction <maximumf>, %243, %cst_72 [1] : vector<2x5xf32> to vector<2xf32>
    %245 = vector.shape_cast %244 : vector<2xf32> to vector<2x1xf32>
    %246 = vector.broadcast %245 : vector<2x1xf32> to vector<2x5xf32>
    %247 = arith.subf %243, %246 : vector<2x5xf32>
    %248 = math.exp %247 : vector<2x5xf32>
    %cst_73 = arith.constant dense<0.000000e+00> : vector<2xf32>
    %249 = vector.multi_reduction <add>, %248, %cst_73 [1] : vector<2x5xf32> to vector<2xf32>
    %250 = vector.shape_cast %249 : vector<2xf32> to vector<2x1xf32>
    %251 = vector.broadcast %250 : vector<2x1xf32> to vector<2x5xf32>
    %252 = arith.divf %248, %251 : vector<2x5xf32>
    %c0_74 = arith.constant 0 : index
    %c0_75 = arith.constant 0 : index
    %253 = vector.load %arg4[%c0_74, %c0_75] : memref<2x5xf32, #tpu.memory_space<vmem>>, vector<2x5xf32>
    tpu.vector_store %arg4[%c0_74, %c0_75], %252 {strides = array<i32>} : memref<2x5xf32, #tpu.memory_space<vmem>>, vector<2x5xf32>,
    return
  }
}

</mosaic_0001>

<bundles_post_ra>
// kernel: cnn_forward.1
= control target key start
LH: loop header
LB: loop body
LE: loop exit
PB: predicated region body
PF: predicated region fallthrough
CT: control target
= control target key end

     0   :  { %s3947_s19 = smov 127   ;;  %s6550_s0 = inlined_call_operand.vmem [shape: f32[4,512], index: 0, kind: input, shape index: {}]   ;;  %s6551_s1 = inlined_call_operand.vmem [shape: f32[112,180], index: 1, kind: input, shape index: {}]   ;;  %s6552_s2 = inlined_call_operand.vmem [shape: f32[296,128], index: 2, kind: input, shape index: {}]   ;;  %s6553_s3 = inlined_call_operand.vmem [shape: f32[2,128], index: 3, kind: input, shape index: {}]   ;;  %s6554_s4 = inlined_call_operand.hbm [shape: f32[2,5], index: 4, kind: output, shape index: {}]  }
   0x1   :  { %v3985_v0 = vld [vmem:[%s6550_s0] sm:$0xff]  ;;  %v3990_v1 = vld [vmem:[%s6550_s0 + $0x8] sm:$0xff] }
   0x2   :  { %46 = vrot.lane.b32.xlu1 %v3985_v0, %s3947_s19  ;;  %v38_v2 = vcombine.high %v3985_v0, %v3985_v0  ;;  %v43_v3 = vcombine.low %v3990_v1, %v3990_v1 }
   0x3   :  { %9 = vsyncpa [#allocation3], 0  ;;  %s3948_s20 = smov 126   ;;  %v6555_v4 = vmov 0.0   ;;  %v39_v5 = vcombine.high %v3990_v1, %v3990_v1  ;;  %v42_v6 = vcombine.low %v3985_v0, %v3985_v0  ;;  %v20_v7 = vld [vmem:[%s6551_s1 + $0x8] sm:$0xff]  ;;  %v21_v8 = vld [vmem:[%s6551_s1 + $0x18] sm:$0xff] }
   0x4   :  { %62 = vrot.lane.b32.xlu0 %v38_v2, %s3948_s20  ;;  %327 = vmatprep.mubr.f32.mxu1 %v6555_v4  ;;  %v6557_v9 = vmov 49   ;;  %v26_v10 = vld [vmem:[%s6551_s1 + $0x68] sm:$0xff]  ;;  %v25_v12 = vld [vmem:[%s6551_s1 + $0x58] sm:$0xff]  ;;  %vm68_vm0 = vcmask 1031168   ;;  %vm52_vm1 = vcmask 1039360   ;;  %vm72_vm2 = vcmask 1043456  }
   0x5   :  { %214 = vmatprep.mubr.f32.mxu0 %v6555_v4  ;;  %3751 = vset.pattern.permute.xlu0 %v6557_v9  ;;  %v22_v11 = vld [vmem:[%s6551_s1 + $0x28] sm:$0xff]  ;;  %v27_v13 = vld [vmem:[%s6551_s1 + $0x78] sm:$0x7]  ;;  %v28_v30 = vld [vmem:[%s6551_s1] sm:$0xff]  ;;  %vm117_vm3 = vcmask 97280   ;;  %s3952_s27 = smov 50  }
   0x6   :  { %48 = vrot.lane.b32.xlu1 %v43_v3, %s3947_s19  ;;  %v23_v14 = vld [vmem:[%s6551_s1 + $0x38] sm:$0xff]  ;;  %v24_v15 = vld [vmem:[%s6551_s1 + $0x48] sm:$0xff]  ;;  %v29_v35 = vld [vmem:[%s6551_s1 + $0x10] sm:$0xff]  ;;  %s3956_s15 = smov [#allocation2]  }
   0x7   :  { %3752 = vset.pattern.permute.xlu1 %v6557_v9  ;;  %v30_v36 = vld [vmem:[%s6551_s1 + $0x20] sm:$0xff]  ;;  %v31_v37 = vld [vmem:[%s6551_s1 + $0x30] sm:$0xff]  ;;  %s3581_s16 = sshll.u32 %s3956_s15, 4  ;;  %s3582_s16 = int_to_ptr.vmem [resolvable:$true] %s3581_s16 }
   0x8   :  { %64 = vrot.lane.b32.xlu0 %v3990_v1, %s3948_s20  ;;  %v32_v38 = vld [vmem:[%s6551_s1 + $0x40] sm:$0xff]  ;;  %v33_v39 = vld [vmem:[%s6551_s1 + $0x50] sm:$0xff]  ;;  %p3930_p1 = scmp.lt.s32.totalorder %s3582_s16, %s3582_s16 }
   0x9   :  { %v34_v40 = vld [vmem:[%s6551_s1 + $0x60] sm:$0xff]  ;;  %v35_v41 = vld [vmem:[%s6551_s1 + $0x70] sm:$0x7] }
   0xa   :  { %66 = vrot.lane.b32.xlu1 %v39_v5, %s3948_s20 }
   0xc   :  { %60 = vrot.lane.b32.xlu0 %v3985_v0, %s3948_s20 }
   0xe   :  { %50 = vrot.lane.b32.xlu1 %v3990_v1, %s3947_s19 }
  0x10   :  { %44 = vrot.lane.b32.xlu0 %v42_v6, %s3947_s19 }
  0x12   :  { %84 = vperm.xlu1 %3752, %v21_v8  }
  0x14   :  { %79 = vperm.xlu0 %3751, %v20_v7  }
  0x16   :  { %89 = vperm.xlu1 %3752, %v22_v11  }
  0x18   :  { %109 = vperm.xlu0 %3751, %v26_v10  }
  0x1a   :  { %114 = vperm.xlu1 %3752, %v27_v13  }
  0x1c   :  { %104 = vperm.xlu0 %3751, %v25_v12  }
  0x1e   :  { %99 = vperm.xlu1 %3752, %v24_v15  }
  0x20   :  { %94 = vperm.xlu0 %3751, %v23_v14  }
  0x74   :  { %v47_v16 = vpop.permute.xlu1 %46 }
  0x76   :  { %v63_v17 = vpop.permute.xlu0 %62 }
  0x78   :  { %v49_v18 = vpop.permute.xlu1 %48 }
  0x79   :  { %v54_v22 = vsel %vm52_vm1, %v47_v16, %v49_v18 }
  0x7a   :  { %v65_v19 = vpop.permute.xlu0 %64  ;;  %v74_v27 = vsel %vm72_vm2, %v38_v2, %v54_v22 }
  0x7b   :  { %v70_v20 = vsel %vm68_vm0, %v63_v17, %v65_v19 }
  0x7c   :  { %v67_v21 = vpop.permute.xlu1 %66  ;;  %3589 = vmatprep.subr.msk.mxu0 %vm72_vm2, %v70_v20 }
  0x7d   :  { %3599 = vmatprep.subr.msk.mxu1 %vm72_vm2, %v67_v21  ;;  %v71_v23 = vsel %vm68_vm0, %v65_v19, %v67_v21 }
  0x7e   :  { %3600 = vmatpush1.msk.msra.mxu1 %vm72_vm2, %v71_v23  ;;  %v61_v24 = vpop.permute.xlu0 %60 }
  0x7f   :  { %v69_v25 = vsel %vm68_vm0, %v61_v24, %v63_v17 }
  0x80   :  { %v51_v26 = vpop.permute.xlu1 %50  ;;  %3590 = vmatpush1.msk.msra.mxu0 %vm72_vm2, %v69_v25 }
  0x81   :  { %v55_v28 = vsel %vm52_vm1, %v49_v18, %v51_v26  ;;  %180 = vmatprep.subr.mxu0 %v74_v27  ;;  %v76_v29 = vsel %vm72_vm2, %v39_v5, %v51_v26 }
  0x82   :  { %293 = vmatprep.subr.mxu1 %v76_v29  ;;  %v45_v31 = vpop.permute.xlu0 %44  ;;  %v75_v32 = vsel %vm72_vm2, %v3990_v1, %v55_v28 }
  0x83   :  { %v53_v33 = vsel %vm52_vm1, %v45_v31, %v47_v16  ;;  %294 = vmatpush1.msra.mxu1 %v75_v32 }
  0x84   :  { %3601 = vmatmul.mubr.msk.f32.vlgmr.msra.gmra.mxu1 %vm117_vm3, %v28_v30  ;;  %v73_v34 = vsel %vm72_vm2, %v3985_v0, %v53_v33 }
  0x85   :  { %181 = vmatpush1.msra.mxu0 %v73_v34  ;;  %333 = vmatprep.mubr.f32.mxu1 %v6555_v4 }
  0x86   :  { %3591 = vmatmul.mubr.msk.f32.vlgmr.msra.gmra.mxu0 %vm117_vm3, %v28_v30 }
  0x87   :  { %220 = vmatprep.mubr.f32.mxu0 %v6555_v4 }
  0x88   :  { %3602 = vmatmul.mubr.msk.f32.gmra.mxu1 %vm117_vm3, %v29_v35 }
  0x89   :  { %339 = vmatprep.mubr.f32.mxu1 %v6555_v4 }
  0x8a   :  { %3592 = vmatmul.mubr.msk.f32.gmra.mxu0 %vm117_vm3, %v29_v35 }
  0x8b   :  { %226 = vmatprep.mubr.f32.mxu0 %v6555_v4 }
  0x8c   :  { %3603 = vmatmul.mubr.msk.f32.gmra.mxu1 %vm117_vm3, %v30_v36 }
  0x8d   :  { %345 = vmatprep.mubr.f32.mxu1 %v6555_v4  ;;  %v85_v56 = vpop.permute.xlu1 %84 }
  0x8e   :  { %3593 = vmatmul.mubr.msk.f32.gmra.mxu0 %vm117_vm3, %v30_v36 }
  0x8f   :  { %232 = vmatprep.mubr.f32.mxu0 %v6555_v4  ;;  %v80_v42 = vpop.permute.xlu0 %79 }
  0x90   :  { %3604 = vmatmul.mubr.msk.f32.gmra.mxu1 %vm117_vm3, %v31_v37 }
  0x91   :  { %351 = vmatprep.mubr.f32.mxu1 %v6555_v4  ;;  %v90_v10 = vpop.permute.xlu1 %89 }
  0x92   :  { %3594 = vmatmul.mubr.msk.f32.gmra.mxu0 %vm117_vm3, %v31_v37 }
  0x93   :  { %238 = vmatprep.mubr.f32.mxu0 %v6555_v4  ;;  %v4122_v61 = vpop.permute.xlu0 %109 }
  0x94   :  { %3605 = vmatmul.mubr.msk.f32.gmra.mxu1 %vm117_vm3, %v32_v38 }
  0x95   :  { %357 = vmatprep.mubr.f32.mxu1 %v6555_v4  ;;  %v4146_v26 = vpop.permute.xlu1 %114 }
  0x96   :  { %3595 = vmatmul.mubr.msk.f32.gmra.mxu0 %vm117_vm3, %v32_v38 }
  0x97   :  { %244 = vmatprep.mubr.f32.mxu0 %v6555_v4  ;;  %v4138_v16 = vpop.permute.xlu0 %104 }
  0x98   :  { %3606 = vmatmul.mubr.msk.f32.gmra.mxu1 %vm117_vm3, %v33_v39 }
  0x99   :  { %363 = vmatprep.mubr.f32.mxu1 %v6555_v4 }
  0x9a   :  { %3596 = vmatmul.mubr.msk.f32.gmra.mxu0 %vm117_vm3, %v33_v39 }
  0x9b   :  { %250 = vmatprep.mubr.f32.mxu0 %v6555_v4  ;;  %v4156_v35 = vpop.permute.xlu0 %94 }
  0x9c   :  { %3607 = vmatmul.mubr.msk.f32.gmra.mxu1 %vm117_vm3, %v34_v40 }
  0x9d   :  { %369 = vmatprep.mubr.f32.mxu1 %v6555_v4 }
  0x9e   :  { %3597 = vmatmul.mubr.msk.f32.gmra.mxu0 %vm117_vm3, %v34_v40 }
  0x9f   :  { %256 = vmatprep.mubr.f32.mxu0 %v6555_v4 }
  0xa0   :  { %3608 = vmatmul.mubr.msk.f32.gmra.mxu1 %vm117_vm3, %v35_v41 }
  0xa2   :  { %3598 = vmatmul.mubr.msk.f32.gmra.mxu0 %vm117_vm3, %v35_v41 }
 0x144   :  { %v329_v43 = vpop.f32.mrf.mxu1 }
 0x145   :  { %v4110_v44 = vadd.f32 %v329_v43, %v80_v42  ;;  %v4163_v43 = vpop.permute.xlu1 %99 }
 0x146   :  { %v216_v45 = vpop.f32.mrf.mxu0  ;;  %v331_v46 = vpop.f32.mrf.mxu1 }
 0x147   :  { %v410_v47 = vmin.f32 %v4110_v44, 0.0  ;;  %v4113_v48 = vadd.f32 %v331_v46, %v80_v42  ;;  %v4115_v51 = vadd.f32 %v216_v45, %v80_v42  ;;  %vm378_vm4 = vcmp.gt.f32.partialorder %v4110_v44, 0.0 }
 0x148   :  { %v218_v49 = vpop.f32.mrf.mxu0  ;;  %v335_v50 = vpop.f32.mrf.mxu1 }
 0x149   :  { %v411_v52 = vmin.f32 %v4113_v48, 0.0  ;;  %v444_v53 = vmul.f32 1.442695, %v410_v47  ;;  %v4118_v57 = vadd.f32 %v218_v49, %v80_v42  ;;  %v4120_v58 = vadd.f32 %v335_v50, %v85_v56 }
 0x14a   :  { %v222_v54 = vpop.f32.mrf.mxu0  ;;  %v337_v55 = vpop.f32.mrf.mxu1  ;;  %v408_v62 = vmin.f32 %v4115_v51, 0.0  ;;  %vm379_vm5 = vcmp.gt.f32.partialorder %v4113_v48, 0.0  ;;  %vm376_vm6 = vcmp.gt.f32.partialorder %v4115_v51, 0.0 }
 0x14b   :  { %v446_v63 = vmul.f32 1.442695, %v411_v52  ;;  %3776 = vpow2.f32 %v444_v53  ;;  %v4125_v0 = vadd.f32 %v222_v54, %v85_v56  ;;  %v409_v3 = vmin.f32 %v4118_v57, 0.0 }
 0x14c   :  { %v224_v59 = vpop.f32.mrf.mxu0  ;;  %v341_v60 = vpop.f32.mrf.mxu1  ;;  %v4128_v5 = vadd.f32 %v337_v55, %v85_v56  ;;  %v414_v6 = vmin.f32 %v4120_v58, 0.0  ;;  %v440_v11 = vmul.f32 1.442695, %v408_v62  ;;  %vm377_vm7 = vcmp.gt.f32.partialorder %v4118_v57, 0.0 }
 0x14d   :  { %3778 = vpow2.f32 %v446_v63  ;;  %v4131_v12 = vadd.f32 %v224_v59, %v85_v56  ;;  %v412_v13 = vmin.f32 %v4125_v0, 0.0  ;;  %v442_v17 = vmul.f32 1.442695, %v409_v3 }
 0x14e   :  { %v228_v1 = vpop.f32.mrf.mxu0  ;;  %v343_v2 = vpop.f32.mrf.mxu1  ;;  %v415_v18 = vmin.f32 %v4128_v5, 0.0  ;;  %v452_v20 = vmul.f32 1.442695, %v414_v6  ;;  %3780 = vpow2.f32 %v440_v11  ;;  %v4144_v24 = vadd.f32 %v341_v60, %v90_v10 }
 0x14f   :  { %v4141_v19 = vadd.f32 %v343_v2, %v90_v10  ;;  %v413_v23 = vmin.f32 %v4131_v12, 0.0  ;;  %v448_v25 = vmul.f32 1.442695, %v412_v13  ;;  %3782 = vpow2.f32 %v442_v17 }
 0x150   :  { %v230_v7 = vpop.f32.mrf.mxu0  ;;  %v347_v8 = vpop.f32.mrf.mxu1  ;;  %v454_v27 = vmul.f32 1.442695, %v415_v18  ;;  %3784 = vpow2.f32 %v452_v20  ;;  %v4151_v30 = vadd.f32 %v228_v1, %v90_v10  ;;  %v418_v34 = vmin.f32 %v4144_v24, 0.0 }
 0x151   :  { %v419_v28 = vmin.f32 %v4141_v19, 0.0  ;;  %v4149_v29 = vadd.f32 %v230_v7, %v90_v10  ;;  %v450_v33 = vmul.f32 1.442695, %v413_v23  ;;  %3786 = vpow2.f32 %v448_v25 }
 0x152   :  { %v4134_v14 = vpop.f32.mrf.mxu0  ;;  %v4136_v15 = vpop.f32.mrf.mxu1  ;;  %3788 = vpow2.f32 %v454_v27  ;;  %v416_v40 = vmin.f32 %v4151_v30, 0.0  ;;  %v460_v45 = vmul.f32 1.442695, %v418_v34  ;;  %v4166_v46 = vadd.f32 %v347_v8, %v4156_v35 }
 0x153   :  { %v462_v37 = vmul.f32 1.442695, %v419_v28  ;;  %v417_v38 = vmin.f32 %v4149_v29, 0.0  ;;  %3790 = vpow2.f32 %v450_v33  ;;  %vm382_vm8 = vcmp.gt.f32.partialorder %v4120_v58, 0.0 }
 0x154   :  { %v236_v21 = vpop.f32.mrf.mxu0  ;;  %v353_v22 = vpop.f32.mrf.mxu1  ;;  %v456_v54 = vmul.f32 1.442695, %v416_v40  ;;  %v422_v60 = vmin.f32 %v4166_v46, 0.0  ;;  %vm383_vm9 = vcmp.gt.f32.partialorder %v4128_v5, 0.0  ;;  %vm380_vm10 = vcmp.gt.f32.partialorder %v4125_v0, 0.0 }
 0x155   :  { %v4160_v39 = vadd.f32 %v236_v21, %v4156_v35  ;;  %v4169_v49 = vadd.f32 %v353_v22, %v4163_v43  ;;  %3792 = vpow2.f32 %v462_v37  ;;  %v458_v52 = vmul.f32 1.442695, %v417_v38 }
 0x156   :  { %v4153_v31 = vpop.f32.mrf.mxu0  ;;  %v355_v32 = vpop.f32.mrf.mxu1  ;;  %3794 = vpow2.f32 %v460_v45  ;;  %v468_v17 = vmul.f32 1.442695, %v422_v60  ;;  %vm381_vm11 = vcmp.gt.f32.partialorder %v4131_v12, 0.0  ;;  %vm387_vm12 = vcmp.gt.f32.partialorder %v4141_v19, 0.0 }
 0x157   :  { %v421_v53 = vmin.f32 %v4160_v39, 0.0  ;;  %v4178_v62 = vadd.f32 %v355_v32, %v4163_v43  ;;  %v426_v2 = vmin.f32 %v4169_v49, 0.0  ;;  %3796 = vpow2.f32 %v458_v52 }
 0x158   :  { %v3777_v36 = vpop.eup %3776  ;;  %v242_v41 = vpop.f32.mrf.mxu0  ;;  %3798 = vpow2.f32 %v456_v54  ;;  %vm386_vm13 = vcmp.gt.f32.partialorder %v4144_v24, 0.0  ;;  %vm385_vm14 = vcmp.gt.f32.partialorder %v4149_v29, 0.0  ;;  %vm384_vm15 = vcmp.gt.f32.partialorder %v4151_v30, 0.0 }
 0x159   :  { %v359_v42 = vpop.f32.mrf.mxu1  ;;  %v3611_v50 = vadd.f32 -1.0, %v3777_v36  ;;  %v466_v3 = vmul.f32 1.442695, %v421_v53  ;;  %v4191_v8 = vadd.f32 %v242_v41, %v4163_v43  ;;  %v427_v18 = vmin.f32 %v4178_v62, 0.0 }
 0x15a   :  { %v3779_v47 = vpop.eup %3778  ;;  %v246_v55 = vpop.f32.mrf.mxu0  ;;  %v476_v21 = vmul.f32 1.442695, %v426_v2  ;;  %vm389_vm2 = vcmp.gt.f32.partialorder %v4160_v39, 0.0  ;;  %vm390_vm3 = vcmp.gt.f32.partialorder %v4166_v46, 0.0 }
 0x15b   :  { %v361_v56 = vpop.f32.mrf.mxu1  ;;  %v4174_v59 = vsel %vm378_vm4, %v4110_v44, %v3611_v50  ;;  %v3612_v63 = vadd.f32 -1.0, %v3779_v47  ;;  %v3781_v1 = vpop.eup %3780  ;;  %v4185_v44 = vadd.f32 %v359_v42, %v4138_v16  ;;  %v4197_v22 = vadd.f32 %v246_v55, %v4138_v16 }
 0x15c   :  { %604 = vrot.lane.b32.xlu0 %v4174_v59, %s3947_s19  ;;  %v3783_v7 = vpop.eup %3782  ;;  %v248_v11 = vpop.f32.mrf.mxu0  ;;  %v3609_v20 = vadd.f32 -1.0, %v3781_v1  ;;  %3800 = vpow2.f32 %v466_v3  ;;  %v425_v32 = vmin.f32 %v4191_v8, 0.0  ;;  %v4206_v33 = vadd.f32 %v361_v56, %v4138_v16 }
 0x15d   :  { %v4188_v6 = vsel %vm379_vm5, %v4113_v48, %v3612_v63  ;;  %v365_v10 = vpop.f32.mrf.mxu1  ;;  %v3785_v13 = vpop.eup %3784  ;;  %v430_v23 = vmin.f32 %v4185_v44, 0.0  ;;  %v3610_v27 = vadd.f32 -1.0, %v3783_v7  ;;  %3802 = vpow2.f32 %v468_v17 }
 0x15e   :  { %606 = vrot.lane.b32.xlu1 %v4188_v6, %s3947_s19  ;;  %v3787_v48 = vpop.eup %3786  ;;  %v4202_v25 = vsel %vm376_vm6, %v4115_v51, %v3609_v20  ;;  %v252_v36 = vpop.f32.mrf.mxu0  ;;  %v3615_v37 = vadd.f32 -1.0, %v3785_v13  ;;  %v478_v38 = vmul.f32 1.442695, %v427_v18  ;;  %3804 = vpow2.f32 %v476_v21 }
 0x15f   :  { %v3789_v28 = vpop.eup %3788  ;;  %v367_v34 = vpop.f32.mrf.mxu1  ;;  %v4212_v51 = vsel %vm377_vm7, %v4118_v57, %v3610_v27  ;;  %v428_v41 = vmin.f32 %v4197_v22, 0.0  ;;  %v4216_v42 = vadd.f32 %v365_v10, %v4122_v61  ;;  %v484_v45 = vmul.f32 1.442695, %v430_v23 }
 0x160   :  { %600 = vrot.lane.b32.xlu0 %v4202_v25, %s3947_s19  ;;  %v3791_v40 = vpop.eup %3790  ;;  %v4222_v47 = vsel %vm382_vm8, %v4120_v58, %v3615_v37  ;;  %v3616_v50 = vadd.f32 -1.0, %v3789_v28  ;;  %v3613_v52 = vadd.f32 -1.0, %v3787_v48  ;;  %v474_v53 = vmul.f32 1.442695, %v425_v32  ;;  %v254_v55 = vpop.f32.mrf.mxu0 }
 0x161   :  { %v431_v54 = vmin.f32 %v4206_v33, 0.0  ;;  %v371_v56 = vpop.f32.mrf.mxu1  ;;  %3806 = vpow2.f32 %v478_v38  ;;  %v4229_v60 = vadd.f32 %v248_v11, %v4138_v16  ;;  %v3614_v63 = vadd.f32 -1.0, %v3791_v40 }
 0x162   :  { %602 = vrot.lane.b32.xlu1 %v4212_v51, %s3947_s19  ;;  %v3793_v57 = vpop.eup %3792  ;;  %v4232_v58 = vsel %vm383_vm9, %v4128_v5, %v3616_v50  ;;  %v434_v2 = vmin.f32 %v4216_v42, 0.0  ;;  %v4236_v3 = vadd.f32 %v252_v36, %v4122_v61  ;;  %3808 = vpow2.f32 %v484_v45  ;;  %v258_v13 = vpop.f32.mrf.mxu0 }
 0x163   :  { %v3795_v1 = vpop.eup %3794  ;;  %v480_v7 = vmul.f32 1.442695, %v428_v41  ;;  %v4242_v16 = vsel %vm380_vm10, %v4125_v0, %v3613_v52  ;;  %v3620_v10 = vadd.f32 -1.0, %v3793_v57  ;;  %3810 = vpow2.f32 %v474_v53  ;;  %v373_v17 = vpop.f32.mrf.mxu1 }
 0x164   :  { %612 = vrot.lane.b32.xlu0 %v4222_v47, %s3947_s19  ;;  %v3797_v5 = vpop.eup %3796  ;;  %v4245_v11 = vadd.f32 %v367_v34, %v4122_v61  ;;  %v486_v18 = vmul.f32 1.442695, %v431_v54  ;;  %v429_v20 = vmin.f32 %v4229_v60, 0.0  ;;  %v4252_v21 = vsel %vm381_vm11, %v4131_v12, %v3614_v63  ;;  %v260_v38 = vpop.f32.mrf.mxu0 }
 0x165   :  { %v3619_v0 = vadd.f32 -1.0, %v3795_v1  ;;  %v3799_v48 = vpop.eup %3798  ;;  %v492_v23 = vmul.f32 1.442695, %v434_v2  ;;  %v432_v27 = vmin.f32 %v4236_v3, 0.0  ;;  %3812 = vpow2.f32 %v480_v7 }
 0x166   :  { %614 = vrot.lane.b32.xlu1 %v4232_v58, %s3947_s19  ;;  %v4259_v28 = vadd.f32 %v373_v17, %v4146_v26  ;;  %v4262_v32 = vsel %vm387_vm12, %v4141_v19, %v3620_v10  ;;  %v3618_v34 = vadd.f32 -1.0, %v3797_v5  ;;  %v435_v36 = vmin.f32 %v4245_v11, 0.0 }
 0x167   :  { %v4266_v37 = vadd.f32 %v254_v55, %v4122_v61  ;;  %3814 = vpow2.f32 %v486_v18  ;;  %v482_v40 = vmul.f32 1.442695, %v429_v20  ;;  %v4272_v41 = vsel %vm386_vm13, %v4144_v24, %v3619_v0 }
 0x168   :  { %608 = vrot.lane.b32.xlu0 %v4242_v16, %s3947_s19  ;;  %v3617_v19 = vadd.f32 -1.0, %v3799_v48  ;;  %3816 = vpow2.f32 %v492_v23  ;;  %v488_v50 = vmul.f32 1.442695, %v432_v27  ;;  %v439_v52 = vmin.f32 %v4259_v28, 0.0 }
 0x169   :  { %v3801_v12 = vpop.eup %3800  ;;  %v4279_v57 = vadd.f32 %v260_v38, %v4146_v26  ;;  %v4282_v53 = vsel %vm385_vm14, %v4149_v29, %v3618_v34  ;;  %v494_v54 = vmul.f32 1.442695, %v435_v36  ;;  %v4285_v55 = vadd.f32 %v371_v56, %v4146_v26 }
 0x16a   :  { %610 = vrot.lane.b32.xlu1 %v4252_v21, %s3947_s19  ;;  %v3803_v45 = vpop.eup %3802  ;;  %v3622_v24 = vadd.f32 -1.0, %v3801_v12  ;;  %3818 = vpow2.f32 %v482_v40  ;;  %v433_v63 = vmin.f32 %v4266_v37, 0.0  ;;  %v4292_v1 = vsel %vm384_vm15, %v4151_v30, %v3617_v19 }
 0x16b   :  { %v3805_v61 = vpop.eup %3804  ;;  %v3623_v2 = vadd.f32 -1.0, %v3803_v45  ;;  %v4296_v29 = vadd.f32 %v4136_v15, %v4156_v35  ;;  %3820 = vpow2.f32 %v488_v50  ;;  %v502_v56 = vmul.f32 1.442695, %v439_v52 }
 0x16c   :  { %622 = vrot.lane.b32.xlu0 %v4262_v32, %s3947_s19  ;;  %v437_v10 = vmin.f32 %v4279_v57, 0.0  ;;  %v4303_v5 = vsel %vm389_vm2, %v4160_v39, %v3622_v24  ;;  %v3627_v30 = vadd.f32 -1.0, %v3805_v61  ;;  %v438_v18 = vmin.f32 %v4285_v55, 0.0 }
 0x16d   :  { %v4307_v20 = vadd.f32 %v258_v13, %v4146_v26  ;;  %3822 = vpow2.f32 %v494_v54  ;;  %v490_v0 = vmul.f32 1.442695, %v433_v63  ;;  %v4313_v48 = vsel %vm390_vm3, %v4166_v46, %v3623_v2 }
 0x16e   :  { %620 = vrot.lane.b32.xlu1 %v4272_v41, %s3947_s19  ;;  %v3807_v7 = vpop.eup %3806  ;;  %v4317_v23 = vadd.f32 %v4134_v14, %v4156_v35  ;;  %v423_v27 = vmin.f32 %v4296_v29, 0.0  ;;  %vm394_vm4 = vcmp.gt.f32.partialorder %v4169_v49, 0.0  ;;  %3824 = vpow2.f32 %v502_v56 }
 0x16f   :  { %v3809_v17 = vpop.eup %3808  ;;  %v3628_v39 = vadd.f32 -1.0, %v3807_v7  ;;  %v498_v26 = vmul.f32 1.442695, %v437_v10  ;;  %v4324_v13 = vsel %vm394_vm4, %v4169_v49, %v3627_v30  ;;  %v4328_v12 = vadd.f32 %v4153_v31, %v4163_v43 }
 0x170   :  { %618 = vrot.lane.b32.xlu0 %v4282_v53, %s3947_s19  ;;  %v3811_v15 = vpop.eup %3810  ;;  %v3631_v34 = vadd.f32 -1.0, %v3809_v17  ;;  %v500_v14 = vmul.f32 1.442695, %v438_v18  ;;  %vm395_vm5 = vcmp.gt.f32.partialorder %v4178_v62, 0.0  ;;  %3826 = vpow2.f32 %v490_v0 }
 0x171   :  { %v436_v35 = vmin.f32 %v4307_v20, 0.0  ;;  %v4335_v36 = vsel %vm395_vm5, %v4178_v62, %v3628_v39  ;;  %v3626_v49 = vadd.f32 -1.0, %v3811_v15  ;;  %v420_v40 = vmin.f32 %v4317_v23, 0.0 }
 0x172   :  { %616 = vrot.lane.b32.xlu1 %v4292_v1, %s3947_s19  ;;  %v3813_v46 = vpop.eup %3812  ;;  %vm398_vm6 = vcmp.gt.f32.partialorder %v4185_v44, 0.0  ;;  %v470_v43 = vmul.f32 1.442695, %v423_v27  ;;  %3828 = vpow2.f32 %v498_v26  ;;  %v424_v50 = vmin.f32 %v4328_v12, 0.0 }
 0x173   :  { %v4342_v19 = vsel %vm398_vm6, %v4185_v44, %v3631_v34  ;;  %v3629_v45 = vadd.f32 -1.0, %v3813_v46  ;;  %vm393_vm7 = vcmp.gt.f32.partialorder %v4191_v8, 0.0  ;;  %3830 = vpow2.f32 %v500_v14 }
 0x174   :  { %626 = vrot.lane.b32.xlu0 %v4303_v5, %s3947_s19  ;;  %v3815_v38 = vpop.eup %3814  ;;  %v496_v62 = vmul.f32 1.442695, %v436_v35  ;;  %v4349_v61 = vsel %vm393_vm7, %v4191_v8, %v3626_v49  ;;  %vm396_vm8 = vcmp.gt.f32.partialorder %v4197_v22, 0.0  ;;  %v464_v54 = vmul.f32 1.442695, %v420_v40 }
 0x175   :  { %v3817_v31 = vpop.eup %3816  ;;  %v3632_v52 = vadd.f32 -1.0, %v3815_v38  ;;  %3832 = vpow2.f32 %v470_v43  ;;  %v4355_v63 = vsel %vm396_vm8, %v4197_v22, %v3629_v45  ;;  %vm399_vm9 = vcmp.gt.f32.partialorder %v4206_v33, 0.0 }
 0x176   :  { %628 = vrot.lane.b32.xlu1 %v4313_v48, %s3947_s19  ;;  %v3635_v2 = vadd.f32 -1.0, %v3817_v31  ;;  %v472_v8 = vmul.f32 1.442695, %v424_v50  ;;  %3834 = vpow2.f32 %v496_v62  ;;  %vm402_vm10 = vcmp.gt.f32.partialorder %v4216_v42, 0.0 }
 0x177   :  { %v3819_v24 = vpop.eup %3818  ;;  %v4361_v7 = vsel %vm399_vm9, %v4206_v33, %v3632_v52  ;;  %3836 = vpow2.f32 %v464_v54  ;;  %vm397_vm11 = vcmp.gt.f32.partialorder %v4229_v60, 0.0  ;;  %vm400_vm12 = vcmp.gt.f32.partialorder %v4236_v3, 0.0 }
 0x178   :  { %636 = vrot.lane.b32.xlu0 %v4324_v13, %s3947_s19  ;;  %v3821_v44 = vpop.eup %3820  ;;  %v3630_v56 = vadd.f32 -1.0, %v3819_v24  ;;  %v4367_v22 = vsel %vm402_vm10, %v4216_v42, %v3635_v2  ;;  %3838 = vpow2.f32 %v472_v8  ;;  %vm403_vm13 = vcmp.gt.f32.partialorder %v4245_v11, 0.0 }
 0x179   :  { %v3633_v30 = vadd.f32 -1.0, %v3821_v44  ;;  %vm407_vm14 = vcmp.gt.f32.partialorder %v4259_v28, 0.0  ;;  %vm401_vm15 = vcmp.gt.f32.partialorder %v4266_v37, 0.0  ;;  %vm405_vm2 = vcmp.gt.f32.partialorder %v4279_v57, 0.0 }
 0x17a   :  { %638 = vrot.lane.b32.xlu1 %v4335_v36, %s3947_s19  ;;  %v3823_v10 = vpop.eup %3822  ;;  %v4373_v33 = vsel %vm397_vm11, %v4229_v60, %v3630_v56  ;;  %vm406_vm3 = vcmp.gt.f32.partialorder %v4285_v55, 0.0  ;;  %vm391_vm4 = vcmp.gt.f32.partialorder %v4296_v29, 0.0  ;;  %vm404_vm5 = vcmp.gt.f32.partialorder %v4307_v20, 0.0 }
 0x17b   :  { %v3825_v17 = vpop.eup %3824  ;;  %v3636_v18 = vadd.f32 -1.0, %v3823_v10  ;;  %v4379_v42 = vsel %vm400_vm12, %v4236_v3, %v3633_v30  ;;  %vm388_vm6 = vcmp.gt.f32.partialorder %v4317_v23, 0.0  ;;  %vm392_vm7 = vcmp.gt.f32.partialorder %v4328_v12, 0.0 }
 0x17c   :  { %644 = vrot.lane.b32.xlu0 %v4342_v19, %s3947_s19  ;;  %v3640_v0 = vadd.f32 -1.0, %v3825_v17  ;;  %vm1152_vm10 = vcmask 1014784   ;;  %vm1053_vm11 = vcmask 1042432   ;;  %vm1235_vm12 = vcmask 1045504  }
 0x17d   :  { %v3827_v15 = vpop.eup %3826  ;;  %v4385_v60 = vsel %vm403_vm13, %v4245_v11, %v3636_v18  ;;  %vm1241_vm13 = vcmask 1012736  }
 0x17e   :  { %634 = vrot.lane.b32.xlu1 %v4349_v61, %s3947_s19  ;;  %v3634_v27 = vadd.f32 -1.0, %v3827_v15  ;;  %v4391_v3 = vsel %vm407_vm14, %v4259_v28, %v3640_v0  ;;  %vm1332_vm14 = vcmask 1044480  }
 0x17f   :  { %v3829_v39 = vpop.eup %3828 }
 0x180   :  { %640 = vrot.lane.b32.xlu0 %v4355_v63, %s3947_s19  ;;  %v3831_v26 = vpop.eup %3830  ;;  %v3638_v34 = vadd.f32 -1.0, %v3829_v39  ;;  %v4397_v11 = vsel %vm401_vm15, %v4266_v37, %v3634_v27  ;;  %vm1980_vm15 = vcmask 400384  }
 0x181   :  { %v3639_v14 = vadd.f32 -1.0, %v3831_v26 }
 0x182   :  { %646 = vrot.lane.b32.xlu1 %v4361_v7, %s3947_s19  ;;  %v3833_v46 = vpop.eup %3832  ;;  %v4403_v28 = vsel %vm405_vm2, %v4279_v57, %v3638_v34  ;;  %vm1987_vm2 = vcmask 1040384  }
 0x183   :  { %v3835_v35 = vpop.eup %3834  ;;  %v3624_v49 = vadd.f32 -1.0, %v3833_v46  ;;  %v4409_v37 = vsel %vm406_vm3, %v4285_v55, %v3639_v14 }
 0x184   :  { %652 = vrot.lane.b32.xlu0 %v4367_v22, %s3947_s19  ;;  %v3837_v38 = vpop.eup %3836  ;;  %v3637_v40 = vadd.f32 -1.0, %v3835_v35 }
 0x185   :  { %v3839_v31 = vpop.eup %3838  ;;  %v4415_v57 = vsel %vm391_vm4, %v4296_v29, %v3624_v49  ;;  %v3621_v43 = vadd.f32 -1.0, %v3837_v38 }
 0x186   :  { %642 = vrot.lane.b32.xlu1 %v4373_v33, %s3947_s19  ;;  %v4421_v45 = vsel %vm404_vm5, %v4307_v20, %v3637_v40  ;;  %v3625_v55 = vadd.f32 -1.0, %v3839_v31 }
 0x187   :  { %v4427_v50 = vsel %vm388_vm6, %v4317_v23, %v3621_v43 }
 0x188   :  { %648 = vrot.lane.b32.xlu0 %v4379_v42, %s3947_s19  ;;  %v4433_v29 = vsel %vm392_vm7, %v4328_v12, %v3625_v55 }
 0x18a   :  { %654 = vrot.lane.b32.xlu1 %v4385_v60, %s3947_s19 }
 0x18c   :  { %662 = vrot.lane.b32.xlu0 %v4391_v3, %s3947_s19 }
 0x18e   :  { %650 = vrot.lane.b32.xlu1 %v4397_v11, %s3947_s19 }
 0x190   :  { %658 = vrot.lane.b32.xlu0 %v4403_v28, %s3947_s19 }
 0x192   :  { %660 = vrot.lane.b32.xlu1 %v4409_v37, %s3947_s19 }
 0x194   :  { %630 = vrot.lane.b32.xlu0 %v4415_v57, %s3947_s19 }
 0x196   :  { %656 = vrot.lane.b32.xlu1 %v4421_v45, %s3947_s19 }
 0x198   :  { %624 = vrot.lane.b32.xlu0 %v4427_v50, %s3947_s19 }
 0x19a   :  { %632 = vrot.lane.b32.xlu1 %v4433_v29, %s3947_s19 }
 0x1ce   :  { %v605_v20 = vpop.permute.xlu0 %604 }
 0x1d0   :  { %v607_v62 = vpop.permute.xlu1 %606 }
 0x1d1   :  { %v723_v52 = vmax.f32 %v4188_v6, %v607_v62  ;;  %v666_v24 = vsel %vm52_vm1, %v605_v20, %v607_v62 }
 0x1d2   :  { %v601_v23 = vpop.permute.xlu0 %600  ;;  %v722_v44 = vmax.f32 %v4174_v59, %v666_v24 }
 0x1d3   :  { %790 = vrot.lane.b32.xlu0 %v723_v52, %s3947_s19 }
 0x1d4   :  { %v603_v54 = vpop.permute.xlu1 %602 }
 0x1d5   :  { %v665_v2 = vsel %vm52_vm1, %v603_v54, %v605_v20  ;;  %v664_v56 = vsel %vm52_vm1, %v601_v23, %v603_v54 }
 0x1d6   :  { %v613_v12 = vpop.permute.xlu0 %612  ;;  %v721_v8 = vmax.f32 %v4212_v51, %v665_v2  ;;  %v720_v15 = vmax.f32 %v4202_v25, %v664_v56 }
 0x1d7   :  { %788 = vrot.lane.b32.xlu0 %v722_v44, %s3947_s19 }
 0x1d8   :  { %786 = vrot.lane.b32.xlu1 %v721_v8, %s3947_s19  ;;  %v615_v10 = vpop.permute.xlu1 %614 }
 0x1d9   :  { %v727_v30 = vmax.f32 %v4232_v58, %v615_v10  ;;  %v669_v17 = vsel %vm52_vm1, %v613_v12, %v615_v10 }
 0x1da   :  { %v609_v18 = vpop.permute.xlu0 %608  ;;  %v726_v27 = vmax.f32 %v4222_v47, %v669_v17 }
 0x1db   :  { %798 = vrot.lane.b32.xlu0 %v727_v30, %s3947_s19 }
 0x1dc   :  { %v611_v0 = vpop.permute.xlu1 %610  ;;  %784 = vrot.lane.b32.xlu1 %v720_v15, %s3947_s19 }
 0x1dd   :  { %v668_v39 = vsel %vm52_vm1, %v611_v0, %v613_v12  ;;  %v667_v46 = vsel %vm52_vm1, %v609_v18, %v611_v0 }
 0x1de   :  { %v623_v26 = vpop.permute.xlu0 %622  ;;  %v725_v34 = vmax.f32 %v4252_v21, %v668_v39  ;;  %v724_v38 = vmax.f32 %v4242_v16, %v667_v46 }
 0x1df   :  { %796 = vrot.lane.b32.xlu0 %v726_v27, %s3947_s19  ;;  %v731_v55 = vmax.f32 %v4262_v32, %v623_v26 }
 0x1e0   :  { %v621_v14 = vpop.permute.xlu1 %620  ;;  %794 = vrot.lane.b32.xlu1 %v725_v34, %s3947_s19 }
 0x1e1   :  { %v672_v35 = vsel %vm52_vm1, %v621_v14, %v623_v26 }
 0x1e2   :  { %v619_v49 = vpop.permute.xlu0 %618  ;;  %v730_v40 = vmax.f32 %v4272_v41, %v672_v35 }
 0x1e3   :  { %v671_v52 = vsel %vm52_vm1, %v619_v49, %v621_v14 }
 0x1e4   :  { %v617_v31 = vpop.permute.xlu1 %616  ;;  %792 = vrot.lane.b32.xlu1 %v724_v38, %s3947_s19  ;;  %804 = vrot.lane.b32.xlu0 %v730_v40, %s3947_s19  ;;  %v729_v44 = vmax.f32 %v4282_v53, %v671_v52 }
 0x1e5   :  { %v670_v43 = vsel %vm52_vm1, %v617_v31, %v619_v49 }
 0x1e6   :  { %v728_v20 = vmax.f32 %v4292_v1, %v670_v43  ;;  %v4465_v62 = vpop.permute.xlu0 %626 }
 0x1e8   :  { %v629_v24 = vpop.permute.xlu1 %628  ;;  %806 = vrot.lane.b32.xlu1 %v731_v55, %s3947_s19  ;;  %800 = vrot.lane.b32.xlu0 %v728_v20, %s3947_s19 }
 0x1e9   :  { %v674_v54 = vsel %vm52_vm1, %v4465_v62, %v629_v24 }
 0x1ea   :  { %v637_v23 = vpop.permute.xlu0 %636  ;;  %v733_v8 = vmax.f32 %v4303_v5, %v674_v54 }
 0x1ec   :  { %v639_v2 = vpop.permute.xlu1 %638  ;;  %802 = vrot.lane.b32.xlu1 %v729_v44, %s3947_s19 }
 0x1ed   :  { %v678_v56 = vsel %vm52_vm1, %v637_v23, %v639_v2 }
 0x1ee   :  { %v645_v12 = vpop.permute.xlu0 %644  ;;  %v738_v17 = vmax.f32 %v4324_v13, %v678_v56 }
 0x1f0   :  { %v635_v10 = vpop.permute.xlu1 %634  ;;  %810 = vrot.lane.b32.xlu1 %v733_v8, %s3947_s19 }
 0x1f1   :  { %v677_v56 = vsel %vm52_vm1, %v635_v10, %v637_v23 }
 0x1f2   :  { %v641_v30 = vpop.permute.xlu0 %640 }
 0x1f4   :  { %v647_v18 = vpop.permute.xlu1 %646  ;;  %820 = vrot.lane.b32.xlu1 %v738_v17, %s3947_s19 }
 0x1f5   :  { %v681_v23 = vsel %vm52_vm1, %v645_v12, %v647_v18 }
 0x1f6   :  { %v653_v15 = vpop.permute.xlu0 %652 }
 0x1f8   :  { %v643_v0 = vpop.permute.xlu1 %642 }
 0x1f9   :  { %v680_v39 = vsel %vm52_vm1, %v643_v0, %v645_v12  ;;  %v679_v34 = vsel %vm52_vm1, %v641_v30, %v643_v0 }
 0x1fa   :  { %v649_v27 = vpop.permute.xlu0 %648  ;;  %v741_v26 = vmax.f32 %v4373_v33, %v680_v39  ;;  %v740_v35 = vmax.f32 %v4355_v63, %v679_v34  ;;  %v737_v39 = vmax.f32 %v4349_v61, %v677_v56 }
 0x1fc   :  { %v655_v46 = vpop.permute.xlu1 %654  ;;  %826 = vrot.lane.b32.xlu1 %v741_v26, %s3947_s19  ;;  %v743_v26 = vmax.f32 %v4361_v7, %v647_v18 }
 0x1fe   :  { %v663_v14 = vpop.permute.xlu0 %662 }
 0x1ff   :  { %v751_v30 = vmax.f32 %v4391_v3, %v663_v14 }
 0x200   :  { %v651_v49 = vpop.permute.xlu1 %650  ;;  %824 = vrot.lane.b32.xlu1 %v740_v35, %s3947_s19  ;;  %v742_v35 = vmax.f32 %v4342_v19, %v681_v23 }
 0x201   :  { %v683_v38 = vsel %vm52_vm1, %v651_v49, %v653_v15  ;;  %v682_v43 = vsel %vm52_vm1, %v649_v27, %v651_v49  ;;  %v739_v49 = vmax.f32 %v4335_v36, %v639_v2 }
 0x202   :  { %v659_v40 = vpop.permute.xlu0 %658  ;;  %v745_v31 = vmax.f32 %v4397_v11, %v683_v38  ;;  %v744_v52 = vmax.f32 %v4379_v42, %v682_v43  ;;  %v684_v38 = vsel %vm52_vm1, %v653_v15, %v655_v46 }
 0x203   :  { %v746_v12 = vmax.f32 %v4367_v22, %v684_v38 }
 0x204   :  { %v661_v55 = vpop.permute.xlu1 %660  ;;  %834 = vrot.lane.b32.xlu1 %v745_v31, %s3947_s19 }
 0x205   :  { %v686_v17 = vsel %vm52_vm1, %v659_v40, %v661_v55  ;;  %v687_v18 = vsel %vm52_vm1, %v661_v55, %v663_v14  ;;  %v936_v55 = vlaneseq }
 0x206   :  { %v631_v20 = vpop.permute.xlu0 %630  ;;  %v750_v31 = vmax.f32 %v4409_v37, %v687_v18 }
 0x207   :  { %v675_v44 = vsel %vm52_vm1, %v629_v24, %v631_v20  ;;  %v749_v24 = vmax.f32 %v4403_v28, %v686_v17  ;;  %v735_v14 = vmax.f32 %v4415_v57, %v631_v20 }
 0x208   :  { %v657_v54 = vpop.permute.xlu1 %656  ;;  %832 = vrot.lane.b32.xlu1 %v744_v52, %s3947_s19  ;;  %v734_v8 = vmax.f32 %v4313_v48, %v675_v44 }
 0x209   :  { %v685_v2 = vsel %vm52_vm1, %v657_v54, %v659_v40  ;;  %v937_v40 = vand.u32 127, %v936_v55 }
 0x20a   :  { %812 = vrot.lane.b32.xlu0 %v734_v8, %s3947_s19  ;;  %v625_v43 = vpop.permute.xlu0 %624  ;;  %v748_v52 = vmax.f32 %v4421_v45, %v685_v2 }
 0x20b   :  { %v673_v15 = vsel %vm52_vm1, %v625_v43, %v4465_v62  ;;  %v938_v44 = vadd.s32 128, %v937_v40  ;;  %v940_v54 = vadd.s32 384, %v937_v40 }
 0x20c   :  { %v633_v0 = vpop.permute.xlu1 %632  ;;  %846 = vrot.lane.b32.xlu1 %v751_v30, %s3947_s19 }
 0x20d   :  { %v676_v27 = vsel %vm52_vm1, %v633_v0, %v635_v10  ;;  %v747_v10 = vmax.f32 %v4385_v60, %v655_v46  ;;  %v732_v46 = vmax.f32 %v4427_v50, %v673_v15  ;;  %v4529_v56 = vand.u32 255, %v938_v44 }
 0x20e   :  { %818 = vrot.lane.b32.xlu0 %v737_v39, %s3947_s19  ;;  %v736_v34 = vmax.f32 %v4433_v29, %v676_v27  ;;  %v4531_v30 = vand.u32 255, %v940_v54 }
 0x20f   :  { %6613 = vst [vmem:[#allocation5_spill] sm:$0xff] %v4529_v56  ;;  %vm946_vm8 = vcmp.lt.s32.totalorder %v4529_v56, 176 }
 0x210   :  { %842 = vrot.lane.b32.xlu1 %v749_v24, %s3947_s19  ;;  %6614 = vst [vmem:[#allocation6_spill] sm:$0xff] %v4531_v30  ;;  %vm948_vm9 = vcmp.lt.s32.totalorder %v4531_v30, 176  ;;  %v4539_v24 = vsel %vm946_vm8, 1.0, %v6555_v4 }
 0x212   :  { %830 = vrot.lane.b32.xlu0 %v743_v26, %s3947_s19  ;;  %v4542_v26 = vsel %vm948_vm9, 1.0, %v6555_v4 }
 0x214   :  { %816 = vrot.lane.b32.xlu1 %v736_v34, %s3947_s19 }
 0x216   :  { %828 = vrot.lane.b32.xlu0 %v742_v35, %s3947_s19 }
 0x218   :  { %822 = vrot.lane.b32.xlu1 %v739_v49, %s3947_s19 }
 0x21a   :  { %838 = vrot.lane.b32.xlu0 %v747_v10, %s3947_s19 }
 0x21e   :  { %836 = vrot.lane.b32.xlu0 %v746_v12, %s3947_s19 }
 0x222   :  { %844 = vrot.lane.b32.xlu0 %v750_v31, %s3947_s19 }
 0x226   :  { %840 = vrot.lane.b32.xlu0 %v748_v52, %s3947_s19 }
 0x22a   :  { %808 = vrot.lane.b32.xlu0 %v732_v46, %s3947_s19 }
 0x22e   :  { %814 = vrot.lane.b32.xlu0 %v735_v14, %s3947_s19 }
 0x245   :  { %v791_v8 = vpop.permute.xlu0 %790 }
 0x246   :  { %v907_v39 = vmax.f32 %v4188_v6, %v791_v8 }
 0x248   :  { %v4554_v6 = vmul.f32 %v4542_v26, %v907_v39 }
 0x249   :  { %v789_v62 = vpop.permute.xlu0 %788 }
 0x24a   :  { %v787_v17 = vpop.permute.xlu1 %786  ;;  %v850_v34 = vsel %vm52_vm1, %v789_v62, %v791_v8  ;;  %6617 = vst [vmem:[#allocation9_spill] sm:$0xff] %v4554_v6  ;;  %v1153_v15 = vsel %vm1152_vm10, %v4554_v6, 0.0 }
 0x24b   :  { %v849_v0 = vsel %vm52_vm1, %v787_v17, %v789_v62  ;;  %v4557_v12 = vmax.f32 %v4174_v59, %v850_v34 }
 0x24c   :  { %v905_v20 = vmax.f32 %v4212_v51, %v849_v0 }
 0x24d   :  { %v799_v27 = vpop.permute.xlu0 %798  ;;  %6618 = vst [vmem:[#allocation10_spill] sm:$0xff] %v4557_v12  ;;  %v4598_v0 = vmul.f32 %v4557_v12, %v4557_v12 }
 0x24e   :  { %v785_v23 = vpop.permute.xlu1 %784  ;;  %v911_v35 = vmax.f32 %v4232_v58, %v799_v27  ;;  %v4548_v10 = vmul.f32 %v4539_v24, %v905_v20  ;;  %v4602_v20 = vmul.f32 %v4554_v6, %v4554_v6 }
 0x24f   :  { %v848_v49 = vsel %vm52_vm1, %v785_v23, %v787_v17 }
 0x250   :  { %6615 = vst [vmem:[#allocation7_spill] sm:$0xff] %v4548_v10  ;;  %v4551_v51 = vmax.f32 %v4202_v25, %v848_v49  ;;  %v4563_v2 = vmul.f32 %v4542_v26, %v911_v35  ;;  %v4578_v40 = vmul.f32 %v4548_v10, %v4548_v10 }
 0x251   :  { %v797_v38 = vpop.permute.xlu0 %796 }
 0x252   :  { %6616 = vst [vmem:[#allocation8_spill] sm:$0xff] %v4551_v51  ;;  %v853_v18 = vsel %vm52_vm1, %v797_v38, %v799_v27  ;;  %v795_v31 = vpop.permute.xlu1 %794  ;;  %v1150_v58 = vadd.f32 %v4548_v10, %v4551_v51  ;;  %v6561_v49 = vrot.slane %v4578_v40, 5 }
 0x253   :  { %v852_v25 = vsel %vm52_vm1, %v795_v31, %v797_v38  ;;  %v4567_v43 = vmax.f32 %v4222_v47, %v853_v18  ;;  %v996_v47 = vmul.f32 %v4563_v2, %v4563_v2 }
 0x254   :  { %v909_v52 = vmax.f32 %v4252_v21, %v852_v25  ;;  %v1151_v59 = vadd.f32 %v1150_v58, %v4557_v12  ;;  %v4585_v21 = vmul.f32 %v4551_v51, %v4551_v51 }
 0x255   :  { %v4589_v54 = vmul.f32 %v4567_v43, %v4567_v43  ;;  %v1064_v38 = vrot.slane %v996_v47, 5 }
 0x256   :  { %v4574_v46 = vmul.f32 %v4539_v24, %v909_v52  ;;  %v793_v14 = vpop.permute.xlu1 %792  ;;  %v1154_v55 = vadd.f32 %v1153_v15, %v1151_v59  ;;  %v805_v17 = vpop.permute.xlu0 %804  ;;  %v6560_v18 = vrot.slane %v4585_v21, 5  ;;  %v1159_v59 = vsel %vm1152_vm10, %v4563_v2, 0.0 }
 0x257   :  { %v851_v44 = vsel %vm52_vm1, %v793_v14, %v795_v31  ;;  %v1062_v25 = vrot.slane %v4589_v54, 5  ;;  %v6559_v15 = vrot.slane %v4598_v0, 5 }
 0x258   :  { %v994_v8 = vmul.f32 %v4574_v46, %v4574_v46  ;;  %v4594_v62 = vmax.f32 %v4242_v16, %v851_v44  ;;  %1155 = vadd.xlane.f32.xlu1 %v1154_v55 }
 0x25a   :  { %v993_v39 = vmul.f32 %v4594_v62, %v4594_v62  ;;  %v807_v27 = vpop.permute.xlu1 %806  ;;  %v1157_v23 = vadd.f32 %v4574_v46, %v4594_v62  ;;  %v1060_v16 = vrot.slane %v994_v8, 5  ;;  %v801_v55 = vpop.permute.xlu0 %800 }
 0x25b   :  { %v856_v34 = vsel %vm52_vm1, %v805_v17, %v807_v27  ;;  %v915_v35 = vmax.f32 %v4262_v32, %v807_v27  ;;  %v6563_v32 = vrot.slane %v4602_v20, 5 }
 0x25c   :  { %v1058_v31 = vrot.slane %v993_v39, 5  ;;  %v1158_v58 = vadd.f32 %v1157_v23, %v4567_v43  ;;  %v4622_v14 = vmax.f32 %v4272_v41, %v856_v34  ;;  %v1061_v8 = vsel %vm1053_vm11, %v6561_v49, %v1060_v16 }
 0x25d   :  { %v4615_v52 = vmul.f32 %v4542_v26, %v915_v35  ;;  %v1065_v41 = vsel %vm1053_vm11, %v6563_v32, %v1064_v38 }
 0x25e   :  { %v803_v44 = vpop.permute.xlu1 %802  ;;  %v1160_v47 = vadd.f32 %v1159_v59, %v1158_v58  ;;  %v1059_v54 = vsel %vm1053_vm11, %v6560_v18, %v1058_v31  ;;  %v1063_v58 = vsel %vm1053_vm11, %v6559_v15, %v1062_v25 }
 0x25f   :  { %v854_v39 = vsel %vm52_vm1, %v801_v55, %v803_v44  ;;  %v855_v27 = vsel %vm52_vm1, %v803_v44, %v805_v17  ;;  %v1199_v23 = vadd.f32 %v1061_v8, %v1059_v54  ;;  %v4644_v55 = vmul.f32 %v4615_v52, %v4615_v52 }
 0x260   :  { %v4636_v34 = vmax.f32 %v4292_v1, %v854_v39  ;;  %v913_v35 = vmax.f32 %v4282_v53, %v855_v27  ;;  %1161 = vadd.xlane.f32.xlu0 %v1160_v47  ;;  %v4648_v17 = vmul.f32 %v4622_v14, %v4622_v14  ;;  %v1201_v1 = vsel %vm1152_vm10, %v1065_v41, 0.0 }
 0x261   :  { %v1200_v59 = vadd.f32 %v1199_v23, %v1063_v58  ;;  %v6567_v23 = vrot.slane %v4644_v55, 5 }
 0x262   :  { %v4651_v44 = vmul.f32 %v4539_v24, %v913_v35  ;;  %v4655_v53 = vmul.f32 %v4636_v34, %v4636_v34  ;;  %v4663_v39 = vpop.permute.xlu1 %810  ;;  %v6568_v41 = vrot.slane %v4648_v17, 5 }
 0x263   :  { %v1202_v47 = vadd.f32 %v1201_v1, %v1200_v59  ;;  %v1165_v59 = vsel %vm1152_vm10, %v4615_v52, 0.0 }
 0x264   :  { %v4660_v54 = vmul.f32 %v4651_v44, %v4651_v44  ;;  %v6562_v8 = vrot.slane %v4655_v53, 5  ;;  %v1163_v27 = vadd.f32 %v4651_v44, %v4636_v34  ;;  %v1071_v18 = vsel %vm1053_vm11, %v1062_v25, %v6568_v41 }
 0x265   :  { %1203 = vadd.xlane.f32.xlu1 %v1202_v47 }
 0x266   :  { %v1164_v35 = vadd.f32 %v1163_v27, %v4622_v14  ;;  %v6564_v58 = vrot.slane %v4660_v54, 5  ;;  %v1067_v4 = vsel %vm1053_vm11, %v1058_v31, %v6562_v8  ;;  %v1073_v27 = vsel %vm1053_vm11, %v1064_v38, %v6567_v23  ;;  %v821_v15 = vpop.permute.xlu1 %820 }
 0x268   :  { %v1166_v1 = vadd.f32 %v1165_v59, %v1164_v35  ;;  %v1069_v47 = vsel %vm1053_vm11, %v1060_v16, %v6564_v58  ;;  %v1207_v59 = vsel %vm1152_vm10, %v1073_v27, 0.0 }
 0x269   :  { %v1205_v9 = vadd.f32 %v1069_v47, %v1067_v4 }
 0x26a   :  { %1167 = vadd.xlane.f32.xlu0 %v1166_v1 }
 0x26b   :  { %v1206_v35 = vadd.f32 %v1205_v9, %v1071_v18 }
 0x26d   :  { %v1208_v49 = vadd.f32 %v1207_v59, %v1206_v35 }
 0x26e   :  { %v827_v31 = vpop.permute.xlu1 %826 }
 0x26f   :  { %1209 = vadd.xlane.f32.xlu0 %v1208_v49 }
 0x272   :  { %v825_v8 = vpop.permute.xlu1 %824 }
 0x273   :  { %v863_v4 = vsel %vm52_vm1, %v825_v8, %v827_v31 }
 0x274   :  { %v4699_v49 = vmax.f32 %v4355_v63, %v863_v4 }
 0x276   :  { %v835_v32 = vpop.permute.xlu1 %834  ;;  %6620 = vst [vmem:[#allocation12_spill] sm:$0xff] %v4699_v49  ;;  %v4713_v35 = vmul.f32 %v4699_v49, %v4699_v49 }
 0x278   :  { %v6571_v56 = vrot.slane %v4713_v35, 5 }
 0x27a   :  { %v833_v16 = vpop.permute.xlu1 %832 }
 0x27b   :  { %v866_v58 = vsel %vm52_vm1, %v833_v16, %v835_v32 }
 0x27c   :  { %v4687_v30 = vpop.permute.xlu0 %812  ;;  %v4693_v1 = vmax.f32 %v4379_v42, %v866_v58 }
 0x27d   :  { %v858_v9 = vsel %vm52_vm1, %v4663_v39, %v4687_v30 }
 0x27e   :  { %v4690_v38 = vpop.permute.xlu1 %846  ;;  %6619 = vst [vmem:[#allocation11_spill] sm:$0xff] %v4693_v1  ;;  %v4707_v8 = vmul.f32 %v4693_v1, %v4693_v1  ;;  %v917_v42 = vmax.f32 %v4303_v5, %v858_v9 }
 0x27f   :  { %v935_v25 = vmax.f32 %v4391_v3, %v4690_v38 }
 0x280   :  { %v819_v18 = vpop.permute.xlu0 %818  ;;  %v4722_v23 = vmul.f32 %v4539_v24, %v917_v42 }
 0x281   :  { %v861_v58 = vsel %vm52_vm1, %v819_v18, %v821_v15  ;;  %v4716_v63 = vmul.f32 %v4542_v26, %v935_v25 }
 0x282   :  { %v4703_v47 = vpop.permute.xlu1 %842  ;;  %v921_v3 = vmax.f32 %v4349_v61, %v861_v58 }
 0x283   :  { %6621 = vst [vmem:[#allocation13_spill] sm:$0xff] %v4716_v63 }
 0x284   :  { %v831_v27 = vpop.permute.xlu0 %830 }
 0x285   :  { %v927_v59 = vmax.f32 %v4361_v7, %v831_v27  ;;  %v4732_v7 = vmul.f32 %v4539_v24, %v921_v3 }
 0x286   :  { %v817_v16 = vpop.permute.xlu1 %816 }
 0x287   :  { %v860_v5 = vsel %vm52_vm1, %v817_v16, %v819_v18  ;;  %v4735_v58 = vmul.f32 %v4542_v26, %v927_v59  ;;  %v6623_v18 = vrot.slane %v4602_v20, 5  ;;  %v4744_v16 = vmul.f32 %v4722_v23, %v4722_v23 }
 0x288   :  { %v4726_v9 = vmax.f32 %v4433_v29, %v860_v5  ;;  %v829_v41 = vpop.permute.xlu0 %828 }
 0x289   :  { %v864_v25 = vsel %vm52_vm1, %v827_v31, %v829_v41  ;;  %v865_v61 = vsel %vm52_vm1, %v829_v41, %v831_v27  ;;  %6622 = vst [vmem:[#allocation14_spill] sm:$0xff] %v4735_v58  ;;  %v1149_v29 = vsel %vm1053_vm11, %v4716_v63, %v6623_v18  ;;  %v6624_v27 = vrot.slane %v4707_v8, 5 }
 0x28a   :  { %v925_v42 = vmax.f32 %v4373_v33, %v864_v25  ;;  %v823_v4 = vpop.permute.xlu1 %822  ;;  %v4756_v20 = vmax.f32 %v4342_v19, %v865_v61  ;;  %v4771_v25 = vsel %vm1152_vm10, %v1149_v29, 0.0  ;;  %v4775_v19 = vmul.f32 %v4716_v63, %v4716_v63 }
 0x28b   :  { %v862_v41 = vsel %vm52_vm1, %v821_v15, %v823_v4  ;;  %v923_v31 = vmax.f32 %v4335_v36, %v823_v4  ;;  %v4753_v33 = vsel %vm1053_vm11, %v6571_v56, %v6624_v27  ;;  %v1175_v36 = vadd.f32 %v4732_v7, %v4726_v9 }
 0x28c   :  { %6625 = vst [vmem:[#allocation15_spill] sm:$0xff] %v4756_v20  ;;  %v4759_v3 = vmul.f32 %v4539_v24, %v925_v42  ;;  %v4762_v59 = vmax.f32 %v4324_v13, %v862_v41  ;;  %v839_v5 = vpop.permute.xlu0 %838  ;;  %v4779_v13 = vmul.f32 %v4732_v7, %v4732_v7  ;;  %v1012_v18 = vmul.f32 %v4735_v58, %v4735_v58 }
 0x28d   :  { %v4767_v15 = vmul.f32 %v4542_v26, %v923_v31  ;;  %v931_v4 = vmax.f32 %v4385_v60, %v839_v5  ;;  %v4788_v60 = vmul.f32 %v4726_v9, %v4726_v9  ;;  %v4799_v27 = vmul.f32 %v4756_v20, %v4756_v20 }
 0x28e   :  { %6626 = vst [vmem:[#allocation16_spill] sm:$0xff] %v4759_v3  ;;  %v1176_v61 = vadd.f32 %v1175_v36, %v4762_v59  ;;  %v1181_v42 = vadd.f32 %v4759_v3, %v4699_v49  ;;  %v1010_v29 = vmul.f32 %v4759_v3, %v4759_v3  ;;  %v4803_v36 = vmul.f32 %v4762_v59, %v4762_v59 }
 0x28f   :  { %v4793_v41 = vmul.f32 %v4542_v26, %v931_v4  ;;  %v1177_v31 = vsel %vm1152_vm10, %v4767_v15, 0.0  ;;  %v1183_v51 = vsel %vm1152_vm10, %v4735_v58, 0.0  ;;  %v4812_v6 = vmul.f32 %v4767_v15, %v4767_v15 }
 0x290   :  { %v837_v56 = vpop.permute.xlu0 %836  ;;  %v1178_v63 = vadd.f32 %v1177_v31, %v1176_v61  ;;  %v1182_v49 = vadd.f32 %v1181_v42, %v4756_v20  ;;  %v6582_v31 = vrot.slane %v4779_v13, 5 }
 0x291   :  { %6627 = vst [vmem:[#allocation17_spill] sm:$0xff] %v4793_v41  ;;  %v867_v3 = vsel %vm52_vm1, %v835_v32, %v837_v56  ;;  %v868_v4 = vsel %vm52_vm1, %v837_v56, %v839_v5  ;;  %v6581_v32 = vrot.slane %v4788_v60, 5  ;;  %v4822_v56 = vmul.f32 %v4793_v41, %v4793_v41 }
 0x292   :  { %v929_v10 = vmax.f32 %v4397_v11, %v867_v3  ;;  %v4816_v12 = vmax.f32 %v4367_v22, %v868_v4  ;;  %1179 = vadd.xlane.f32.xlu0 %v1178_v63  ;;  %v1184_v61 = vadd.f32 %v1183_v51, %v1182_v49  ;;  %v1092_v5 = vrot.slane %v1010_v29, 5 }
 0x293   :  { %v1094_v22 = vrot.slane %v4799_v27, 5  ;;  %v1096_v63 = vrot.slane %v1012_v18, 5  ;;  %v1189_v42 = vsel %vm1152_vm10, %v4793_v41, 0.0 }
 0x294   :  { %6628 = vst [vmem:[#allocation18_spill] sm:$0xff] %v4816_v12  ;;  %v4826_v58 = vmul.f32 %v4539_v24, %v929_v10  ;;  %1185 = vadd.xlane.f32.xlu1 %v1184_v61  ;;  %v845_v11 = vpop.permute.xlu0 %844  ;;  %v1015_v49 = vmul.f32 %v4816_v12, %v4816_v12 }
 0x295   :  { %v870_v3 = vsel %vm52_vm1, %v4703_v47, %v845_v11  ;;  %v871_v29 = vsel %vm52_vm1, %v845_v11, %v4690_v38  ;;  %v6630_v38 = vrot.slane %v4713_v35, 5 }
 0x296   :  { %6629 = vst [vmem:[#allocation19_spill] sm:$0xff] %v4826_v58  ;;  %v1014_v10 = vmul.f32 %v4826_v58, %v4826_v58  ;;  %v933_v61 = vmax.f32 %v4403_v28, %v870_v3  ;;  %v4841_v18 = vmax.f32 %v4409_v37, %v871_v29  ;;  %v1187_v27 = vadd.f32 %v4826_v58, %v4693_v1 }
 0x297   :  { %v1091_v11 = vsel %vm1053_vm11, %v6581_v32, %v6630_v38  ;;  %v1093_v28 = vsel %vm1053_vm11, %v6582_v31, %v1092_v5  ;;  %v1102_v41 = vrot.slane %v1015_v49, 5  ;;  %v6631_v38 = vrot.slane %v4803_v36, 5 }
 0x298   :  { %v4857_v37 = vmul.f32 %v4539_v24, %v933_v61  ;;  %v1019_v3 = vmul.f32 %v4841_v18, %v4841_v18  ;;  %v841_v29 = vpop.permute.xlu0 %840  ;;  %v1188_v51 = vadd.f32 %v1187_v27, %v4816_v12  ;;  %v1100_v4 = vrot.slane %v1014_v10, 5 }
 0x299   :  { %v869_v35 = vsel %vm52_vm1, %v841_v29, %v4703_v47  ;;  %v1095_v32 = vsel %vm1053_vm11, %v6631_v38, %v1094_v22  ;;  %v6632_v31 = vrot.slane %v4812_v6, 5  ;;  %v1223_v10 = vadd.f32 %v1093_v28, %v1091_v11 }
 0x29a   :  { %v1018_v61 = vmul.f32 %v4857_v37, %v4857_v37  ;;  %v4873_v1 = vmax.f32 %v4421_v45, %v869_v35  ;;  %v1190_v27 = vadd.f32 %v1189_v42, %v1188_v51  ;;  %v1110_v12 = vrot.slane %v1019_v3, 5 }
 0x29b   :  { %v1097_v24 = vsel %vm1053_vm11, %v6632_v31, %v1096_v63  ;;  %v1101_v47 = vsel %vm1053_vm11, %v1092_v5, %v1100_v4  ;;  %v6633_v49 = vrot.slane %v4822_v56, 5  ;;  %v6634_v38 = vrot.slane %v4578_v40, 5 }
 0x29c   :  { %v1108_v58 = vrot.slane %v1018_v61, 5  ;;  %v1017_v20 = vmul.f32 %v4873_v1, %v4873_v1  ;;  %1191 = vadd.xlane.f32.xlu0 %v1190_v27  ;;  %v809_v45 = vpop.permute.xlu0 %808  ;;  %v1229_v42 = vadd.f32 %v1101_v47, %v4753_v33  ;;  %v6635_v51 = vrot.slane %v4585_v21, 5 }
 0x29d   :  { %v1105_v29 = vsel %vm1053_vm11, %v1096_v63, %v6633_v49  ;;  %v1147_v31 = vsel %vm1053_vm11, %v4857_v37, %v6634_v38  ;;  %v857_v63 = vsel %vm52_vm1, %v809_v45, %v4663_v39  ;;  %v1103_v40 = vsel %vm1053_vm11, %v1094_v22, %v1102_v41 }
 0x29e   :  { %v1146_v5 = vsel %vm1053_vm11, %v4873_v1, %v6635_v51  ;;  %v6636_v11 = vrot.slane %v4598_v0, 5  ;;  %v1106_v35 = vrot.slane %v1017_v20, 5  ;;  %v4898_v61 = vmax.f32 %v4427_v50, %v857_v63 }
 0x29f   :  { %v1193_v3 = vadd.f32 %v1147_v31, %v1146_v5  ;;  %v1230_v33 = vadd.f32 %v1229_v42, %v1103_v40  ;;  %v1109_v21 = vsel %vm1053_vm11, %v1100_v4, %v1108_v58  ;;  %v1231_v27 = vsel %vm1152_vm10, %v1105_v29, 0.0 }
 0x2a0   :  { %v1148_v28 = vsel %vm1053_vm11, %v4841_v18, %v6636_v11  ;;  %v1224_v39 = vadd.f32 %v1223_v10, %v1095_v32  ;;  %v1111_v22 = vsel %vm1053_vm11, %v1102_v41, %v1110_v12  ;;  %v1001_v0 = vmul.f32 %v4898_v61, %v4898_v61  ;;  %v815_v49 = vpop.permute.xlu0 %814 }
 0x2a1   :  { %v1194_v47 = vadd.f32 %v1193_v3, %v1148_v28  ;;  %v1232_v38 = vadd.f32 %v1231_v27, %v1230_v33  ;;  %v6637_v20 = vrot.slane %v4707_v8, 5  ;;  %v1237_v31 = vsel %vm1235_vm12, %v1109_v21, 0.0 }
 0x2a2   :  { %v859_v58 = vsel %vm52_vm1, %v4687_v30, %v815_v49  ;;  %v919_v4 = vmax.f32 %v4415_v57, %v815_v49  ;;  %v1074_v41 = vrot.slane %v1001_v0, 5  ;;  %v1169_v8 = vadd.f32 %v4722_v23, %v4898_v61 }
 0x2a3   :  { %v1107_v50 = vsel %vm1053_vm11, %v6637_v20, %v1106_v35  ;;  %v1196_v32 = vadd.f32 %v4771_v25, %v1194_v47  ;;  %v4915_v10 = vmax.f32 %v4313_v48, %v859_v58  ;;  %1233 = vadd.xlane.f32.xlu0 %v1232_v38  ;;  %v1225_v30 = vsel %vm1152_vm10, %v1097_v24, 0.0 }
 0x2a4   :  { %v1236_v12 = vsel %vm1235_vm12, %v1107_v50, 0.0  ;;  %v4920_v45 = vmul.f32 %v4542_v26, %v919_v4  ;;  %v1112_v57 = vrot.slane %v4775_v19, 5  ;;  %v6638_v25 = vrot.slane %v4744_v16, 5 }
 0x2a5   :  { %v1238_v29 = vadd.f32 %v1237_v31, %v1236_v12  ;;  %1197 = vadd.xlane.f32.xlu1 %v1196_v32  ;;  %v6639_v42 = vrot.slane %v4660_v54, 5  ;;  %v1003_v51 = vmul.f32 %v4915_v10, %v4915_v10  ;;  %v1226_v5 = vadd.f32 %v1225_v30, %v1224_v39 }
 0x2a6   :  { %v1170_v63 = vadd.f32 %v1169_v8, %v4915_v10  ;;  %v6640_v26 = vrot.slane %v4655_v53, 5  ;;  %v1171_v24 = vsel %vm1152_vm10, %v4920_v45, 0.0  ;;  %v1239_v19 = vsel %vm1235_vm12, %v1111_v22, 0.0 }
 0x2a7   :  { %v1077_v48 = vsel %vm1053_vm11, %v6639_v42, %v6638_v25  ;;  %v1004_v54 = vmul.f32 %v4920_v45, %v4920_v45  ;;  %v6641_v11 = vrot.slane %v4788_v60, 5  ;;  %1227 = vadd.xlane.f32.xlu0 %v1226_v5  ;;  %v6642_v35 = vrot.slane %v4822_v56, 5 }
 0x2a8   :  { %v1075_v40 = vsel %vm1053_vm11, %v6640_v26, %v1074_v41  ;;  %v1172_v3 = vadd.f32 %v1171_v24, %v1170_v63  ;;  %v1240_v33 = vadd.f32 %v1239_v19, %v1238_v29  ;;  %v1078_v21 = vrot.slane %v1003_v51, 5 }
 0x2a9   :  { %v1083_v28 = vsel %vm1053_vm11, %v1074_v41, %v6641_v11  ;;  %v1113_v53 = vsel %vm1053_vm11, %v6642_v35, %v1112_v57  ;;  %v1080_v27 = vrot.slane %v1004_v54, 5  ;;  %v1211_v47 = vadd.f32 %v1077_v48, %v1075_v40 }
 0x2aa   :  { %v6643_v39 = vrot.slane %v4779_v13, 5  ;;  %v6644_v22 = vmov %v6638_v25  ;;  %1173 = vadd.xlane.f32.xlu1 %v1172_v3  ;;  %v6645_v60 = vrot.slane %v4648_v17, 5  ;;  %v6646_v38 = vrot.slane %v4803_v36, 5 }
 0x2ab   :  { %v1242_v50 = vsel %vm1241_vm13, %v1113_v53, 0.0  ;;  %v6647_v31 = vrot.slane %v4644_v55, 5  ;;  %v6648_v16 = vrot.slane %v4812_v6, 5  ;;  %v6587_v29 = vmov 51  }
 0x2ac   :  { %v1085_v0 = vsel %vm1053_vm11, %v6644_v22, %v6643_v39  ;;  %v1079_v49 = vsel %vm1053_vm11, %v6645_v60, %v1078_v21  ;;  %v1087_v56 = vsel %vm1053_vm11, %v1078_v21, %v6646_v38  ;;  %v1243_v32 = vadd.f32 %v1242_v50, %v1240_v33  ;;  %3753 = vset.pattern.permute.xlu1 %v6587_v29 }
 0x2ad   :  { %v1217_v20 = vadd.f32 %v1085_v0, %v1083_v28  ;;  %v1081_v13 = vsel %vm1053_vm11, %v6647_v31, %v1080_v27  ;;  %v1212_v58 = vadd.f32 %v1211_v47, %v1079_v49  ;;  %v1089_v4 = vsel %vm1053_vm11, %v1080_v27, %v6648_v16  ;;  %3754 = vset.pattern.permute.xlu0 %v6587_v29 }
 0x2ae   :  { %v1213_v17 = vsel %vm1152_vm10, %v1081_v13, 0.0  ;;  %v1219_v36 = vsel %vm1152_vm10, %v1089_v4, 0.0  ;;  %1244 = vadd.xlane.f32.xlu1 %v1243_v32 }
 0x2af   :  { %v1218_v12 = vadd.f32 %v1217_v20, %v1087_v56  ;;  %v1214_v41 = vadd.f32 %v1213_v17, %v1212_v58 }
 0x2b1   :  { %1215 = vadd.xlane.f32.xlu0 %v1214_v41  ;;  %v1220_v8 = vadd.f32 %v1219_v36, %v1218_v12 }
 0x2b3   :  { %1221 = vadd.xlane.f32.xlu1 %v1220_v8 }
 0x2e1   :  { %v1156_v55 = vpop.xlane.xlu1 %1155 }
 0x2e2   :  { %v4968_v6 = vmul.f32 0.0028409092, %v1156_v55 }
 0x2e4   :  { %v1261_v25 = vmul.f32 %v4968_v6, %v4968_v6 }
 0x2e6   :  { %v1277_v5 = vrot.slane %v1261_v25, 5 }
 0x2e9   :  { %v1162_v30 = vpop.xlane.xlu0 %1161 }
 0x2ea   :  { %v4970_v57 = vmul.f32 0.0028409092, %v1162_v30 }
 0x2ec   :  { %v1262_v42 = vmul.f32 %v4970_v57, %v4970_v57 }
 0x2ee   :  { %v1204_v48 = vpop.xlane.xlu1 %1203  ;;  %v1278_v51 = vrot.slane %v1262_v42, 5 }
 0x2ef   :  { %v1254_v63 = vmul.f32 0.0028409092, %v1204_v48 }
 0x2f0   :  { %v1279_v26 = vsel %vm1053_vm11, %v1277_v5, %v1278_v51 }
 0x2f1   :  { %v1301_v19 = vsub.f32 %v1254_v63, %v1279_v26 }
 0x2f3   :  { %v1168_v40 = vpop.xlane.xlu0 %1167  ;;  %v1309_v3 = vadd.f32 1e-05, %v1301_v19 }
 0x2f4   :  { %v4977_v24 = vmul.f32 0.0028409092, %v1168_v40 }
 0x2f5   :  { %3840 = vrsqrt.f32 %v1309_v3 }
 0x2f6   :  { %v1263_v54 = vmul.f32 %v4977_v24, %v4977_v24 }
 0x2f8   :  { %v1280_v11 = vrot.slane %v1263_v54, 5  ;;  %v1210_v28 = vpop.xlane.xlu0 %1209 }
 0x2f9   :  { %v1255_v35 = vmul.f32 0.0028409092, %v1210_v28 }
 0x2fa   :  { %v1281_v53 = vsel %vm1053_vm11, %v1278_v51, %v1280_v11 }
 0x2fb   :  { %v1302_v33 = vsub.f32 %v1255_v35, %v1281_v53 }
 0x2fd   :  { %v1310_v21 = vadd.f32 1e-05, %v1302_v33 }
 0x2ff   :  { %3842 = vrsqrt.f32 %v1310_v21 }
 0x302   :  { %v4982_v27 = vpop.eup %3840 }
 0x303   :  { %v1334_v39 = vrot.slane %v4982_v27, 3 }
 0x30c   :  { %v4984_v47 = vpop.eup %3842 }
 0x30d   :  { %v1336_v22 = vrot.slane %v4984_v47, 3  ;;  %v3915_v47 = vld [vmem:[%s6551_s1 + $0x28] sm:$0xff] }
 0x30f   :  { %v1337_v0 = vsel %vm1332_vm14, %v1334_v39, %v1336_v22 }
 0x310   :  { %1350 = vrot.lane.b32.xlu0 %v1337_v0, %s3952_s27 }
 0x31b   :  { %v1180_v49 = vpop.xlane.xlu0 %1179 }
 0x31c   :  { %v4998_v31 = vmul.f32 0.0028409092, %v1180_v49 }
 0x31d   :  { %v1186_v60 = vpop.xlane.xlu1 %1185 }
 0x31e   :  { %v4992_v38 = vmul.f32 0.0028409092, %v1186_v60  ;;  %v1265_v32 = vmul.f32 %v4998_v31, %v4998_v31 }
 0x320   :  { %v1266_v50 = vmul.f32 %v4992_v38, %v4992_v38  ;;  %v1284_v55 = vrot.slane %v1265_v32, 5 }
 0x322   :  { %v1286_v58 = vrot.slane %v1266_v50, 5 }
 0x324   :  { %v1287_v51 = vsel %vm1053_vm11, %v1284_v55, %v1286_v58 }
 0x325   :  { %v1192_v56 = vpop.xlane.xlu0 %1191 }
 0x326   :  { %v4994_v20 = vmul.f32 0.0028409092, %v1192_v56 }
 0x328   :  { %v1267_v13 = vmul.f32 %v4994_v20, %v4994_v20 }
 0x32a   :  { %v1288_v16 = vrot.slane %v1267_v13, 5 }
 0x32c   :  { %v1234_v4 = vpop.xlane.xlu0 %1233  ;;  %v1289_v17 = vsel %vm1053_vm11, %v1286_v58, %v1288_v16 }
 0x32d   :  { %v1259_v12 = vmul.f32 0.0028409092, %v1234_v4 }
 0x32e   :  { %v1198_v41 = vpop.xlane.xlu1 %1197 }
 0x32f   :  { %v5005_v36 = vmul.f32 0.0028409092, %v1198_v41  ;;  %v1306_v8 = vsub.f32 %v1259_v12, %v1289_v17 }
 0x330   :  { %v1228_v30 = vpop.xlane.xlu0 %1227 }
 0x331   :  { %v1300_v25 = vsub.f32 %v5005_v36, %v1277_v5  ;;  %v1314_v42 = vadd.f32 1e-05, %v1306_v8  ;;  %v1258_v48 = vmul.f32 0.0028409092, %v1228_v30  ;;  %v1268_v0 = vmul.f32 %v5005_v36, %v5005_v36 }
 0x333   :  { %v1174_v63 = vpop.xlane.xlu1 %1173  ;;  %v1308_v26 = vadd.f32 1e-05, %v1300_v25  ;;  %v1305_v40 = vsub.f32 %v1258_v48, %v1287_v51  ;;  %v1290_v13 = vrot.slane %v1268_v0, 5  ;;  %v3920_v0 = vld [vmem:[%s6551_s1 + $0x48] sm:$0xff] }
 0x334   :  { %v5009_v19 = vmul.f32 0.0028409092, %v1174_v63 }
 0x335   :  { %3844 = vrsqrt.f32 %v1308_v26  ;;  %v1313_v54 = vadd.f32 1e-05, %v1305_v40 }
 0x336   :  { %3846 = vrsqrt.f32 %v1314_v42  ;;  %v1264_v28 = vmul.f32 %v5009_v19, %v5009_v19 }
 0x337   :  { %v1245_v3 = vpop.xlane.xlu1 %1244  ;;  %3848 = vrsqrt.f32 %v1313_v54 }
 0x338   :  { %v1282_v35 = vrot.slane %v1264_v28, 5  ;;  %v1260_v4 = vmul.f32 0.0028409092, %v1245_v3  ;;  %v3914_v28 = vld [vmem:[%s6551_s1 + $0x18] sm:$0xff] }
 0x33a   :  { %v1216_v53 = vpop.xlane.xlu0 %1215  ;;  %v1283_v33 = vsel %vm1053_vm11, %v1280_v11, %v1282_v35  ;;  %v1285_v56 = vsel %vm1053_vm11, %v1282_v35, %v1284_v55  ;;  %v1291_v11 = vsel %vm1053_vm11, %v1288_v16, %v1290_v13  ;;  %v6589_v35 = vmov 50  }
 0x33b   :  { %v1256_v5 = vmul.f32 0.0028409092, %v1216_v53  ;;  %v1307_v8 = vsub.f32 %v1260_v4, %v1291_v11 }
 0x33c   :  { %v1222_v27 = vpop.xlane.xlu1 %1221 }
 0x33d   :  { %v1303_v21 = vsub.f32 %v1256_v5, %v1283_v33  ;;  %v1257_v60 = vmul.f32 0.0028409092, %v1222_v27  ;;  %v1315_v55 = vadd.f32 1e-05, %v1307_v8  ;;  %v3916_v5 = vld [vmem:[%s6551_s1 + $0x8] sm:$0xff]  ;;  %v3919_v27 = vld [vmem:[%s6551_s1 + $0x58] sm:$0xff] }
 0x33e   :  { %v3917_v33 = vld [vmem:[%s6551_s1 + $0x68] sm:$0xff] }
 0x33f   :  { %v1311_v49 = vadd.f32 1e-05, %v1303_v21  ;;  %v1304_v50 = vsub.f32 %v1257_v60, %v1285_v56  ;;  %v3918_v21 = vld [vmem:[%s6551_s1 + $0x78] sm:$0x7] }
 0x340   :  { %v3921_v60 = vld [vmem:[%s6551_s1 + $0x38] sm:$0xff] }
 0x341   :  { %3850 = vrsqrt.f32 %v1311_v49  ;;  %v1312_v58 = vadd.f32 1e-05, %v1304_v50 }
 0x342   :  { %v3845_v32 = vpop.eup %3844 }
 0x343   :  { %3852 = vrsqrt.f32 %v1312_v58  ;;  %v3847_v17 = vpop.eup %3846  ;;  %v1333_v12 = vrot.slane %v3845_v32, 3 }
 0x344   :  { %v3849_v41 = vpop.eup %3848  ;;  %v1344_v42 = vrot.slane %v3847_v17, 3  ;;  %3854 = vrsqrt.f32 %v1315_v55 }
 0x345   :  { %v1335_v30 = vsel %vm1332_vm14, %v1333_v12, %v1334_v39  ;;  %v1342_v25 = vrot.slane %v3849_v41, 3 }
 0x347   :  { %v1345_v48 = vsel %vm1332_vm14, %v1342_v25, %v1344_v42 }
 0x348   :  { %1358 = vrot.lane.b32.xlu0 %v1345_v48, %s3952_s27  ;;  %v6649_v48 = vmov 49  }
 0x34e   :  { %v3851_v51 = vpop.eup %3850 }
 0x34f   :  { %v1338_v63 = vrot.slane %v3851_v51, 3 }
 0x350   :  { %v3853_v26 = vpop.eup %3852 }
 0x351   :  { %v1339_v40 = vsel %vm1332_vm14, %v1336_v22, %v1338_v63  ;;  %v1340_v16 = vrot.slane %v3853_v26, 3  ;;  %v3855_v3 = vpop.eup %3854 }
 0x352   :  { %v1346_v22 = vrot.slane %v3855_v3, 3  ;;  %v1385_v3 = vsub.f32 %v4574_v46, %v4970_v57  ;;  %v1391_v46 = vsub.f32 %v4615_v52, %v4977_v24  ;;  %v1394_v52 = vsub.f32 %v4915_v10, %v5009_v19 }
 0x353   :  { %v1343_v54 = vsel %vm1332_vm14, %v1340_v16, %v1342_v25  ;;  %v1341_v39 = vsel %vm1332_vm14, %v1338_v63, %v1340_v16  ;;  %v1392_v10 = vsub.f32 %v4898_v61, %v5009_v19 }
 0x354   :  { %1356 = vrot.lane.b32.xlu1 %v1343_v54, %s3952_s27  ;;  %1354 = vrot.lane.b32.xlu0 %v1341_v39, %s3952_s27  ;;  %v1347_v53 = vsel %vm1332_vm14, %v1344_v42, %v1346_v22 }
 0x358   :  { %1348 = vrot.lane.b32.xlu1 %v1335_v30, %s3952_s27  ;;  %1489 = vperm.xlu0 %3754, %v3914_v28  }
 0x35c   :  { %1352 = vrot.lane.b32.xlu1 %v1339_v40, %s3952_s27  ;;  %1493 = vperm.xlu0 %3754, %v3915_v47  }
 0x360   :  { %1362 = vrot.lane.b32.xlu1 %v1346_v22, %s3952_s27  ;;  %3756 = vset.pattern.permute.xlu0 %v6589_v35 }
 0x364   :  { %1360 = vrot.lane.b32.xlu1 %v1347_v53, %s3952_s27 }
 0x368   :  { %1485 = vperm.xlu1 %3753, %v3916_v5  }
 0x36c   :  { %1509 = vperm.xlu1 %3753, %v3917_v33  }
 0x370   :  { %1513 = vperm.xlu1 %3753, %v3918_v21  }
 0x374   :  { %1505 = vperm.xlu1 %3753, %v3919_v27  }
 0x378   :  { %1501 = vperm.xlu1 %3753, %v3920_v0  }
 0x37c   :  { %1497 = vperm.xlu1 %3753, %v3921_v60  }
 0x380   :  { %3755 = vset.pattern.permute.xlu1 %v6589_v35 }
 0x382   :  { %v1351_v49 = vpop.permute.xlu0 %1350 }
 0x383   :  { %v1373_v56 = vmul.f32 %v3914_v28, %v1351_v49 }
 0x385   :  { %1419 = vperm.xlu1 %3755, %v1373_v56  }
 0x3ba   :  { %v1359_v4 = vpop.permute.xlu0 %1358 }
 0x3bb   :  { %v1377_v42 = vmul.f32 %v3919_v27, %v1359_v4  ;;  %v1389_v27 = vsub.f32 %v4651_v44, %v4977_v24 }
 0x3c6   :  { %v1357_v50 = vpop.permute.xlu1 %1356  ;;  %v1355_v12 = vpop.permute.xlu0 %1354 }
 0x3c7   :  { %v1376_v13 = vmul.f32 %v3920_v0, %v1357_v50  ;;  %v1375_v41 = vmul.f32 %v3921_v60, %v1355_v12  ;;  %v1390_v0 = vsub.f32 %v4622_v14, %v4977_v24 }
 0x3c9   :  { %1434 = vperm.xlu1 %3755, %v1376_v13  }
 0x3ca   :  { %v1349_v58 = vpop.permute.xlu1 %1348 }
 0x3cb   :  { %v1372_v30 = vmul.f32 %v3916_v5, %v1349_v58 }
 0x3ce   :  { %v1353_v32 = vpop.permute.xlu1 %1352 }
 0x3cf   :  { %v1374_v17 = vmul.f32 %v3915_v47, %v1353_v32  ;;  %v1386_v47 = vsub.f32 %v4567_v43, %v4970_v57  ;;  %v1384_v43 = vsub.f32 %v4594_v62, %v4970_v57  ;;  %v1393_v62 = vsub.f32 %v4722_v23, %v5009_v19 }
 0x3d1   :  { %1424 = vperm.xlu0 %3756, %v1374_v17  }
 0x3d2   :  { %v1363_v11 = vpop.permute.xlu1 %1362 }
 0x3d3   :  { %v1379_v55 = vmul.f32 %v3918_v21, %v1363_v11  ;;  %v1490_v39 = vpop.permute.xlu0 %1489  ;;  %v1388_v21 = vsub.f32 %v4636_v34, %v4977_v24 }
 0x3d5   :  { %1429 = vperm.xlu0 %3756, %v1375_v41  }
 0x3d6   :  { %v1361_v8 = vpop.permute.xlu1 %1360 }
 0x3d7   :  { %v1378_v25 = vmul.f32 %v3917_v33, %v1361_v8  ;;  %v1494_v5 = vpop.permute.xlu0 %1493  ;;  %v1387_v33 = vsub.f32 %v4563_v2, %v4970_v57  ;;  %v1395_v57 = vsub.f32 %v4920_v45, %v5009_v19 }
 0x3d9   :  { %1444 = vperm.xlu1 %3755, %v1378_v25   ;;  %1414 = vperm.xlu0 %3756, %v1372_v30  }
 0x3dd   :  { %1439 = vperm.xlu0 %3756, %v1377_v42   ;;  %3758 = vset.pattern.permute.xlu1 %v6649_v48 }
 0x3e1   :  { %1449 = vperm.xlu0 %3756, %v1379_v55  }
 0x3e3   :  { %v5061_v51 = vpop.permute.xlu1 %1485 }
 0x3e5   :  { %3757 = vset.pattern.permute.xlu0 %v6649_v48 }
 0x3e7   :  { %v5063_v63 = vpop.permute.xlu1 %1509 }
 0x3eb   :  { %v5065_v26 = vpop.permute.xlu1 %1513 }
 0x3ef   :  { %v5067_v40 = vpop.permute.xlu1 %1505 }
 0x3f3   :  { %v5069_v16 = vpop.permute.xlu1 %1501 }
 0x3f7   :  { %v1498_v54 = vpop.permute.xlu1 %1497 }
 0x400   :  { %v1420_v28 = vpop.permute.xlu1 %1419 }
 0x401   :  { %v1457_v22 = vmul.f32 %v1420_v28, %v1385_v3  ;;  %v1458_v53 = vmul.f32 %v1420_v28, %v1386_v47  ;;  %v1459_v60 = vmul.f32 %v1420_v28, %v1387_v33  ;;  %v1456_v44 = vmul.f32 %v1420_v28, %v1384_v43 }
 0x402   :  { %v1398_v33 = vsub.f32 %v4762_v59, %v4998_v31 }
 0x403   :  { %v5087_v49 = vadd.f32 %v1490_v39, %v1457_v22  ;;  %v5089_v56 = vadd.f32 %v1490_v39, %v1458_v53  ;;  %v5103_v17 = vadd.f32 %v1490_v39, %v1459_v60  ;;  %v5111_v42 = vadd.f32 %v1490_v39, %v1456_v44 }
 0x405   :  { %6650 = vst [vmem:[#allocation20_spill] sm:$0xff] %v5087_v49  ;;  %6651 = vst [vmem:[#allocation21_spill] sm:$0xff] %v5089_v56  ;;  %v1594_v11 = vrot.slane %v5089_v56, 5  ;;  %v1592_v41 = vrot.slane %v5087_v49, 5  ;;  %v1596_v61 = vrot.slane %v5103_v17, 5 }
 0x406   :  { %6654 = vst [vmem:[#allocation24_spill] sm:$0xff] %v5103_v17  ;;  %6655 = vst [vmem:[#allocation25_spill] sm:$0xff] %v5111_v42 }
 0x444   :  { %v1435_v19 = vpop.permute.xlu1 %1434 }
 0x445   :  { %v1470_v60 = vmul.f32 %v1435_v19, %v1398_v33 }
 0x44c   :  { %v1425_v2 = vpop.permute.xlu0 %1424 }
 0x44d   :  { %v1460_v50 = vmul.f32 %v1425_v2, %v1388_v21  ;;  %v1461_v34 = vmul.f32 %v1425_v2, %v1389_v27  ;;  %v1462_v13 = vmul.f32 %v1425_v2, %v1390_v0  ;;  %v1463_v58 = vmul.f32 %v1425_v2, %v1391_v46 }
 0x44e   :  { %v1397_v0 = vsub.f32 %v4732_v7, %v4998_v31 }
 0x44f   :  { %v5091_v4 = vadd.f32 %v1494_v5, %v1461_v34  ;;  %v5093_v14 = vadd.f32 %v1494_v5, %v1462_v13  ;;  %v5095_v32 = vadd.f32 %v1494_v5, %v1463_v58  ;;  %v5105_v12 = vadd.f32 %v1494_v5, %v1460_v50 }
 0x450   :  { %v1430_v24 = vpop.permute.xlu0 %1429  ;;  %v1590_v5 = vrot.slane %v5111_v42, 5  ;;  %v1469_v50 = vmul.f32 %v1435_v19, %v1397_v0  ;;  %v1399_v34 = vsub.f32 %v4767_v15, %v4998_v31  ;;  %v1396_v13 = vsub.f32 %v4726_v9, %v4998_v31  ;;  %v6657_v9 = vld [vmem:[#allocation10_spill] sm:$0xff]  ;;  %v6660_v0 = vld [vmem:[#allocation8_spill] sm:$0xff] }
 0x451   :  { %6652 = vst [vmem:[#allocation22_spill] sm:$0xff] %v5093_v14  ;;  %6653 = vst [vmem:[#allocation23_spill] sm:$0xff] %v5095_v32  ;;  %v1465_v8 = vmul.f32 %v1430_v24, %v1393_v62  ;;  %v1466_v30 = vmul.f32 %v1430_v24, %v1394_v52  ;;  %v1602_v25 = vrot.slane %v5093_v14, 5  ;;  %v1600_v23 = vrot.slane %v5091_v4, 5 }
 0x452   :  { %v1467_v45 = vmul.f32 %v1430_v24, %v1395_v57  ;;  %v1604_v3 = vrot.slane %v5095_v32, 5  ;;  %v1464_v47 = vmul.f32 %v1430_v24, %v1392_v10  ;;  %v1598_v39 = vrot.slane %v5105_v12, 5 }
 0x453   :  { %v1603_v55 = vsel %vm1053_vm11, %v1594_v11, %v1602_v25  ;;  %v1601_v28 = vsel %vm1053_vm11, %v1592_v41, %v1600_v23  ;;  %v5124_v22 = vadd.f32 %v1498_v54, %v1465_v8  ;;  %v5126_v53 = vadd.f32 %v1498_v54, %v1466_v30 }
 0x454   :  { %1666 = vrot.lane.b32.xlu1 %v1603_v55, %s3947_s19  ;;  %1664 = vrot.lane.b32.xlu0 %v1601_v28, %s3947_s19  ;;  %v5133_v21 = vadd.f32 %v1498_v54, %v1467_v45  ;;  %v1605_v27 = vsel %vm1053_vm11, %v1596_v61, %v1604_v3  ;;  %v5140_v46 = vadd.f32 %v1498_v54, %v1464_v47  ;;  %v1415_v24 = vpop.permute.xlu0 %1414 }
 0x455   :  { %6656 = vst [vmem:[#allocation26_spill] sm:$0xff] %v5126_v53  ;;  %v1599_v43 = vsel %vm1053_vm11, %v1590_v5, %v1598_v39  ;;  %v1610_v59 = vrot.slane %v5126_v53, 5  ;;  %v1608_v2 = vrot.slane %v5124_v22, 5  ;;  %v1471_v62 = vmul.f32 %v1435_v19, %v1399_v34 }
 0x456   :  { %v1612_v54 = vrot.slane %v5133_v21, 5  ;;  %v1606_v44 = vrot.slane %v5140_v46, 5  ;;  %v5159_v52 = vadd.f32 %v5069_v16, %v1470_v60  ;;  %v1468_v15 = vmul.f32 %v1435_v19, %v1396_v13  ;;  %v6659_v19 = vld [vmem:[#allocation9_spill] sm:$0xff] }
 0x457   :  { %v1611_v7 = vsel %vm1053_vm11, %v1602_v25, %v1610_v59  ;;  %v1609_v58 = vsel %vm1053_vm11, %v1600_v23, %v1608_v2  ;;  %v5163_v57 = vadd.f32 %v5069_v16, %v1469_v50  ;;  %v1382_v31 = vsub.f32 %v6657_v9, %v4968_v6  ;;  %v6658_v23 = vld [vmem:[#allocation7_spill] sm:$0xff] }
 0x458   :  { %1668 = vrot.lane.b32.xlu1 %v1605_v27, %s3947_s19  ;;  %1662 = vrot.lane.b32.xlu0 %v1599_v43, %s3947_s19  ;;  %v1613_v8 = vsel %vm1053_vm11, %v1604_v3, %v1612_v54  ;;  %v1607_v30 = vsel %vm1053_vm11, %v1598_v39, %v1606_v44  ;;  %v5171_v25 = vadd.f32 %v5069_v16, %v1471_v62  ;;  %v1618_v45 = vrot.slane %v5159_v52, 5 }
 0x459   :  { %v1381_v10 = vsub.f32 %v6658_v23, %v4968_v6  ;;  %v5178_v55 = vadd.f32 %v5069_v16, %v1468_v15  ;;  %v1454_v28 = vmul.f32 %v1415_v24, %v1382_v31  ;;  %v1616_v3 = vrot.slane %v5163_v57, 5  ;;  %v6666_v23 = vld [vmem:[#allocation12_spill] sm:$0xff] }
 0x45a   :  { %v1619_v39 = vsel %vm1053_vm11, %v1610_v59, %v1618_v45  ;;  %v1383_v33 = vsub.f32 %v6659_v19, %v4968_v6  ;;  %v1380_v43 = vsub.f32 %v6660_v0, %v4968_v6  ;;  %v1620_v16 = vrot.slane %v5171_v25, 5 }
 0x45b   :  { %v1453_v47 = vmul.f32 %v1415_v24, %v1381_v10  ;;  %v1617_v27 = vsel %vm1053_vm11, %v1608_v2, %v1616_v3  ;;  %v5193_v50 = vadd.f32 %v5061_v51, %v1454_v28  ;;  %v1614_v59 = vrot.slane %v5178_v55, 5 }
 0x45c   :  { %1674 = vrot.lane.b32.xlu1 %v1611_v7, %s3947_s19  ;;  %1672 = vrot.lane.b32.xlu0 %v1609_v58, %s3947_s19  ;;  %v1455_v60 = vmul.f32 %v1415_v24, %v1383_v33  ;;  %v1452_v34 = vmul.f32 %v1415_v24, %v1380_v43  ;;  %v1621_v2 = vsel %vm1053_vm11, %v1612_v54, %v1620_v16  ;;  %v1440_v24 = vpop.permute.xlu0 %1439  ;;  %v6667_v33 = vld [vmem:[#allocation15_spill] sm:$0xff]  ;;  %v1772_v0 = vrot.slane %v5087_v49, 2 }
 0x45d   :  { %6661 = vst [vmem:[#allocation10_spill] sm:$0xff] %v5193_v50  ;;  %v5197_v7 = vadd.f32 %v5061_v51, %v1453_v47  ;;  %v1615_v6 = vsel %vm1053_vm11, %v1606_v44, %v1614_v59  ;;  %v1768_v58 = vrot.slane %v5193_v50, 2  ;;  %v1400_v10 = vsub.f32 %v6666_v23, %v4992_v38 }
 0x45e   :  { %v5206_v13 = vadd.f32 %v5061_v51, %v1455_v60  ;;  %v5210_v62 = vadd.f32 %v5061_v51, %v1452_v34  ;;  %v1588_v51 = vrot.slane %v5193_v50, 5  ;;  %v1770_v43 = vrot.slane %v5111_v42, 2 }
 0x45f   :  { %6662 = vst [vmem:[#allocation7_spill] sm:$0xff] %v5197_v7  ;;  %v1767_v15 = vrot.slane %v5197_v7, 2  ;;  %v1587_v31 = vrot.slane %v5197_v7, 5  ;;  %v1774_v23 = vrot.slane %v5089_v56, 2 }
 0x460   :  { %1676 = vrot.lane.b32.xlu1 %v1613_v8, %s3947_s19  ;;  %1670 = vrot.lane.b32.xlu0 %v1607_v30, %s3947_s19  ;;  %6663 = vst [vmem:[#allocation9_spill] sm:$0xff] %v5206_v13  ;;  %6664 = vst [vmem:[#allocation8_spill] sm:$0xff] %v5210_v62  ;;  %v1769_v54 = vrot.slane %v5206_v13, 2  ;;  %v1766_v44 = vrot.slane %v5210_v62, 2  ;;  %v6665_v8 = vld [vmem:[#allocation16_spill] sm:$0xff]  ;;  %v1589_v28 = vrot.slane %v5206_v13, 5 }
 0x461   :  { %v1401_v9 = vsub.f32 %v6665_v8, %v4992_v38  ;;  %v1586_v47 = vrot.slane %v5210_v62, 5  ;;  %v1773_v34 = vsel %vm1235_vm12, %v1767_v15, %v1772_v0 }
 0x463   :  { %v1473_v30 = vmul.f32 %v1440_v24, %v1401_v9  ;;  %v6668_v9 = vld [vmem:[#allocation14_spill] sm:$0xff] }
 0x464   :  { %1682 = vrot.lane.b32.xlu1 %v1619_v39, %s3947_s19  ;;  %1680 = vrot.lane.b32.xlu0 %v1617_v27, %s3947_s19  ;;  %v1472_v39 = vmul.f32 %v1440_v24, %v1400_v10  ;;  %v1402_v27 = vsub.f32 %v6667_v33, %v4992_v38  ;;  %v1776_v33 = vrot.slane %v5103_v17, 2 }
 0x465   :  { %v5230_v19 = vadd.f32 %v5067_v40, %v1473_v30  ;;  %v1403_v30 = vsub.f32 %v6668_v9, %v4992_v38 }
 0x466   :  { %v1474_v60 = vmul.f32 %v1440_v24, %v1402_v27  ;;  %v1777_v27 = vsel %vm1235_vm12, %v1769_v54, %v1776_v33 }
 0x467   :  { %v1624_v8 = vrot.slane %v5230_v19, 5  ;;  %v1475_v10 = vmul.f32 %v1440_v24, %v1403_v30  ;;  %v1794_v30 = vrot.slane %v5178_v55, 2 }
 0x468   :  { %1684 = vrot.lane.b32.xlu1 %v1621_v2, %s3947_s19  ;;  %1678 = vrot.lane.b32.xlu0 %v1615_v6, %s3947_s19  ;;  %v5242_v2 = vadd.f32 %v5067_v40, %v1472_v39  ;;  %v1771_v6 = vsel %vm1235_vm12, %v1766_v44, %v1770_v43  ;;  %v1775_v39 = vsel %vm1235_vm12, %v1768_v58, %v1774_v23 }
 0x469   :  { %v5267_v24 = vadd.f32 %v5067_v40, %v1475_v10  ;;  %v1445_v10 = vpop.permute.xlu1 %1444 }
 0x46a   :  { %v1622_v38 = vrot.slane %v5242_v2, 5 }
 0x46c   :  { %1830 = vrot.lane.b32.xlu1 %v1768_v58, %s3948_s20  ;;  %1828 = vrot.lane.b32.xlu0 %v1767_v15, %s3948_s20  ;;  %v5254_v15 = vadd.f32 %v5067_v40, %v1474_v60  ;;  %v1628_v60 = vrot.slane %v5267_v24, 5 }
 0x46e   :  { %v1626_v58 = vrot.slane %v5254_v15, 5 }
 0x470   :  { %1832 = vrot.lane.b32.xlu1 %v1769_v54, %s3948_s20  ;;  %1826 = vrot.lane.b32.xlu0 %v1766_v44, %s3948_s20  ;;  %v1625_v44 = vsel %vm1053_vm11, %v1616_v3, %v1624_v8  ;;  %v1623_v3 = vsel %vm1053_vm11, %v1614_v59, %v1622_v38  ;;  %v1627_v40 = vsel %vm1053_vm11, %v1618_v45, %v1626_v58 }
 0x471   :  { %v1593_v54 = vsel %vm1053_vm11, %v1587_v31, %v1592_v41  ;;  %v1629_v59 = vsel %vm1053_vm11, %v1620_v16, %v1628_v60  ;;  %v1591_v45 = vsel %vm1053_vm11, %v1586_v47, %v1590_v5  ;;  %v1409_v41 = vsub.f32 %v4857_v37, %v5005_v36 }
 0x472   :  { %v1595_v16 = vsel %vm1053_vm11, %v1588_v51, %v1594_v11  ;;  %v1408_v37 = vsub.f32 %v4873_v1, %v5005_v36  ;;  %v1410_v1 = vsub.f32 %v4841_v18, %v5005_v36 }
 0x474   :  { %1650 = vrot.lane.b32.xlu1 %v1588_v51, %s3947_s19  ;;  %1648 = vrot.lane.b32.xlu0 %v1587_v31, %s3947_s19  ;;  %v1796_v31 = vrot.slane %v5163_v57, 2  ;;  %v1597_v51 = vsel %vm1053_vm11, %v1589_v28, %v1596_v61  ;;  %v1798_v61 = vrot.slane %v5159_v52, 2 }
 0x478   :  { %1652 = vrot.lane.b32.xlu1 %v1589_v28, %s3947_s19  ;;  %1646 = vrot.lane.b32.xlu0 %v1586_v47, %s3947_s19  ;;  %v1802_v47 = vrot.slane %v5242_v2, 2 }
 0x47c   :  { %1836 = vrot.lane.b32.xlu1 %v1773_v34, %s3948_s20  ;;  %1834 = vrot.lane.b32.xlu0 %v1771_v6, %s3948_s20  ;;  %v1450_v34 = vpop.permute.xlu0 %1449  ;;  %v1804_v6 = vrot.slane %v5230_v19, 2 }
 0x47d   :  { %v1481_v9 = vmul.f32 %v1450_v34, %v1409_v41  ;;  %v1808_v41 = vrot.slane %v5267_v24, 2 }
 0x47e   :  { %v1805_v5 = vsel %vm1235_vm12, %v1796_v31, %v1804_v6 }
 0x47f   :  { %v5318_v11 = vadd.f32 %v5065_v26, %v1481_v9  ;;  %v6670_v9 = vld [vmem:[#allocation11_spill] sm:$0xff] }
 0x480   :  { %1838 = vrot.lane.b32.xlu1 %v1775_v39, %s3948_s20  ;;  %1688 = vrot.lane.b32.xlu0 %v1625_v44, %s3947_s19  ;;  %v1480_v39 = vmul.f32 %v1450_v34, %v1408_v37  ;;  %v1806_v44 = vrot.slane %v5254_v15, 2 }
 0x482   :  { %v1807_v18 = vsel %vm1235_vm12, %v1798_v61, %v1806_v44 }
 0x484   :  { %1840 = vrot.lane.b32.xlu1 %v1777_v27, %s3948_s20  ;;  %1686 = vrot.lane.b32.xlu0 %v1623_v3, %s3947_s19  ;;  %v6669_v27 = vld [vmem:[#allocation19_spill] sm:$0xff] }
 0x485   :  { %v1405_v3 = vsub.f32 %v6669_v27, %v4994_v20 }
 0x487   :  { %v1477_v28 = vmul.f32 %v1445_v10, %v1405_v3 }
 0x488   :  { %1690 = vrot.lane.b32.xlu1 %v1627_v40, %s3947_s19  ;;  %1656 = vrot.lane.b32.xlu0 %v1593_v54, %s3947_s19  ;;  %v1803_v40 = vsel %vm1235_vm12, %v1794_v30, %v1802_v47  ;;  %v1482_v54 = vmul.f32 %v1450_v34, %v1410_v1 }
 0x489   :  { %v5356_v27 = vadd.f32 %v5063_v63, %v1477_v28 }
 0x48a   :  { %v5359_v1 = vadd.f32 %v5065_v26, %v1482_v54 }
 0x48c   :  { %1692 = vrot.lane.b32.xlu1 %v1629_v59, %s3947_s19  ;;  %1654 = vrot.lane.b32.xlu0 %v1591_v45, %s3947_s19  ;;  %v5337_v59 = vadd.f32 %v5065_v26, %v1480_v39  ;;  %v1820_v45 = vrot.slane %v5318_v11, 2  ;;  %v1800_v39 = vrot.slane %v5171_v25, 2  ;;  %v1822_v54 = vrot.slane %v5359_v1, 2 }
 0x48e   :  { %v1638_v29 = vrot.slane %v5337_v59, 5 }
 0x490   :  { %1658 = vrot.lane.b32.xlu1 %v1595_v16, %s3947_s19  ;;  %1868 = vrot.lane.b32.xlu0 %v1805_v5, %s3948_s20  ;;  %v1404_v16 = vsub.f32 %v6670_v9, %v4994_v20  ;;  %v6671_v5 = vld [vmem:[#allocation13_spill] sm:$0xff] }
 0x491   :  { %v1411_v37 = vsub.f32 %v6671_v5, %v5005_v36  ;;  %v1809_v36 = vsel %vm1235_vm12, %v1800_v39, %v1808_v41 }
 0x493   :  { %v1483_v3 = vmul.f32 %v1450_v34, %v1411_v37  ;;  %v1632_v37 = vrot.slane %v5356_v27, 5 }
 0x494   :  { %1660 = vrot.lane.b32.xlu1 %v1597_v51, %s3947_s19  ;;  %1866 = vrot.lane.b32.xlu0 %v1803_v40, %s3948_s20  ;;  %v1476_v51 = vmul.f32 %v1445_v10, %v1404_v16  ;;  %v6672_v40 = vld [vmem:[#allocation18_spill] sm:$0xff]  ;;  %v1640_v16 = vrot.slane %v5318_v11, 5 }
 0x495   :  { %v1406_v9 = vsub.f32 %v6672_v40, %v4994_v20  ;;  %v5376_v28 = vadd.f32 %v5065_v26, %v1483_v3  ;;  %v6673_v40 = vld [vmem:[#allocation17_spill] sm:$0xff] }
 0x496   :  { %v5373_v34 = vadd.f32 %v5063_v63, %v1476_v51 }
 0x497   :  { %v1478_v5 = vmul.f32 %v1445_v10, %v1406_v9  ;;  %v1641_v9 = vsel %vm1053_vm11, %v1632_v37, %v1640_v16  ;;  %v1824_v26 = vrot.slane %v5376_v28, 2 }
 0x498   :  { %1870 = vrot.lane.b32.xlu1 %v1807_v18, %s3948_s20  ;;  %1892 = vrot.lane.b32.xlu0 %v1820_v45, %s3948_s20  ;;  %v1818_v18 = vrot.slane %v5337_v59, 2  ;;  %v1630_v3 = vrot.slane %v5373_v34, 5 }
 0x499   :  { %v5388_v35 = vadd.f32 %v5063_v63, %v1478_v5 }
 0x49a   :  { %v1639_v16 = vsel %vm1053_vm11, %v1630_v3, %v1638_v29 }
 0x49c   :  { %1872 = vrot.lane.b32.xlu1 %v1809_v36, %s3948_s20  ;;  %1890 = vrot.lane.b32.xlu0 %v1818_v18, %s3948_s20  ;;  %v1407_v36 = vsub.f32 %v6673_v40, %v4994_v20  ;;  %v1642_v20 = vrot.slane %v5359_v1, 5 }
 0x49e   :  { %v1479_v51 = vmul.f32 %v1445_v10, %v1407_v36  ;;  %v1634_v10 = vrot.slane %v5388_v35, 5  ;;  %v1644_v36 = vrot.slane %v5376_v28, 5 }
 0x4a0   :  { %1894 = vrot.lane.b32.xlu1 %v1822_v54, %s3948_s20  ;;  %1704 = vrot.lane.b32.xlu0 %v1641_v9, %s3947_s19  ;;  %v5399_v40 = vadd.f32 %v5063_v63, %v1479_v51  ;;  %v1643_v5 = vsel %vm1053_vm11, %v1634_v10, %v1642_v20  ;;  %v1633_v9 = vsel %vm1053_vm11, %v1624_v8, %v1632_v37  ;;  %v1788_v20 = vrot.slane %v5124_v22, 2 }
 0x4a1   :  { %v1631_v51 = vsel %vm1053_vm11, %v1622_v38, %v1630_v3  ;;  %v1635_v8 = vsel %vm1053_vm11, %v1626_v58, %v1634_v10  ;;  %v1790_v3 = vrot.slane %v5126_v53, 2 }
 0x4a2   :  { %v1636_v29 = vrot.slane %v5399_v40, 5  ;;  %v1797_v37 = vsel %vm1235_vm12, %v1788_v20, %v1796_v31  ;;  %v1780_v31 = vrot.slane %v5091_v4, 2 }
 0x4a3   :  { %v1799_v10 = vsel %vm1235_vm12, %v1790_v3, %v1798_v61  ;;  %v1782_v61 = vrot.slane %v5093_v14, 2 }
 0x4a4   :  { %1896 = vrot.lane.b32.xlu1 %v1824_v26, %s3948_s20  ;;  %1702 = vrot.lane.b32.xlu0 %v1639_v16, %s3947_s19  ;;  %v1645_v63 = vsel %vm1053_vm11, %v1636_v29, %v1644_v36  ;;  %v1786_v16 = vrot.slane %v5140_v46, 2  ;;  %v1637_v38 = vsel %vm1053_vm11, %v1628_v60, %v1636_v29  ;;  %v1789_v60 = vsel %vm1235_vm12, %v1780_v31, %v1788_v20 }
 0x4a5   :  { %v1778_v36 = vrot.slane %v5105_v12, 2  ;;  %v1812_v29 = vrot.slane %v5356_v27, 2  ;;  %v1810_v20 = vrot.slane %v5373_v34, 2 }
 0x4a6   :  { %v1795_v58 = vsel %vm1235_vm12, %v1786_v16, %v1794_v30 }
 0x4a8   :  { %1706 = vrot.lane.b32.xlu1 %v1643_v5, %s3947_s19  ;;  %1696 = vrot.lane.b32.xlu0 %v1633_v9, %s3947_s19  ;;  %v1792_v5 = vrot.slane %v5133_v21, 2  ;;  %v1787_v9 = vsel %vm1235_vm12, %v1778_v36, %v1786_v16  ;;  %v1814_v16 = vrot.slane %v5388_v35, 2 }
 0x4aa   :  { %v1801_v30 = vsel %vm1235_vm12, %v1792_v5, %v1800_v39  ;;  %v1784_v39 = vrot.slane %v5095_v32, 2 }
 0x4ac   :  { %1708 = vrot.lane.b32.xlu1 %v1645_v63, %s3947_s19  ;;  %1694 = vrot.lane.b32.xlu0 %v1631_v51, %s3947_s19  ;;  %v1791_v63 = vsel %vm1235_vm12, %v1782_v61, %v1790_v3  ;;  %v1821_v51 = vsel %vm1235_vm12, %v1812_v29, %v1820_v45  ;;  %v1823_v3 = vsel %vm1235_vm12, %v1814_v16, %v1822_v54 }
 0x4ad   :  { %v1811_v54 = vsel %vm1235_vm12, %v1802_v47, %v1810_v20  ;;  %v1781_v47 = vsel %vm1235_vm12, %v1772_v0, %v1780_v31  ;;  %v1783_v31 = vsel %vm1235_vm12, %v1774_v23, %v1782_v61  ;;  %v5540_v23 = vld [vmem:[%s6551_s1 + $0x98] sm:$0xff] }
 0x4ae   :  { %6675 = vst [vmem:[#allocation16_spill] sm:$0xff] %v5540_v23 }
 0x4b0   :  { %1698 = vrot.lane.b32.xlu1 %v1635_v8, %s3947_s19  ;;  %1860 = vrot.lane.b32.xlu0 %v1797_v37, %s3948_s20  ;;  %v1793_v8 = vsel %vm1235_vm12, %v1784_v39, %v1792_v5  ;;  %v1819_v37 = vsel %vm1235_vm12, %v1810_v20, %v1818_v18  ;;  %v1816_v18 = vrot.slane %v5399_v40, 2 }
 0x4b4   :  { %1700 = vrot.lane.b32.xlu1 %v1637_v38, %s3947_s19  ;;  %1858 = vrot.lane.b32.xlu0 %v1795_v58, %s3948_s20  ;;  %v1813_v58 = vsel %vm1235_vm12, %v1804_v6, %v1812_v29  ;;  %v1548_v6 = vld [vmem:[%s6551_s1 + $0x88] sm:$0xff] }
 0x4b5   :  { %3645 = vmatprep.mubr.msk.f32.mxu0 %vm1980_vm15, %v1548_v6  ;;  %3650 = vmatprep.mubr.msk.f32.mxu1 %vm1980_vm15, %v1548_v6 }
 0x4b8   :  { %1862 = vrot.lane.b32.xlu1 %v1799_v10, %s3948_s20  ;;  %1852 = vrot.lane.b32.xlu0 %v1789_v60, %s3948_s20  ;;  %v1825_v60 = vsel %vm1235_vm12, %v1816_v18, %v1824_v26 }
 0x4bc   :  { %1864 = vrot.lane.b32.xlu1 %v1801_v30, %s3948_s20  ;;  %1850 = vrot.lane.b32.xlu0 %v1787_v9, %s3948_s20  ;;  %v1815_v9 = vsel %vm1235_vm12, %v1806_v44, %v1814_v16  ;;  %v1779_v44 = vsel %vm1235_vm12, %v1770_v43, %v1778_v36  ;;  %v1785_v43 = vsel %vm1235_vm12, %v1776_v33, %v1784_v39  ;;  %v6674_v36 = vmov 50  }
 0x4c0   :  { %1854 = vrot.lane.b32.xlu1 %v1791_v63, %s3948_s20  ;;  %1884 = vrot.lane.b32.xlu0 %v1821_v51, %s3948_s20  ;;  %v1817_v51 = vsel %vm1235_vm12, %v1808_v41, %v1816_v18  ;;  %v6677_v18 = vmov 51  }
 0x4c4   :  { %1856 = vrot.lane.b32.xlu1 %v1793_v8, %s3948_s20  ;;  %1882 = vrot.lane.b32.xlu0 %v1819_v37, %s3948_s20 }
 0x4c6   :  { %v5466_v38 = vpop.permute.xlu1 %1666  ;;  %v5468_v45 = vpop.permute.xlu0 %1664 }
 0x4c8   :  { %1886 = vrot.lane.b32.xlu1 %v1823_v3, %s3948_s20  ;;  %1876 = vrot.lane.b32.xlu0 %v1813_v58, %s3948_s20  ;;  %v5546_v58 = vld [vmem:[%s6551_s1 + $0xa8] sm:$0x7] }
 0x4c9   :  { %6676 = vst [vmem:[#allocation12_spill] sm:$0xff] %v5546_v58 }
 0x4ca   :  { %v5479_v10 = vpop.permute.xlu1 %1668  ;;  %v5481_v5 = vpop.permute.xlu0 %1662 }
 0x4cc   :  { %1888 = vrot.lane.b32.xlu1 %v1825_v60, %s3948_s20  ;;  %1874 = vrot.lane.b32.xlu0 %v1811_v54, %s3948_s20 }
 0x4ce   :  { %v5494_v30 = vpop.permute.xlu1 %1674  ;;  %v5498_v26 = vpop.permute.xlu0 %1672 }
 0x4d0   :  { %1878 = vrot.lane.b32.xlu1 %v1815_v9, %s3948_s20  ;;  %1844 = vrot.lane.b32.xlu0 %v1781_v47, %s3948_s20 }
 0x4d2   :  { %v5508_v29 = vpop.permute.xlu1 %1676  ;;  %v5510_v63 = vpop.permute.xlu0 %1670 }
 0x4d4   :  { %1880 = vrot.lane.b32.xlu1 %v1817_v51, %s3948_s20  ;;  %1842 = vrot.lane.b32.xlu0 %v1779_v44, %s3948_s20 }
 0x4d6   :  { %v5520_v20 = vpop.permute.xlu1 %1682  ;;  %v5522_v0 = vpop.permute.xlu0 %1680 }
 0x4d8   :  { %1846 = vrot.lane.b32.xlu1 %v1783_v31, %s3948_s20  ;;  %1967 = vperm.xlu0 %3757, %v1548_v6  }
 0x4da   :  { %v5528_v41 = vpop.permute.xlu1 %1684  ;;  %v5530_v8 = vpop.permute.xlu0 %1678 }
 0x4dc   :  { %1848 = vrot.lane.b32.xlu1 %v1785_v43, %s3948_s20  ;;  %3760 = vset.pattern.permute.xlu0 %v6674_v36 }
 0x4de   :  { %v1831_v37 = vpop.permute.xlu1 %1830  ;;  %v1829_v16 = vpop.permute.xlu0 %1828 }
 0x4df   :  { %v1899_v32 = vsel %vm68_vm0, %v1829_v16, %v1831_v37 }
 0x4e0   :  { %1972 = vperm.xlu1 %3758, %v5540_v23  }
 0x4e2   :  { %v1833_v61 = vpop.permute.xlu1 %1832  ;;  %v1827_v3 = vpop.permute.xlu0 %1826 }
 0x4e4   :  { %1977 = vperm.xlu1 %3758, %v5546_v58  }
 0x4e6   :  { %v5549_v33 = vpop.permute.xlu1 %1650  ;;  %v5551_v39 = vpop.permute.xlu0 %1648 }
 0x4e8   :  { %3759 = vset.pattern.permute.xlu1 %v6677_v18 }
 0x4ea   :  { %v5554_v60 = vpop.permute.xlu1 %1652  ;;  %v5556_v54 = vpop.permute.xlu0 %1646 }
 0x4ee   :  { %v1837_v6 = vpop.permute.xlu1 %1836  ;;  %v1835_v9 = vpop.permute.xlu0 %1834 }
 0x4ef   :  { %v1901_v31 = vsel %vm68_vm0, %v1835_v9, %v1837_v6 }
 0x4f2   :  { %v1839_v47 = vpop.permute.xlu1 %1838  ;;  %v1689_v51 = vpop.permute.xlu0 %1688 }
 0x4f3   :  { %v1902_v44 = vsel %vm68_vm0, %v1837_v6, %v1839_v47 }
 0x4f4   :  { %1996 = vmatprep.subr.mxu0 %v1902_v44 }
 0x4f5   :  { %1997 = vmatpush1.msra.mxu0 %v1901_v31 }
 0x4f6   :  { %v1841_v43 = vpop.permute.xlu1 %1840  ;;  %v1687_v48 = vpop.permute.xlu0 %1686 }
 0x4f7   :  { %2079 = vmatprep.subr.mxu1 %v1841_v43  ;;  %v1903_v36 = vsel %vm68_vm0, %v1839_v47, %v1841_v43 }
 0x4f8   :  { %2080 = vmatpush1.msra.mxu1 %v1903_v36 }
 0x4fa   :  { %v1691_v18 = vpop.permute.xlu1 %1690  ;;  %v5561_v58 = vpop.permute.xlu0 %1656 }
 0x4fe   :  { %v1693_v23 = vpop.permute.xlu1 %1692  ;;  %v5563_v50 = vpop.permute.xlu0 %1654 }
 0x502   :  { %v5565_v13 = vpop.permute.xlu1 %1658  ;;  %v5567_v56 = vpop.permute.xlu0 %1868 }
 0x503   :  { %6678 = vst [vmem:[#allocation15_spill] sm:$0xff] %v5567_v56 }
 0x506   :  { %v5569_v17 = vpop.permute.xlu1 %1660  ;;  %v5571_v6 = vpop.permute.xlu0 %1866 }
 0x507   :  { %6679 = vst [vmem:[#allocation14_spill] sm:$0xff] %v5571_v6 }
 0x50a   :  { %v5573_v9 = vpop.permute.xlu1 %1870  ;;  %v5575_v44 = vpop.permute.xlu0 %1892 }
 0x50b   :  { %6680 = vst [vmem:[#allocation19_spill] sm:$0xff] %v5573_v9  ;;  %6681 = vst [vmem:[#allocation11_spill] sm:$0xff] %v5575_v44  ;;  %v1898_v44 = vsel %vm68_vm0, %v1827_v3, %v1829_v16 }
 0x50e   :  { %v5577_v47 = vpop.permute.xlu1 %1872  ;;  %v5579_v36 = vpop.permute.xlu0 %1890 }
 0x50f   :  { %6682 = vst [vmem:[#allocation13_spill] sm:$0xff] %v5577_v47  ;;  %6683 = vst [vmem:[#allocation18_spill] sm:$0xff] %v5579_v36 }
 0x512   :  { %v5581_v31 = vpop.permute.xlu1 %1894  ;;  %v1705_v43 = vpop.permute.xlu0 %1704 }
 0x513   :  { %6684 = vst [vmem:[#allocation17_spill] sm:$0xff] %v5581_v31 }
 0x516   :  { %v5583_v62 = vpop.permute.xlu1 %1896  ;;  %v1703_v7 = vpop.permute.xlu0 %1702 }
 0x517   :  { %6685 = vst [vmem:[#allocation27_spill] sm:$0xff] %v5583_v62  ;;  %v1731_v56 = vsel %vm52_vm1, %v1703_v7, %v1705_v43  ;;  %v1900_v62 = vsel %vm68_vm0, %v1831_v37, %v1833_v61  ;;  %v1726_v37 = vsel %vm52_vm1, %v1689_v51, %v1691_v18 }
 0x518   :  { %v1961_v36 = vsel %vm1235_vm12, %v1731_v56, %v1898_v44 }
 0x51a   :  { %v1707_v14 = vpop.permute.xlu1 %1706  ;;  %v1697_v9 = vpop.permute.xlu0 %1696 }
 0x51b   :  { %v1732_v6 = vsel %vm52_vm1, %v1705_v43, %v1707_v14 }
 0x51c   :  { %v1962_v47 = vsel %vm1235_vm12, %v1732_v6, %v1899_v32  ;;  %v1719_v6 = vsel %vm52_vm1, %v5510_v63, %v5498_v26  ;;  %v1711_v63 = vsel %vm52_vm1, %v5551_v39, %v5549_v33 }
 0x51d   :  { %1998 = vmatprep.subr.mxu0 %v1962_v47 }
 0x51e   :  { %v1709_v31 = vpop.permute.xlu1 %1708  ;;  %1999 = vmatpush1.msra.mxu0 %v1961_v36  ;;  %v1695_v7 = vpop.permute.xlu0 %1694  ;;  %v6700_v47 = vld [vmem:[#allocation27_spill] sm:$0xff] }
 0x51f   :  { %v1733_v42 = vsel %vm52_vm1, %v1707_v14, %v1709_v31  ;;  %v1964_v53 = vsel %vm1235_vm12, %v1709_v31, %v1833_v61  ;;  %v1728_v56 = vsel %vm52_vm1, %v1695_v7, %v1697_v9  ;;  %v1725_v14 = vsel %vm52_vm1, %v1687_v48, %v1689_v51 }
 0x520   :  { %2081 = vmatprep.subr.mxu1 %v1964_v53  ;;  %v1963_v43 = vsel %vm1235_vm12, %v1733_v42, %v1900_v62  ;;  %v1723_v42 = vsel %vm52_vm1, %v5522_v0, %v5520_v20  ;;  %v1722_v62 = vsel %vm52_vm1, %v5530_v8, %v5522_v0  ;;  %v1727_v48 = vsel %vm52_vm1, %v1691_v18, %v1693_v23 }
 0x521   :  { %2082 = vmatpush1.msra.mxu1 %v1963_v43  ;;  %v1720_v51 = vsel %vm52_vm1, %v5498_v26, %v5494_v30  ;;  %v1717_v0 = vsel %vm52_vm1, %v5468_v45, %v5466_v38  ;;  %v1724_v8 = vsel %vm52_vm1, %v5520_v20, %v5528_v41  ;;  %v1716_v26 = vsel %vm52_vm1, %v5481_v5, %v5468_v45 }
 0x522   :  { %v1699_v49 = vpop.permute.xlu1 %1698  ;;  %v5595_v16 = vpop.permute.xlu0 %1860  ;;  %v1721_v20 = vsel %vm52_vm1, %v5494_v30, %v5508_v29  ;;  %v1714_v45 = vsel %vm52_vm1, %v5561_v58, %v5565_v13  ;;  %v1713_v5 = vsel %vm52_vm1, %v5563_v50, %v5561_v58  ;;  %v1958_v30 = vsel %vm1053_vm11, %v5318_v11, %v1711_v63 }
 0x523   :  { %v1729_v32 = vsel %vm52_vm1, %v1697_v9, %v1699_v49  ;;  %v1712_v50 = vsel %vm52_vm1, %v5549_v33, %v5554_v60  ;;  %v1715_v11 = vsel %vm52_vm1, %v5565_v13, %v5569_v17 }
 0x524   :  { %2000 = vmatprep.subr.mxu0 %v1729_v32 }
 0x525   :  { %2001 = vmatpush1.msra.mxu0 %v1728_v56  ;;  %v6701_v56 = vld [vmem:[#allocation19_spill] sm:$0xff] }
 0x526   :  { %v1701_v3 = vpop.permute.xlu1 %1700  ;;  %2002 = vmatprep.subr.mxu0 %v1726_v37  ;;  %v5601_v61 = vpop.permute.xlu0 %1858  ;;  %v6702_v37 = vld [vmem:[#allocation15_spill] sm:$0xff] }
 0x527   :  { %2003 = vmatpush1.msra.mxu0 %v1725_v14  ;;  %2083 = vmatprep.subr.mxu1 %v1701_v3  ;;  %v1730_v53 = vsel %vm52_vm1, %v1699_v49, %v1701_v3  ;;  %v1914_v14 = vsel %vm68_vm0, %v6702_v37, %v6701_v56  ;;  %v6703_v3 = vld [vmem:[#allocation14_spill] sm:$0xff] }
 0x528   :  { %2004 = vmatprep.subr.mxu0 %v1723_v42  ;;  %2084 = vmatpush1.msra.mxu1 %v1730_v53  ;;  %v1913_v42 = vsel %vm68_vm0, %v6703_v3, %v6702_v37 }
 0x529   :  { %2005 = vmatpush1.msra.mxu0 %v1722_v62  ;;  %2085 = vmatprep.subr.mxu1 %v1693_v23  ;;  %v1710_v23 = vsel %vm52_vm1, %v5556_v54, %v5551_v39  ;;  %v6699_v54 = vld [vmem:[#allocation10_spill] sm:$0xff] }
 0x52a   :  { %2086 = vmatpush1.msra.mxu1 %v1727_v48  ;;  %v5617_v49 = vpop.permute.xlu1 %1862  ;;  %2006 = vmatprep.subr.mxu0 %v1720_v51  ;;  %v5619_v9 = vpop.permute.xlu0 %1852  ;;  %v1957_v58 = vsel %vm1053_vm11, %v5337_v59, %v1710_v23  ;;  %v1959_v59 = vsel %vm1053_vm11, %v5359_v1, %v1712_v50  ;;  %v6696_v1 = vld [vmem:[#allocation18_spill] sm:$0xff]  ;;  %v1910_v51 = vsel %vm68_vm0, %v5601_v61, %v5595_v16  ;;  %v6707_v50 = vmov 0.0  }
 0x52b   :  { %2007 = vmatpush1.msra.mxu0 %v1719_v6  ;;  %2087 = vmatprep.subr.mxu1 %v5528_v41  ;;  %v1911_v62 = vsel %vm68_vm0, %v5595_v16, %v5617_v49 }
 0x52c   :  { %2008 = vmatprep.subr.mxu0 %v1717_v0  ;;  %2088 = vmatpush1.msra.mxu1 %v1724_v8  ;;  %v6704_v0 = vld [vmem:[#allocation13_spill] sm:$0xff] }
 0x52d   :  { %2009 = vmatpush1.msra.mxu0 %v1716_v26  ;;  %2089 = vmatprep.subr.mxu1 %v5508_v29  ;;  %v1718_v29 = vsel %vm52_vm1, %v5466_v38, %v5479_v10  ;;  %v1960_v38 = vsel %vm1053_vm11, %v5376_v28, %v5554_v60  ;;  %v6697_v28 = vld [vmem:[#allocation21_spill] sm:$0xff]  ;;  %v1915_v8 = vsel %vm68_vm0, %v6701_v56, %v6704_v0 }
 0x52e   :  { %2090 = vmatpush1.msra.mxu1 %v1721_v20  ;;  %v5647_v41 = vpop.permute.xlu1 %1864  ;;  %2010 = vmatprep.subr.mxu0 %v1714_v45  ;;  %v5649_v39 = vpop.permute.xlu0 %1850  ;;  %v1551_v20 = vld [vmem:[%s6551_s1 + $0x80] sm:$0xff] }
 0x52f   :  { %2011 = vmatpush1.msra.mxu0 %v1713_v5  ;;  %2091 = vmatprep.subr.mxu1 %v5479_v10  ;;  %v1907_v63 = vsel %vm68_vm0, %v5649_v39, %v5619_v9  ;;  %v1912_v23 = vsel %vm68_vm0, %v5617_v49, %v5647_v41  ;;  %v1552_v39 = vld [vmem:[%s6551_s1 + $0x90] sm:$0xff] }
 0x530   :  { %2012 = vmatprep.subr.mxu0 %v1958_v30  ;;  %2092 = vmatpush1.msra.mxu1 %v1718_v29  ;;  %v6706_v30 = vld [vmem:[#allocation12_spill] sm:$0xff] }
 0x531   :  { %2013 = vmatpush1.msra.mxu0 %v1957_v58  ;;  %2093 = vmatprep.subr.mxu1 %v5569_v17  ;;  %v1553_v29 = vld [vmem:[%s6551_s1 + $0xa0] sm:$0x7] }
 0x532   :  { %2094 = vmatpush1.msra.mxu1 %v1715_v11  ;;  %v5666_v18 = vpop.permute.xlu1 %1854  ;;  %2014 = vmatprep.subr.mxu0 %v5356_v27  ;;  %v1885_v10 = vpop.permute.xlu0 %1884 }
 0x533   :  { %2015 = vmatpush1.msra.mxu0 %v5373_v34  ;;  %2095 = vmatprep.subr.mxu1 %v1960_v38  ;;  %v1908_v26 = vsel %vm68_vm0, %v5619_v9, %v5666_v18 }
 0x534   :  { %2016 = vmatprep.subr.mxu0 %v5230_v19  ;;  %2096 = vmatpush1.msra.mxu1 %v1959_v59 }
 0x535   :  { %2017 = vmatpush1.msra.mxu0 %v5242_v2  ;;  %2097 = vmatprep.subr.mxu1 %v5399_v40  ;;  %v6689_v2 = vld [vmem:[#allocation23_spill] sm:$0xff]  ;;  %v6698_v40 = vld [vmem:[#allocation9_spill] sm:$0xff] }
 0x536   :  { %2098 = vmatpush1.msra.mxu1 %v5388_v35  ;;  %v5679_v17 = vpop.permute.xlu1 %1856  ;;  %2018 = vmatprep.subr.mxu0 %v5163_v57  ;;  %v1883_v13 = vpop.permute.xlu0 %1882  ;;  %v6686_v57 = vld [vmem:[#allocation20_spill] sm:$0xff] }
 0x537   :  { %2019 = vmatpush1.msra.mxu0 %v5178_v55  ;;  %2099 = vmatprep.subr.mxu1 %v5267_v24  ;;  %v6687_v55 = vld [vmem:[#allocation26_spill] sm:$0xff]  ;;  %v6695_v24 = vld [vmem:[#allocation11_spill] sm:$0xff]  ;;  %v1919_v60 = vsel %vm68_vm0, %v1883_v13, %v1885_v10  ;;  %v1909_v9 = vsel %vm68_vm0, %v5666_v18, %v5679_v17 }
 0x538   :  { %2020 = vmatprep.subr.mxu0 %v5124_v22  ;;  %2100 = vmatpush1.msra.mxu1 %v5254_v15  ;;  %v6688_v22 = vld [vmem:[#allocation25_spill] sm:$0xff]  ;;  %v6692_v15 = vld [vmem:[#allocation8_spill] sm:$0xff]  ;;  %v1922_v34 = vsel %vm68_vm0, %v6696_v1, %v6695_v24 }
 0x539   :  { %2021 = vmatpush1.msra.mxu0 %v5140_v46  ;;  %2101 = vmatprep.subr.mxu1 %v5171_v25  ;;  %v6690_v46 = vld [vmem:[#allocation22_spill] sm:$0xff]  ;;  %v6691_v25 = vld [vmem:[#allocation7_spill] sm:$0xff] }
 0x53a   :  { %2102 = vmatpush1.msra.mxu1 %v5159_v52  ;;  %v1887_v35 = vpop.permute.xlu1 %1886  ;;  %2022 = vmatprep.subr.mxu0 %v5091_v4  ;;  %v1877_v19 = vpop.permute.xlu0 %1876 }
 0x53b   :  { %2023 = vmatpush1.msra.mxu0 %v5105_v12  ;;  %2103 = vmatprep.subr.mxu1 %v5133_v21  ;;  %v6693_v12 = vld [vmem:[#allocation24_spill] sm:$0xff]  ;;  %v6694_v21 = vld [vmem:[#allocation17_spill] sm:$0xff]  ;;  %v1920_v33 = vsel %vm68_vm0, %v1885_v10, %v1887_v35 }
 0x53c   :  { %2024 = vmatprep.subr.mxu0 %v6686_v57  ;;  %2104 = vmatpush1.msra.mxu1 %v6687_v55  ;;  %v1923_v27 = vsel %vm68_vm0, %v6695_v24, %v6694_v21  ;;  %v1924_v36 = vsel %vm68_vm0, %v6694_v21, %v6700_v47 }
 0x53d   :  { %2025 = vmatpush1.msra.mxu0 %v6688_v22  ;;  %2105 = vmatprep.subr.mxu1 %v6689_v2 }
 0x53e   :  { %2106 = vmatpush1.msra.mxu1 %v6690_v46  ;;  %v1889_v52 = vpop.permute.xlu1 %1888  ;;  %2026 = vmatprep.subr.mxu0 %v6691_v25  ;;  %v1875_v4 = vpop.permute.xlu0 %1874 }
 0x53f   :  { %2027 = vmatpush1.msra.mxu0 %v6692_v15  ;;  %2107 = vmatprep.subr.mxu1 %v6693_v12  ;;  %v1916_v43 = vsel %vm68_vm0, %v1875_v4, %v1877_v19  ;;  %v1921_v32 = vsel %vm68_vm0, %v1887_v35, %v1889_v52 }
 0x540   :  { %3643 = vmatprep.subr.msk.mxu0 %vm1987_vm2, %v1923_v27  ;;  %2108 = vmatpush1.msra.mxu1 %v6697_v28 }
 0x541   :  { %3644 = vmatpush2.msk.msra.mxu0 %vm1987_vm2, %v1922_v34  ;;  %2109 = vmatprep.subr.mxu1 %v6698_v40 }
 0x542   :  { %2110 = vmatpush1.msra.mxu1 %v6699_v54  ;;  %v1879_v44 = vpop.permute.xlu1 %1878  ;;  %2048 = vmatprep.subr.mxu0 %v1920_v33  ;;  %v1845_v31 = vpop.permute.xlu0 %1844 }
 0x543   :  { %2049 = vmatpush2.msra.mxu0 %v1919_v60  ;;  %3648 = vmatprep.subr.msk.mxu1 %vm1987_vm2, %v6700_v47  ;;  %v1917_v7 = vsel %vm68_vm0, %v1877_v19, %v1879_v44 }
 0x544   :  { %2050 = vmatprep.subr.mxu0 %v1917_v7  ;;  %3649 = vmatpush2.msk.msra.mxu1 %vm1987_vm2, %v1924_v36 }
 0x545   :  { %2051 = vmatpush2.msra.mxu0 %v1916_v43  ;;  %2131 = vmatprep.subr.mxu1 %v1889_v52 }
 0x546   :  { %2132 = vmatpush2.msra.mxu1 %v1921_v32  ;;  %v1881_v53 = vpop.permute.xlu1 %1880  ;;  %2052 = vmatprep.subr.mxu0 %v1914_v14  ;;  %v1843_v6 = vpop.permute.xlu0 %1842 }
 0x547   :  { %2053 = vmatpush2.msra.mxu0 %v1913_v42  ;;  %2133 = vmatprep.subr.mxu1 %v1881_v53  ;;  %v1918_v48 = vsel %vm68_vm0, %v1879_v44, %v1881_v53  ;;  %v1904_v45 = vsel %vm68_vm0, %v1843_v6, %v1845_v31 }
 0x548   :  { %2054 = vmatprep.subr.mxu0 %v1911_v62  ;;  %2134 = vmatpush2.msra.mxu1 %v1918_v48 }
 0x549   :  { %2055 = vmatpush2.msra.mxu0 %v1910_v51  ;;  %2135 = vmatprep.subr.mxu1 %v6704_v0 }
 0x54a   :  { %2136 = vmatpush2.msra.mxu1 %v1915_v8  ;;  %v1847_v16 = vpop.permute.xlu1 %1846  ;;  %2056 = vmatprep.subr.mxu0 %v1908_v26 }
 0x54b   :  { %2057 = vmatpush2.msra.mxu0 %v1907_v63  ;;  %2137 = vmatprep.subr.mxu1 %v5647_v41  ;;  %v1905_v61 = vsel %vm68_vm0, %v1845_v31, %v1847_v16  ;;  %v6705_v41 = vld [vmem:[#allocation16_spill] sm:$0xff] }
 0x54c   :  { %2058 = vmatprep.subr.mxu0 %v1905_v61  ;;  %2138 = vmatpush2.msra.mxu1 %v1912_v23 }
 0x54d   :  { %2059 = vmatpush2.msra.mxu0 %v1904_v45  ;;  %2139 = vmatprep.subr.mxu1 %v5679_v17 }
 0x54e   :  { %2140 = vmatpush2.msra.mxu1 %v1909_v9  ;;  %v1849_v5 = vpop.permute.xlu1 %1848  ;;  %2061 = vmatmul.mubr.f32.vlgmr.msra.gmra.mxu0 %v1551_v20 }
 0x54f   :  { %2141 = vmatprep.subr.mxu1 %v1849_v5  ;;  %v1906_v49 = vsel %vm68_vm0, %v1847_v16, %v1849_v5  ;;  %3646 = vmatprep.mubr.msk.f32.mxu0 %vm1980_vm15, %v6705_v41 }
 0x550   :  { %2142 = vmatpush2.msra.mxu1 %v1906_v49 }
 0x551   :  { %2144 = vmatmul.mubr.f32.vlgmr.msra.gmra.mxu1 %v1551_v20 }
 0x552   :  { %2067 = vmatmul.mubr.f32.gmra.mxu0 %v1552_v39  ;;  %3651 = vmatprep.mubr.msk.f32.mxu1 %vm1980_vm15, %v6705_v41 }
 0x553   :  { %3647 = vmatprep.mubr.msk.f32.mxu0 %vm1980_vm15, %v6706_v30  ;;  %v1968_v11 = vpop.permute.xlu0 %1967 }
 0x555   :  { %2150 = vmatmul.mubr.f32.gmra.mxu1 %v1552_v39 }
 0x556   :  { %2073 = vmatmul.mubr.f32.gmra.mxu0 %v1553_v29  ;;  %3652 = vmatprep.mubr.msk.f32.mxu1 %vm1980_vm15, %v6706_v30 }
 0x557   :  { %2846 = vmatprep.mubr.f32.mxu0 %v6707_v50 }
 0x559   :  { %2156 = vmatmul.mubr.f32.gmra.mxu1 %v1553_v29 }
 0x55a   :  { %2917 = vmatprep.mubr.f32.mxu1 %v6707_v50 }
 0x55b   :  { %v1973_v19 = vpop.permute.xlu1 %1972 }
 0x55f   :  { %v1978_v33 = vpop.permute.xlu1 %1977 }
 0x60e   :  { %v2062_v58 = vpop.f32.mrf.mxu0 }
 0x60f   :  { %v5777_v59 = vadd.f32 %v2062_v58, %v1968_v11 }
 0x610   :  { %v2064_v18 = vpop.f32.mrf.mxu0 }
 0x611   :  { %v5775_v38 = vadd.f32 %v2064_v18, %v1968_v11  ;;  %v2145_v10 = vpop.f32.mrf.mxu1  ;;  %v2174_v4 = vmin.f32 %v5777_v59, 0.0  ;;  %vm2162_vm6 = vcmp.gt.f32.partialorder %v5777_v59, 0.0 }
 0x612   :  { %v2146_v17 = vadd.f32 %v2145_v10, %v1968_v11  ;;  %v2068_v13 = vpop.f32.mrf.mxu0 }
 0x613   :  { %v2175_v35 = vmin.f32 %v5775_v38, 0.0  ;;  %v2147_v57 = vpop.f32.mrf.mxu1  ;;  %v2186_v44 = vmul.f32 1.442695, %v2174_v4  ;;  %v5793_v43 = vadd.f32 %v2068_v13, %v1973_v19  ;;  %vm2163_vm5 = vcmp.gt.f32.partialorder %v5775_v38, 0.0 }
 0x614   :  { %v2176_v55 = vmin.f32 %v2146_v17, 0.0  ;;  %v2148_v22 = vadd.f32 %v2147_v57, %v1968_v11  ;;  %v2070_v2 = vpop.f32.mrf.mxu0  ;;  %vm2164_vm3 = vcmp.gt.f32.partialorder %v2146_v17, 0.0 }
 0x615   :  { %v2188_v46 = vmul.f32 1.442695, %v2175_v35  ;;  %v5780_v52 = vadd.f32 %v2070_v2, %v1973_v19  ;;  %v2151_v25 = vpop.f32.mrf.mxu1  ;;  %v2178_v48 = vmin.f32 %v5793_v43, 0.0 }
 0x616   :  { %v2190_v15 = vmul.f32 1.442695, %v2176_v55  ;;  %v2177_v12 = vmin.f32 %v2148_v22, 0.0  ;;  %v5783_v21 = vadd.f32 %v2151_v25, %v1973_v19  ;;  %v2074_v24 = vpop.f32.mrf.mxu0  ;;  %vm2165_vm4 = vcmp.gt.f32.partialorder %v2148_v22, 0.0 }
 0x617   :  { %v2153_v27 = vpop.f32.mrf.mxu1  ;;  %v2179_v40 = vmin.f32 %v5780_v52, 0.0  ;;  %v5797_v3 = vadd.f32 %v2074_v24, %v1978_v33  ;;  %v2194_v63 = vmul.f32 1.442695, %v2178_v48  ;;  %vm2167_vm9 = vcmp.gt.f32.partialorder %v5780_v52, 0.0 }
 0x618   :  { %3856 = vpow2.f32 %v2190_v15  ;;  %v2192_v1 = vmul.f32 1.442695, %v2177_v12  ;;  %v2180_v34 = vmin.f32 %v5783_v21, 0.0  ;;  %v2076_v28 = vpop.f32.mrf.mxu0  ;;  %v5787_v60 = vadd.f32 %v2153_v27, %v1973_v19 }
 0x619   :  { %3858 = vpow2.f32 %v2188_v46  ;;  %v2157_v54 = vpop.f32.mrf.mxu1  ;;  %v5789_v36 = vadd.f32 %v2076_v28, %v1978_v33  ;;  %v2196_v56 = vmul.f32 1.442695, %v2179_v40  ;;  %v2182_v0 = vmin.f32 %v5797_v3, 0.0 }
 0x61a   :  { %3860 = vpow2.f32 %v2192_v1  ;;  %v2198_v47 = vmul.f32 1.442695, %v2180_v34  ;;  %v5791_v31 = vadd.f32 %v2157_v54, %v1978_v33  ;;  %v2181_v32 = vmin.f32 %v5787_v60, 0.0 }
 0x61b   :  { %v2159_v7 = vpop.f32.mrf.mxu1  ;;  %v2183_v37 = vmin.f32 %v5789_v36, 0.0  ;;  %v2202_v61 = vmul.f32 1.442695, %v2182_v0  ;;  %vm2168_vm7 = vcmp.gt.f32.partialorder %v5783_v21, 0.0  ;;  %vm2169_vm8 = vcmp.gt.f32.partialorder %v5787_v60, 0.0 }
 0x61c   :  { %3862 = vpow2.f32 %v2198_v47  ;;  %v2160_v14 = vadd.f32 %v2159_v7, %v1978_v33  ;;  %v2200_v42 = vmul.f32 1.442695, %v2181_v32  ;;  %v2184_v53 = vmin.f32 %v5791_v31, 0.0 }
 0x61d   :  { %3864 = vpow2.f32 %v2186_v44  ;;  %v2204_v51 = vmul.f32 1.442695, %v2183_v37  ;;  %vm2171_vm13 = vcmp.gt.f32.partialorder %v5789_v36, 0.0  ;;  %vm2172_vm15 = vcmp.gt.f32.partialorder %v5791_v31, 0.0 }
 0x61e   :  { %v2185_v62 = vmin.f32 %v2160_v14, 0.0  ;;  %3866 = vpow2.f32 %v2200_v42  ;;  %v2206_v8 = vmul.f32 1.442695, %v2184_v53  ;;  %vm2173_vm10 = vcmp.gt.f32.partialorder %v2160_v14, 0.0 }
 0x61f   :  { %3868 = vpow2.f32 %v2196_v56 }
 0x620   :  { %v2208_v6 = vmul.f32 1.442695, %v2185_v62 }
 0x622   :  { %3870 = vpow2.f32 %v2208_v6 }
 0x623   :  { %3872 = vpow2.f32 %v2204_v51 }
 0x624   :  { %3874 = vpow2.f32 %v2206_v8 }
 0x625   :  { %v3857_v26 = vpop.eup %3856  ;;  %3876 = vpow2.f32 %v2194_v63 }
 0x626   :  { %v3859_v16 = vpop.eup %3858  ;;  %v3655_v23 = vadd.f32 -1.0, %v3857_v26  ;;  %3878 = vpow2.f32 %v2202_v61 }
 0x627   :  { %v3861_v20 = vpop.eup %3860  ;;  %v3654_v41 = vadd.f32 -1.0, %v3859_v16 }
 0x628   :  { %v5802_v45 = vsel %vm2164_vm3, %v2146_v17, %v3655_v23  ;;  %v3656_v9 = vadd.f32 -1.0, %v3861_v20  ;;  %vm2166_vm3 = vcmp.gt.f32.partialorder %v5793_v43, 0.0 }
 0x629   :  { %2250 = vrot.lane.b32.xlu1 %v5802_v45, %s3947_s19  ;;  %v3863_v5 = vpop.eup %3862  ;;  %v5816_v11 = vsel %vm2163_vm5, %v5775_v38, %v3654_v41 }
 0x62a   :  { %v5806_v49 = vsel %vm2165_vm4, %v2148_v22, %v3656_v9  ;;  %v3865_v39 = vpop.eup %3864  ;;  %v3659_v18 = vadd.f32 -1.0, %v3863_v5  ;;  %vm2170_vm4 = vcmp.gt.f32.partialorder %v5797_v3, 0.0 }
 0x62b   :  { %2252 = vrot.lane.b32.xlu0 %v5806_v49, %s3947_s19  ;;  %v3653_v30 = vadd.f32 -1.0, %v3865_v39  ;;  %v3867_v29 = vpop.eup %3866 }
 0x62c   :  { %v3660_v10 = vadd.f32 -1.0, %v3867_v29  ;;  %v3869_v17 = vpop.eup %3868 }
 0x62d   :  { %v5813_v58 = vsel %vm2162_vm6, %v5777_v59, %v3653_v30  ;;  %v5825_v59 = vsel %vm2168_vm7, %v5783_v21, %v3659_v18  ;;  %v3658_v57 = vadd.f32 -1.0, %v3869_v17  ;;  %v6708_v30 = vld [vmem:[#allocation5_spill] sm:$0xff]  ;;  %v6709_v18 = vld [vmem:[#allocation6_spill] sm:$0xff]  ;;  %vm2458_vm7 = vcmask 982016  }
 0x62e   :  { %2246 = vrot.lane.b32.xlu1 %v5813_v58, %s3947_s19  ;;  %v5828_v38 = vsel %vm2169_vm8, %v5787_v60, %v3660_v10  ;;  %vm2373_vm5 = vcmp.lt.s32.totalorder %v6708_v30, 172  ;;  %vm2375_vm6 = vcmp.lt.s32.totalorder %v6709_v18, 172  ;;  %vm2486_vm8 = vcmask 979968  }
 0x62f   :  { %2248 = vrot.lane.b32.xlu0 %v5816_v11, %s3947_s19  ;;  %v3871_v13 = vpop.eup %3870  ;;  %v5838_v46 = vsel %vm2167_vm9, %v5780_v52, %v3658_v57 }
 0x630   :  { %v3873_v35 = vpop.eup %3872  ;;  %v3664_v19 = vadd.f32 -1.0, %v3871_v13 }
 0x631   :  { %v3875_v55 = vpop.eup %3874  ;;  %v3662_v25 = vadd.f32 -1.0, %v3873_v35  ;;  %v3665_v35 = vsel %vm2373_vm5, 1.0, %v6707_v50  ;;  %vm3037_vm5 = vcmask 1041408  }
 0x632   :  { %2258 = vrot.lane.b32.xlu1 %v5825_v59, %s3947_s19  ;;  %v3877_v22 = vpop.eup %3876  ;;  %v5835_v2 = vsel %vm2173_vm10, %v2160_v14, %v3664_v19  ;;  %v3663_v4 = vadd.f32 -1.0, %v3875_v55  ;;  %v3666_v19 = vsel %vm2375_vm6, 1.0, %v6707_v50  ;;  %vm3043_vm6 = vcmask 943104  }
 0x633   :  { %2260 = vrot.lane.b32.xlu0 %v5828_v38, %s3947_s19  ;;  %v3879_v15 = vpop.eup %3878  ;;  %v5847_v12 = vsel %vm2171_vm13, %v5789_v36, %v3662_v25  ;;  %v3657_v24 = vadd.f32 -1.0, %v3877_v22 }
 0x634   :  { %v5850_v21 = vsel %vm2172_vm15, %v5791_v31, %v3663_v4  ;;  %v3661_v52 = vadd.f32 -1.0, %v3879_v15 }
 0x635   :  { %v5862_v1 = vsel %vm2166_vm3, %v5793_v43, %v3657_v24  ;;  %vm2995_vm3 = vcmp.lt.s32.totalorder %v6708_v30, 168 }
 0x636   :  { %2268 = vrot.lane.b32.xlu1 %v5835_v2, %s3947_s19  ;;  %v5859_v27 = vsel %vm2170_vm4, %v5797_v3, %v3661_v52  ;;  %vm2997_vm4 = vcmp.lt.s32.totalorder %v6709_v18, 168 }
 0x637   :  { %2256 = vrot.lane.b32.xlu0 %v5838_v46, %s3947_s19 }
 0x63a   :  { %2264 = vrot.lane.b32.xlu1 %v5847_v12, %s3947_s19 }
 0x63b   :  { %2266 = vrot.lane.b32.xlu0 %v5850_v21, %s3947_s19 }
 0x63e   :  { %2262 = vrot.lane.b32.xlu1 %v5859_v27, %s3947_s19 }
 0x63f   :  { %2254 = vrot.lane.b32.xlu0 %v5862_v1, %s3947_s19 }
 0x69b   :  { %v2251_v34 = vpop.permute.xlu1 %2250 }
 0x69d   :  { %v2253_v28 = vpop.permute.xlu0 %2252 }
 0x69e   :  { %v2294_v40 = vmax.f32 %v5806_v49, %v2253_v28  ;;  %v2272_v33 = vsel %vm52_vm1, %v2251_v34, %v2253_v28 }
 0x69f   :  { %v2293_v44 = vmax.f32 %v5802_v45, %v2272_v33 }
 0x6a0   :  { %2321 = vrot.lane.b32.xlu1 %v2294_v40, %s3947_s19  ;;  %v2247_v60 = vpop.permute.xlu1 %2246 }
 0x6a1   :  { %v2249_v54 = vpop.permute.xlu0 %2248 }
 0x6a2   :  { %v2271_v47 = vsel %vm52_vm1, %v2249_v54, %v2251_v34  ;;  %v2270_v31 = vsel %vm52_vm1, %v2247_v60, %v2249_v54 }
 0x6a3   :  { %v2292_v36 = vmax.f32 %v5816_v11, %v2271_v47  ;;  %v2291_v56 = vmax.f32 %v5813_v58, %v2270_v31 }
 0x6a4   :  { %2319 = vrot.lane.b32.xlu1 %v2293_v44, %s3947_s19  ;;  %v2259_v7 = vpop.permute.xlu1 %2258 }
 0x6a5   :  { %2317 = vrot.lane.b32.xlu0 %v2292_v36, %s3947_s19  ;;  %v2261_v43 = vpop.permute.xlu0 %2260 }
 0x6a6   :  { %v2275_v32 = vsel %vm52_vm1, %v2259_v7, %v2261_v43  ;;  %v2298_v5 = vmax.f32 %v5828_v38, %v2261_v43 }
 0x6a7   :  { %v2297_v37 = vmax.f32 %v5825_v59, %v2275_v32 }
 0x6a8   :  { %v2269_v14 = vpop.permute.xlu1 %2268 }
 0x6a9   :  { %v2257_v3 = vpop.permute.xlu0 %2256  ;;  %2315 = vrot.lane.b32.xlu0 %v2291_v56, %s3947_s19  ;;  %2327 = vrot.lane.b32.xlu1 %v2297_v37, %s3947_s19  ;;  %v2302_v20 = vmax.f32 %v5835_v2, %v2269_v14 }
 0x6aa   :  { %v2274_v42 = vsel %vm52_vm1, %v2257_v3, %v2259_v7 }
 0x6ab   :  { %v2296_v53 = vmax.f32 %v5838_v46, %v2274_v42 }
 0x6ac   :  { %v2265_v62 = vpop.permute.xlu1 %2264 }
 0x6ad   :  { %v2267_v48 = vpop.permute.xlu0 %2266  ;;  %2325 = vrot.lane.b32.xlu0 %v2296_v53, %s3947_s19 }
 0x6ae   :  { %v2278_v51 = vsel %vm52_vm1, %v2267_v48, %v2269_v14  ;;  %v2277_v23 = vsel %vm52_vm1, %v2265_v62, %v2267_v48 }
 0x6af   :  { %v2301_v6 = vmax.f32 %v5850_v21, %v2278_v51  ;;  %v2300_v9 = vmax.f32 %v5847_v12, %v2277_v23 }
 0x6b0   :  { %v2263_v0 = vpop.permute.xlu1 %2262 }
 0x6b1   :  { %v2255_v8 = vpop.permute.xlu0 %2254  ;;  %2335 = vrot.lane.b32.xlu1 %v2301_v6, %s3947_s19  ;;  %v2276_v26 = vsel %vm52_vm1, %v2263_v0, %v2265_v62 }
 0x6b2   :  { %v2273_v63 = vsel %vm52_vm1, %v2255_v8, %v2257_v3  ;;  %v2299_v16 = vmax.f32 %v5859_v27, %v2276_v26 }
 0x6b3   :  { %v2295_v61 = vmax.f32 %v5862_v1, %v2273_v63 }
 0x6b5   :  { %2323 = vrot.lane.b32.xlu0 %v2295_v61, %s3947_s19  ;;  %2331 = vrot.lane.b32.xlu1 %v2299_v16, %s3947_s19 }
 0x6b9   :  { %2333 = vrot.lane.b32.xlu0 %v2300_v9, %s3947_s19  ;;  %2337 = vrot.lane.b32.xlu1 %v2302_v20, %s3947_s19 }
 0x6bd   :  { %2329 = vrot.lane.b32.xlu0 %v2298_v5, %s3947_s19 }
 0x712   :  { %v2322_v41 = vpop.permute.xlu1 %2321 }
 0x713   :  { %v2363_v13 = vmax.f32 %v5806_v49, %v2322_v41 }
 0x715   :  { %v5915_v15 = vmul.f32 %v3666_v19, %v2363_v13 }
 0x716   :  { %v2320_v39 = vpop.permute.xlu1 %2319 }
 0x717   :  { %v2318_v29 = vpop.permute.xlu0 %2317  ;;  %v2341_v55 = vsel %vm52_vm1, %v2320_v39, %v2322_v41  ;;  %v5933_v44 = vmul.f32 %v5915_v15, %v5915_v15 }
 0x718   :  { %v2340_v10 = vsel %vm52_vm1, %v2318_v29, %v2320_v39 }
 0x719   :  { %v2361_v17 = vmax.f32 %v5816_v11, %v2340_v10  ;;  %v5918_v11 = vmax.f32 %v5802_v45, %v2341_v55  ;;  %v2423_v53 = vrot.slane %v5933_v44, 5 }
 0x71b   :  { %v2316_v57 = vpop.permute.xlu0 %2315  ;;  %v5910_v25 = vmul.f32 %v3665_v35, %v2361_v17  ;;  %v2328_v52 = vpop.permute.xlu1 %2327  ;;  %v2398_v7 = vmul.f32 %v5918_v11, %v5918_v11 }
 0x71c   :  { %v2339_v22 = vsel %vm52_vm1, %v2316_v57, %v2318_v29 }
 0x71d   :  { %v5913_v4 = vmax.f32 %v5813_v58, %v2339_v22  ;;  %v2459_v58 = vsel %vm2458_vm7, %v5915_v15, 0.0  ;;  %v2422_v6 = vrot.slane %v2398_v7, 5 }
 0x71f   :  { %v2456_v49 = vadd.f32 %v5910_v25, %v5913_v4  ;;  %v2326_v24 = vpop.permute.xlu0 %2325  ;;  %v2396_v32 = vmul.f32 %v5913_v4, %v5913_v4 }
 0x720   :  { %v2343_v34 = vsel %vm52_vm1, %v2326_v24, %v2328_v52 }
 0x721   :  { %v2365_v28 = vmax.f32 %v5838_v46, %v2343_v34  ;;  %v2457_v40 = vadd.f32 %v2456_v49, %v5918_v11  ;;  %v2397_v46 = vmul.f32 %v5910_v25, %v5910_v25  ;;  %v2420_v63 = vrot.slane %v2396_v32, 5 }
 0x723   :  { %v5927_v33 = vmul.f32 %v3665_v35, %v2365_v28  ;;  %v2336_v60 = vpop.permute.xlu1 %2335  ;;  %v2460_v45 = vadd.f32 %v2459_v58, %v2457_v40  ;;  %v2421_v37 = vrot.slane %v2397_v46, 5 }
 0x725   :  { %2461 = vadd.xlane.f32.xlu0 %v2460_v45  ;;  %v2401_v54 = vmul.f32 %v5927_v33, %v5927_v33 }
 0x727   :  { %v2324_v47 = vpop.permute.xlu0 %2323  ;;  %v2332_v36 = vpop.permute.xlu1 %2331  ;;  %v2426_v56 = vrot.slane %v2401_v54, 5 }
 0x728   :  { %v2342_v31 = vsel %vm52_vm1, %v2324_v47, %v2326_v24 }
 0x729   :  { %v5941_v43 = vmax.f32 %v5862_v1, %v2342_v31  ;;  %v2427_v23 = vsel %vm1053_vm11, %v2421_v37, %v2426_v56 }
 0x72b   :  { %v2400_v14 = vmul.f32 %v5941_v43, %v5941_v43  ;;  %v2334_v3 = vpop.permute.xlu0 %2333  ;;  %v2338_v42 = vpop.permute.xlu1 %2337  ;;  %v2463_v16 = vadd.f32 %v5927_v33, %v5941_v43 }
 0x72c   :  { %v2345_v62 = vsel %vm52_vm1, %v2332_v36, %v2334_v3  ;;  %v2346_v48 = vsel %vm52_vm1, %v2334_v3, %v2336_v60  ;;  %v2347_v51 = vsel %vm52_vm1, %v2336_v60, %v2338_v42  ;;  %v2371_v1 = vmax.f32 %v5835_v2, %v2338_v42 }
 0x72d   :  { %v5953_v0 = vmax.f32 %v5859_v27, %v2345_v62  ;;  %v2369_v8 = vmax.f32 %v5847_v12, %v2346_v48  ;;  %v5957_v26 = vmax.f32 %v5850_v21, %v2347_v51  ;;  %v2424_v20 = vrot.slane %v2400_v14, 5 }
 0x72e   :  { %v5961_v61 = vmul.f32 %v3666_v19, %v2371_v1 }
 0x72f   :  { %v5964_v9 = vmul.f32 %v3665_v35, %v2369_v8  ;;  %v2404_v2 = vmul.f32 %v5953_v0, %v5953_v0  ;;  %v2406_v12 = vmul.f32 %v5957_v26, %v5957_v26  ;;  %v2330_v27 = vpop.permute.xlu0 %2329  ;;  %v2452_v21 = vsel %vm1053_vm11, %v5953_v0, %v2420_v63 }
 0x730   :  { %v2407_v5 = vmul.f32 %v5961_v61, %v5961_v61  ;;  %v2344_v41 = vsel %vm52_vm1, %v2328_v52, %v2330_v27  ;;  %v2367_v39 = vmax.f32 %v5828_v38, %v2330_v27  ;;  %v2454_v13 = vsel %vm1053_vm11, %v5957_v26, %v2422_v6 }
 0x731   :  { %v2405_v29 = vmul.f32 %v5964_v9, %v5964_v9  ;;  %v2432_v10 = vrot.slane %v2404_v2, 5  ;;  %v5979_v17 = vmax.f32 %v5825_v59, %v2344_v41  ;;  %v2436_v35 = vrot.slane %v2406_v12, 5 }
 0x732   :  { %v5983_v57 = vmul.f32 %v3666_v19, %v2367_v39  ;;  %v2453_v55 = vsel %vm1053_vm11, %v5964_v9, %v2421_v37  ;;  %v2455_v22 = vsel %vm1053_vm11, %v5961_v61, %v2423_v53  ;;  %v2438_v24 = vrot.slane %v2407_v5, 5 }
 0x733   :  { %v2434_v38 = vrot.slane %v2405_v29, 5  ;;  %v2402_v49 = vmul.f32 %v5979_v17, %v5979_v17  ;;  %v2464_v52 = vadd.f32 %v2463_v16, %v5979_v17  ;;  %v2469_v59 = vadd.f32 %v2453_v55, %v2452_v21 }
 0x734   :  { %v2403_v34 = vmul.f32 %v5983_v57, %v5983_v57  ;;  %v2465_v19 = vsel %vm2458_vm7, %v5983_v57, 0.0  ;;  %v2425_v28 = vsel %vm1053_vm11, %v2420_v63, %v2424_v20  ;;  %v2471_v45 = vsel %vm2458_vm7, %v2455_v22, 0.0 }
 0x735   :  { %v2428_v40 = vrot.slane %v2402_v49, 5  ;;  %v2466_v58 = vadd.f32 %v2465_v19, %v2464_v52  ;;  %v2470_v60 = vadd.f32 %v2469_v59, %v2454_v13  ;;  %v2475_v44 = vadd.f32 %v2427_v23, %v2425_v28 }
 0x736   :  { %v2430_v54 = vrot.slane %v2403_v34, 5  ;;  %v2433_v46 = vsel %vm1053_vm11, %v2424_v20, %v2432_v10  ;;  %v2435_v47 = vsel %vm1053_vm11, %v2426_v56, %v2434_v38 }
 0x737   :  { %2467 = vadd.xlane.f32.xlu1 %v2466_v58  ;;  %v2472_v36 = vadd.f32 %v2471_v45, %v2470_v60  ;;  %v2429_v31 = vsel %vm1053_vm11, %v2422_v6, %v2428_v40  ;;  %v2437_v7 = vsel %vm1053_vm11, %v2428_v40, %v2436_v35  ;;  %v2481_v32 = vsel %vm1235_vm12, %v2433_v46, 0.0  ;;  %v3922_v46 = vld [vmem:[%s6551_s1 + $0xa8] sm:$0x7] }
 0x738   :  { %v2431_v37 = vsel %vm1053_vm11, %v2423_v53, %v2430_v54  ;;  %v2476_v14 = vadd.f32 %v2475_v44, %v2429_v31  ;;  %v2439_v3 = vsel %vm1053_vm11, %v2430_v54, %v2438_v24  ;;  %v2482_v42 = vsel %vm1235_vm12, %v2435_v47, 0.0  ;;  %v3923_v31 = vld [vmem:[%s6551_s1 + $0x98] sm:$0xff] }
 0x739   :  { %2473 = vadd.xlane.f32.xlu0 %v2472_v36  ;;  %v2477_v62 = vsel %vm2458_vm7, %v2431_v37, 0.0  ;;  %v2483_v48 = vadd.f32 %v2482_v42, %v2481_v32  ;;  %v2484_v56 = vsel %vm1235_vm12, %v2437_v7, 0.0  ;;  %v2487_v1 = vsel %vm2486_vm8, %v2439_v3, 0.0  ;;  %v3924_v37 = vld [vmem:[%s6551_s1 + $0x88] sm:$0xff] }
 0x73a   :  { %v2478_v51 = vadd.f32 %v2477_v62, %v2476_v14  ;;  %v6710_v47 = vmov 50   ;;  %v6711_v42 = vmov 51   ;;  %vm3032_vm7 = vcmask 949248  }
 0x73b   :  { %v2485_v6 = vadd.f32 %v2484_v56, %v2483_v48  ;;  %v6712_v48 = vmov 49   ;;  %vm3188_vm8 = vcmask 931840  }
 0x73d   :  { %2479 = vadd.xlane.f32.xlu0 %v2478_v51  ;;  %v2488_v8 = vadd.f32 %v2487_v1, %v2485_v6 }
 0x73f   :  { %2489 = vadd.xlane.f32.xlu1 %v2488_v8 }
 0x7ae   :  { %v2462_v63 = vpop.xlane.xlu0 %2461 }
 0x7af   :  { %v6009_v53 = vmul.f32 0.0029069767, %v2462_v63 }
 0x7b1   :  { %v2496_v20 = vmul.f32 %v6009_v53, %v6009_v53  ;;  %v2540_v1 = vsub.f32 %v5910_v25, %v6009_v53  ;;  %v2541_v6 = vsub.f32 %v5918_v11, %v6009_v53  ;;  %v2539_v63 = vsub.f32 %v5913_v4, %v6009_v53 }
 0x7b3   :  { %v2502_v21 = vrot.slane %v2496_v20, 5 }
 0x7c0   :  { %v2468_v16 = vpop.xlane.xlu1 %2467 }
 0x7c1   :  { %v6011_v23 = vmul.f32 0.0029069767, %v2468_v16  ;;  %v2542_v16 = vsub.f32 %v5915_v15, %v6009_v53 }
 0x7c2   :  { %v2474_v2 = vpop.xlane.xlu0 %2473 }
 0x7c3   :  { %v6015_v12 = vmul.f32 0.0029069767, %v2474_v2  ;;  %v2497_v27 = vmul.f32 %v6011_v23, %v6011_v23 }
 0x7c5   :  { %v2503_v5 = vrot.slane %v2497_v27, 5  ;;  %v2498_v41 = vmul.f32 %v6015_v12, %v6015_v12  ;;  %v2510_v55 = vsub.f32 %v6015_v12, %v2502_v21  ;;  %v2547_v15 = vsub.f32 %v5953_v0, %v6015_v12 }
 0x7c6   :  { %v2480_v39 = vpop.xlane.xlu0 %2479  ;;  %v2548_v53 = vsub.f32 %v5964_v9, %v6015_v12  ;;  %v2544_v0 = vsub.f32 %v5927_v33, %v6011_v23  ;;  %v2543_v33 = vsub.f32 %v5941_v43, %v6011_v23 }
 0x7c7   :  { %v2494_v29 = vmul.f32 0.0029069767, %v2480_v39  ;;  %v2504_v10 = vsel %vm1053_vm11, %v2502_v21, %v2503_v5  ;;  %v2505_v13 = vrot.slane %v2498_v41, 5  ;;  %v2513_v24 = vadd.f32 1e-05, %v2510_v55 }
 0x7c8   :  { %v2490_v35 = vpop.xlane.xlu1 %2489 }
 0x7c9   :  { %v2511_v22 = vsub.f32 %v2494_v29, %v2504_v10  ;;  %v2506_v38 = vsel %vm1053_vm11, %v2503_v5, %v2505_v13  ;;  %v2495_v49 = vmul.f32 0.0029069767, %v2490_v35 }
 0x7cb   :  { %v2514_v52 = vadd.f32 1e-05, %v2511_v22  ;;  %v2512_v59 = vsub.f32 %v2495_v49, %v2506_v38  ;;  %v2549_v38 = vsub.f32 %v5957_v26, %v6015_v12 }
 0x7cd   :  { %3880 = vrsqrt.f32 %v2514_v52  ;;  %v2515_v34 = vadd.f32 1e-05, %v2512_v59 }
 0x7cf   :  { %3882 = vrsqrt.f32 %v2515_v34 }
 0x7d0   :  { %3884 = vrsqrt.f32 %v2513_v24 }
 0x7da   :  { %v3881_v19 = vpop.eup %3880 }
 0x7db   :  { %v2523_v28 = vrot.slane %v3881_v19, 3  ;;  %v2550_v19 = vsub.f32 %v5961_v61, %v6015_v12  ;;  %v2545_v61 = vsub.f32 %v5979_v17, %v6011_v23 }
 0x7dc   :  { %v3883_v40 = vpop.eup %3882 }
 0x7dd   :  { %v2525_v58 = vrot.slane %v3883_v40, 3  ;;  %v3885_v60 = vpop.eup %3884 }
 0x7de   :  { %v2522_v54 = vrot.slane %v3885_v60, 3 }
 0x7df   :  { %2531 = vrot.lane.b32.xlu0 %v2525_v58, %s3952_s27  ;;  %v2526_v45 = vsel %vm1332_vm14, %v2523_v28, %v2525_v58 }
 0x7e0   :  { %2529 = vrot.lane.b32.xlu1 %v2526_v45, %s3952_s27  ;;  %v2524_v44 = vsel %vm1332_vm14, %v2522_v54, %v2523_v28 }
 0x7e4   :  { %2527 = vrot.lane.b32.xlu1 %v2524_v44, %s3952_s27 }
 0x7e8   :  { %2587 = vperm.xlu1 %3759, %v3922_v46  }
 0x7ec   :  { %3761 = vset.pattern.permute.xlu1 %v6710_v47 }
 0x851   :  { %v2532_v3 = vpop.permute.xlu0 %2531 }
 0x852   :  { %v2530_v36 = vpop.permute.xlu1 %2529  ;;  %v2538_v62 = vmul.f32 %v3922_v46, %v2532_v3 }
 0x853   :  { %v2537_v7 = vmul.f32 %v3923_v31, %v2530_v36 }
 0x855   :  { %2558 = vperm.xlu1 %3761, %v2537_v7   ;;  %v2546_v7 = vsub.f32 %v5983_v57, %v6011_v23 }
 0x856   :  { %v2528_v32 = vpop.permute.xlu1 %2527 }
 0x857   :  { %v2536_v14 = vmul.f32 %v3924_v37, %v2528_v32 }
 0x859   :  { %3762 = vset.pattern.permute.xlu1 %v6711_v42  ;;  %2553 = vperm.xlu0 %3760, %v2536_v14  }
 0x85a   :  { %2583 = vperm.xlu1 %3762, %v3923_v31  }
 0x85d   :  { %2563 = vperm.xlu0 %3760, %v2538_v62  }
 0x85e   :  { %3765 = vset.pattern.permute.xlu1 %v6710_v47 }
 0x861   :  { %3763 = vset.pattern.permute.xlu0 %v6711_v42 }
 0x862   :  { %2579 = vperm.xlu0 %3763, %v3924_v37  }
 0x863   :  { %v2588_v8 = vpop.permute.xlu1 %2587 }
 0x866   :  { %3764 = vset.pattern.permute.xlu0 %v6712_v48 }
 0x8d0   :  { %v2559_v10 = vpop.permute.xlu1 %2558 }
 0x8d1   :  { %v2571_v26 = vmul.f32 %v2559_v10, %v2544_v0  ;;  %v2570_v54 = vmul.f32 %v2559_v10, %v2543_v33  ;;  %v2572_v36 = vmul.f32 %v2559_v10, %v2545_v61  ;;  %v2573_v14 = vmul.f32 %v2559_v10, %v2546_v7 }
 0x8d4   :  { %v2554_v56 = vpop.permute.xlu0 %2553 }
 0x8d5   :  { %v2567_v20 = vmul.f32 %v2554_v56, %v2540_v1  ;;  %v2568_v2 = vmul.f32 %v2554_v56, %v2541_v6  ;;  %v2566_v21 = vmul.f32 %v2554_v56, %v2539_v63  ;;  %v2569_v5 = vmul.f32 %v2554_v56, %v2542_v16  ;;  %v2584_v49 = vpop.permute.xlu1 %2583 }
 0x8d6   :  { %v6093_v28 = vadd.f32 %v2584_v49, %v2571_v26  ;;  %v6103_v12 = vadd.f32 %v2584_v49, %v2570_v54  ;;  %v6114_v32 = vadd.f32 %v2584_v49, %v2572_v36  ;;  %v6121_v62 = vadd.f32 %v2584_v49, %v2573_v14 }
 0x8d8   :  { %v2564_v51 = vpop.permute.xlu0 %2563  ;;  %v2687_v43 = vrot.slane %v6093_v28, 2  ;;  %v2685_v17 = vrot.slane %v6103_v12, 2  ;;  %v2689_v56 = vrot.slane %v6114_v32, 2  ;;  %v2691_v1 = vrot.slane %v6121_v62, 2 }
 0x8d9   :  { %v2574_v13 = vmul.f32 %v2564_v51, %v2547_v15  ;;  %v2575_v35 = vmul.f32 %v2564_v51, %v2548_v53  ;;  %v2576_v9 = vmul.f32 %v2564_v51, %v2549_v38  ;;  %v2577_v40 = vmul.f32 %v2564_v51, %v2550_v19 }
 0x8da   :  { %v2622_v6 = vrot.slane %v6093_v28, 5 }
 0x8db   :  { %v6079_v52 = vadd.f32 %v2588_v8, %v2574_v13  ;;  %v6081_v59 = vadd.f32 %v2588_v8, %v2575_v35  ;;  %v6095_v58 = vadd.f32 %v2588_v8, %v2576_v9  ;;  %v6106_v44 = vadd.f32 %v2588_v8, %v2577_v40  ;;  %v6171_v9 = vld [vmem:[%s6551_s1 + $0xb8] sm:$0x1f] }
 0x8dc   :  { %v2626_v35 = vrot.slane %v6121_v62, 5 }
 0x8dd   :  { %v2580_v27 = vpop.permute.xlu0 %2579  ;;  %v2695_v60 = vrot.slane %v6081_v59, 2  ;;  %v2693_v45 = vrot.slane %v6079_v52, 2  ;;  %v2697_v46 = vrot.slane %v6095_v58, 2  ;;  %v2699_v37 = vrot.slane %v6106_v44, 2 }
 0x8de   :  { %v6051_v41 = vadd.f32 %v2580_v27, %v2567_v20  ;;  %v6053_v39 = vadd.f32 %v2580_v27, %v2568_v2  ;;  %v6055_v25 = vadd.f32 %v2580_v27, %v2566_v21  ;;  %v6057_v29 = vadd.f32 %v2580_v27, %v2569_v5 }
 0x8df   :  { %v2696_v31 = vsel %vm1235_vm12, %v2687_v43, %v2695_v60  ;;  %v2694_v3 = vsel %vm1235_vm12, %v2685_v17, %v2693_v45  ;;  %v2698_v51 = vsel %vm1235_vm12, %v2689_v56, %v2697_v46  ;;  %v2630_v23 = vrot.slane %v6081_v59, 5 }
 0x8e0   :  { %v2683_v11 = vrot.slane %v6053_v39, 2  ;;  %v2682_v4 = vrot.slane %v6051_v41, 2  ;;  %v2684_v55 = vrot.slane %v6057_v29, 2  ;;  %v2681_v22 = vrot.slane %v6055_v25, 2 }
 0x8e1   :  { %v2618_v24 = vrot.slane %v6053_v39, 5  ;;  %v2617_v34 = vrot.slane %v6051_v41, 5  ;;  %v2700_v8 = vsel %vm1235_vm12, %v2691_v1, %v2699_v37  ;;  %v2631_v63 = vsel %vm1053_vm11, %v2622_v6, %v2630_v23 }
 0x8e2   :  { %2705 = vrot.lane.b32.xlu1 %v2683_v11, %s3948_s20  ;;  %2703 = vrot.lane.b32.xlu0 %v2682_v4, %s3948_s20  ;;  %v2688_v57 = vsel %vm1235_vm12, %v2682_v4, %v2687_v43  ;;  %v2690_v16 = vsel %vm1235_vm12, %v2683_v11, %v2689_v56  ;;  %v2686_v20 = vsel %vm1235_vm12, %v2681_v22, %v2685_v17  ;;  %v2632_v2 = vrot.slane %v6095_v58, 5 }
 0x8e3   :  { %v2628_v27 = vrot.slane %v6079_v52, 5  ;;  %v2624_v21 = vrot.slane %v6114_v32, 5  ;;  %v2620_v5 = vrot.slane %v6103_v12, 5  ;;  %v2692_v11 = vsel %vm1235_vm12, %v2684_v55, %v2691_v1 }
 0x8e4   :  { %v2623_v15 = vsel %vm1053_vm11, %v2617_v34, %v2622_v6  ;;  %v2634_v53 = vrot.slane %v6106_v44, 5  ;;  %v2616_v13 = vrot.slane %v6055_v25, 5  ;;  %v2619_v0 = vrot.slane %v6057_v29, 5 }
 0x8e5   :  { %v2633_v4 = vsel %vm1053_vm11, %v2624_v21, %v2632_v2  ;;  %v2629_v10 = vsel %vm1053_vm11, %v2620_v5, %v2628_v27 }
 0x8e6   :  { %2707 = vrot.lane.b32.xlu1 %v2684_v55, %s3948_s20  ;;  %2701 = vrot.lane.b32.xlu0 %v2681_v22, %s3948_s20  ;;  %v2635_v22 = vsel %vm1053_vm11, %v2626_v35, %v2634_v53  ;;  %v2621_v38 = vsel %vm1053_vm11, %v2616_v13, %v2620_v5  ;;  %v2625_v55 = vsel %vm1053_vm11, %v2618_v24, %v2624_v21 }
 0x8e7   :  { %v2627_v49 = vsel %vm1053_vm11, %v2619_v0, %v2626_v35 }
 0x8ea   :  { %2640 = vrot.lane.b32.xlu1 %v2618_v24, %s3947_s19  ;;  %2638 = vrot.lane.b32.xlu0 %v2617_v34, %s3947_s19 }
 0x8ee   :  { %2727 = vrot.lane.b32.xlu1 %v2695_v60, %s3948_s20  ;;  %2725 = vrot.lane.b32.xlu0 %v2693_v45, %s3948_s20 }
 0x8f2   :  { %2729 = vrot.lane.b32.xlu1 %v2697_v46, %s3948_s20  ;;  %2719 = vrot.lane.b32.xlu0 %v2696_v31, %s3948_s20 }
 0x8f6   :  { %2731 = vrot.lane.b32.xlu1 %v2699_v37, %s3948_s20  ;;  %2717 = vrot.lane.b32.xlu0 %v2694_v3, %s3948_s20 }
 0x8fa   :  { %2721 = vrot.lane.b32.xlu1 %v2698_v51, %s3948_s20  ;;  %2711 = vrot.lane.b32.xlu0 %v2688_v57, %s3948_s20 }
 0x8fe   :  { %2723 = vrot.lane.b32.xlu1 %v2700_v8, %s3948_s20  ;;  %2654 = vrot.lane.b32.xlu0 %v2631_v63, %s3947_s19 }
 0x902   :  { %2713 = vrot.lane.b32.xlu1 %v2690_v16, %s3948_s20  ;;  %2709 = vrot.lane.b32.xlu0 %v2686_v20, %s3948_s20 }
 0x906   :  { %2656 = vrot.lane.b32.xlu1 %v2633_v4, %s3947_s19  ;;  %2652 = vrot.lane.b32.xlu0 %v2629_v10, %s3947_s19 }
 0x90a   :  { %2715 = vrot.lane.b32.xlu1 %v2692_v11, %s3948_s20  ;;  %2646 = vrot.lane.b32.xlu0 %v2623_v15, %s3947_s19 }
 0x90e   :  { %2658 = vrot.lane.b32.xlu1 %v2635_v22, %s3947_s19  ;;  %2644 = vrot.lane.b32.xlu0 %v2621_v38, %s3947_s19 }
 0x912   :  { %2648 = vrot.lane.b32.xlu1 %v2625_v55, %s3947_s19  ;;  %2636 = vrot.lane.b32.xlu0 %v2616_v13, %s3947_s19 }
 0x916   :  { %2650 = vrot.lane.b32.xlu1 %v2627_v49, %s3947_s19  ;;  %2767 = vperm.xlu0 %3764, %v6171_v9  }
 0x91a   :  { %2642 = vrot.lane.b32.xlu1 %v2619_v0, %s3947_s19  ;;  %3766 = vset.pattern.permute.xlu0 %v6711_v42 }
 0x954   :  { %v2704_v24 = vpop.permute.xlu0 %2703  ;;  %v2706_v34 = vpop.permute.xlu1 %2705 }
 0x955   :  { %v2734_v20 = vsel %vm68_vm0, %v2704_v24, %v2706_v34 }
 0x958   :  { %v2702_v26 = vpop.permute.xlu0 %2701  ;;  %v2708_v19 = vpop.permute.xlu1 %2707 }
 0x959   :  { %v2733_v2 = vsel %vm68_vm0, %v2702_v26, %v2704_v24  ;;  %v2735_v35 = vsel %vm68_vm0, %v2706_v34, %v2708_v19 }
 0x95c   :  { %v2639_v33 = vpop.permute.xlu0 %2638  ;;  %v6178_v40 = vpop.permute.xlu1 %2640 }
 0x95d   :  { %v2661_v0 = vsel %vm52_vm1, %v2639_v33, %v6178_v40 }
 0x95e   :  { %v2758_v34 = vsel %vm1053_vm11, %v6081_v59, %v2661_v0  ;;  %v3677_v0 = vsel %vm2995_vm3, 1.0, %v6707_v50  ;;  %vm3391_vm3 = vcmask 326656  }
 0x960   :  { %v2726_v60 = vpop.permute.xlu0 %2725  ;;  %v2728_v45 = vpop.permute.xlu1 %2727 }
 0x961   :  { %v2742_v46 = vsel %vm68_vm0, %v2726_v60, %v2728_v45 }
 0x964   :  { %v2720_v54 = vpop.permute.xlu0 %2719  ;;  %v2730_v61 = vpop.permute.xlu1 %2729 }
 0x965   :  { %v2743_v43 = vsel %vm68_vm0, %v2728_v45, %v2730_v61 }
 0x966   :  { %3667 = vmatprep.subr.msk.mxu0 %vm1987_vm2, %v2743_v43 }
 0x967   :  { %3668 = vmatpush1.msk.msra.mxu0 %vm1987_vm2, %v2742_v46 }
 0x968   :  { %v2718_v36 = vpop.permute.xlu0 %2717  ;;  %v2732_v31 = vpop.permute.xlu1 %2731 }
 0x969   :  { %v2744_v7 = vsel %vm68_vm0, %v2730_v61, %v2732_v31  ;;  %3670 = vmatprep.subr.msk.mxu1 %vm1987_vm2, %v2732_v31  ;;  %v2739_v3 = vsel %vm68_vm0, %v2718_v36, %v2720_v54 }
 0x96a   :  { %3671 = vmatpush1.msk.msra.mxu1 %vm1987_vm2, %v2744_v7 }
 0x96c   :  { %v2712_v17 = vpop.permute.xlu0 %2711  ;;  %v2722_v37 = vpop.permute.xlu1 %2721 }
 0x96d   :  { %v2740_v14 = vsel %vm68_vm0, %v2720_v54, %v2722_v37 }
 0x96e   :  { %2800 = vmatprep.subr.mxu0 %v2740_v14 }
 0x96f   :  { %2801 = vmatpush1.msra.mxu0 %v2739_v3 }
 0x970   :  { %v2655_v56 = vpop.permute.xlu0 %2654  ;;  %v2724_v51 = vpop.permute.xlu1 %2723 }
 0x971   :  { %v2741_v57 = vsel %vm68_vm0, %v2722_v37, %v2724_v51  ;;  %2871 = vmatprep.subr.mxu1 %v2724_v51 }
 0x972   :  { %2872 = vmatpush1.msra.mxu1 %v2741_v57 }
 0x974   :  { %v2710_v23 = vpop.permute.xlu0 %2709  ;;  %v2714_v1 = vpop.permute.xlu1 %2713 }
 0x975   :  { %v2736_v6 = vsel %vm68_vm0, %v2710_v23, %v2712_v17  ;;  %v2737_v8 = vsel %vm68_vm0, %v2712_v17, %v2714_v1 }
 0x976   :  { %2802 = vmatprep.subr.mxu0 %v2737_v8 }
 0x977   :  { %2803 = vmatpush1.msra.mxu0 %v2736_v6 }
 0x978   :  { %v2653_v63 = vpop.permute.xlu0 %2652  ;;  %v2657_v16 = vpop.permute.xlu1 %2656 }
 0x979   :  { %v2666_v27 = vsel %vm52_vm1, %v2653_v63, %v2655_v56  ;;  %v2667_v21 = vsel %vm52_vm1, %v2655_v56, %v2657_v16 }
 0x97a   :  { %v2762_v5 = vsel %vm1235_vm12, %v2667_v21, %v2734_v20  ;;  %v2761_v4 = vsel %vm1235_vm12, %v2666_v27, %v2733_v2 }
 0x97b   :  { %2804 = vmatprep.subr.mxu0 %v2762_v5 }
 0x97c   :  { %v2647_v10 = vpop.permute.xlu0 %2646  ;;  %2805 = vmatpush1.msra.mxu0 %v2761_v4  ;;  %v2716_v11 = vpop.permute.xlu1 %2715 }
 0x97d   :  { %v2738_v15 = vsel %vm68_vm0, %v2714_v1, %v2716_v11  ;;  %2873 = vmatprep.subr.mxu1 %v2716_v11 }
 0x97e   :  { %2874 = vmatpush1.msra.mxu1 %v2738_v15 }
 0x980   :  { %v2645_v53 = vpop.permute.xlu0 %2644  ;;  %v2659_v13 = vpop.permute.xlu1 %2658 }
 0x981   :  { %v2668_v22 = vsel %vm52_vm1, %v2657_v16, %v2659_v13  ;;  %v2764_v38 = vsel %vm1235_vm12, %v2659_v13, %v2708_v19  ;;  %v2663_v45 = vsel %vm52_vm1, %v2645_v53, %v2647_v10 }
 0x982   :  { %2875 = vmatprep.subr.mxu1 %v2764_v38  ;;  %v2763_v55 = vsel %vm1235_vm12, %v2668_v22, %v2735_v35  ;;  %vm2770_vm12 = vcmask 465920  }
 0x983   :  { %2876 = vmatpush1.msra.mxu1 %v2763_v55 }
 0x984   :  { %v2637_v49 = vpop.permute.xlu0 %2636  ;;  %v2649_v24 = vpop.permute.xlu1 %2648 }
 0x985   :  { %v2660_v26 = vsel %vm52_vm1, %v2637_v49, %v2639_v33  ;;  %v2664_v60 = vsel %vm52_vm1, %v2647_v10, %v2649_v24  ;;  %v2603_v33 = vld [vmem:[%s6551_s1 + $0xb0] sm:$0x1f] }
 0x986   :  { %2806 = vmatprep.subr.mxu0 %v2664_v60  ;;  %v2757_v54 = vsel %vm1053_vm11, %v6079_v52, %v2660_v26  ;;  %v3678_v26 = vsel %vm2997_vm4, 1.0, %v6707_v50  ;;  %vm3955_vm4 = vmmov 0  }
 0x987   :  { %2807 = vmatpush1.msra.mxu0 %v2663_v45 }
 0x988   :  { %2808 = vmatprep.subr.mxu0 %v2758_v34  ;;  %v2651_v19 = vpop.permute.xlu1 %2650 }
 0x989   :  { %v2665_v61 = vsel %vm52_vm1, %v2649_v24, %v2651_v19  ;;  %2809 = vmatpush1.msra.mxu0 %v2757_v54  ;;  %2877 = vmatprep.subr.mxu1 %v2651_v19 }
 0x98a   :  { %2810 = vmatprep.subr.mxu0 %v6093_v28  ;;  %2878 = vmatpush1.msra.mxu1 %v2665_v61 }
 0x98b   :  { %2811 = vmatpush1.msra.mxu0 %v6103_v12 }
 0x98c   :  { %2812 = vmatprep.subr.mxu0 %v6051_v41  ;;  %v2643_v59 = vpop.permute.xlu1 %2642 }
 0x98d   :  { %v2662_v52 = vsel %vm52_vm1, %v6178_v40, %v2643_v59  ;;  %2813 = vmatpush1.msra.mxu0 %v6055_v25  ;;  %v2760_v43 = vsel %vm1053_vm11, %v6106_v44, %v2643_v59 }
 0x98e   :  { %3669 = vmatmul.mubr.msk.f32.vlgmr.msra.gmra.mxu0 %vm2770_vm12, %v2603_v33  ;;  %2879 = vmatprep.subr.mxu1 %v2760_v43  ;;  %v2759_v28 = vsel %vm1053_vm11, %v6095_v58, %v2662_v52 }
 0x98f   :  { %2880 = vmatpush1.msra.mxu1 %v2759_v28  ;;  %3395 = vmatprep.subr.mxu0 %v6707_v50 }
 0x990   :  { %2881 = vmatprep.subr.mxu1 %v6121_v62 }
 0x991   :  { %2882 = vmatpush1.msra.mxu1 %v6114_v32  ;;  %v2768_v25 = vpop.permute.xlu0 %2767 }
 0x992   :  { %2883 = vmatprep.subr.mxu1 %v6057_v29 }
 0x993   :  { %2884 = vmatpush1.msra.mxu1 %v6053_v39 }
 0x994   :  { %3672 = vmatmul.mubr.msk.f32.vlgmr.msra.gmra.mxu1 %vm2770_vm12, %v2603_v33  ;;  %3706 = vmatprep.subr.mxu1 %v6707_v50  ;;  %vm3161_vm12 = vcmask 1046528  }
 0x995   :  { %3738 = vmatprep.mubr.msk.f32.mxu1 %vm3955_vm4, %v6707_v50 }
 0xa4e   :  { %v2848_v41 = vpop.f32.mrf.mxu0 }
 0xa4f   :  { %v2849_v40 = vadd.f32 %v2848_v41, %v2768_v25 }
 0xa50   :  { %v2850_v12 = vpop.f32.mrf.mxu0 }
 0xa51   :  { %v2851_v44 = vadd.f32 %v2850_v12, %v2768_v25  ;;  %v2928_v62 = vmin.f32 %v2849_v40, 0.0  ;;  %vm2924_vm15 = vcmp.gt.f32.partialorder %v2849_v40, 0.0 }
 0xa53   :  { %v2929_v58 = vmin.f32 %v2851_v44, 0.0  ;;  %v2932_v39 = vmul.f32 1.442695, %v2928_v62  ;;  %vm2925_vm13 = vcmp.gt.f32.partialorder %v2851_v44, 0.0 }
 0xa54   :  { %v2919_v46 = vpop.f32.mrf.mxu1 }
 0xa55   :  { %v2920_v36 = vadd.f32 %v2919_v46, %v2768_v25  ;;  %v2934_v31 = vmul.f32 1.442695, %v2929_v58 }
 0xa56   :  { %v2921_v7 = vpop.f32.mrf.mxu1 }
 0xa57   :  { %v2930_v17 = vmin.f32 %v2920_v36, 0.0  ;;  %v2922_v32 = vadd.f32 %v2921_v7, %v2768_v25  ;;  %3886 = vpow2.f32 %v2934_v31  ;;  %vm2926_vm9 = vcmp.gt.f32.partialorder %v2920_v36, 0.0 }
 0xa59   :  { %v2936_v37 = vmul.f32 1.442695, %v2930_v17  ;;  %v2931_v29 = vmin.f32 %v2922_v32, 0.0  ;;  %vm2927_vm10 = vcmp.gt.f32.partialorder %v2922_v32, 0.0 }
 0xa5b   :  { %3888 = vpow2.f32 %v2936_v37  ;;  %v2938_v14 = vmul.f32 1.442695, %v2931_v29 }
 0xa5d   :  { %3890 = vpow2.f32 %v2938_v14 }
 0xa5e   :  { %3892 = vpow2.f32 %v2932_v39 }
 0xa64   :  { %v3887_v3 = vpop.eup %3886 }
 0xa65   :  { %v3674_v6 = vadd.f32 -1.0, %v3887_v3 }
 0xa67   :  { %v2945_v16 = vsel %vm2925_vm13, %v2851_v44, %v3674_v6  ;;  %vm3277_vm13 = vcmp.lt.s32.totalorder %v6708_v30, 164 }
 0xa68   :  { %v3889_v56 = vpop.eup %3888 }
 0xa69   :  { %v3675_v51 = vadd.f32 -1.0, %v3889_v56 }
 0xa6a   :  { %v3891_v57 = vpop.eup %3890 }
 0xa6b   :  { %v2946_v23 = vsel %vm2926_vm9, %v2920_v36, %v3675_v51  ;;  %v3676_v1 = vadd.f32 -1.0, %v3891_v57  ;;  %v3893_v8 = vpop.eup %3892 }
 0xa6c   :  { %2956 = vrot.lane.b32.xlu1 %v2946_v23, %s3947_s19  ;;  %v3673_v20 = vadd.f32 -1.0, %v3893_v8 }
 0xa6d   :  { %v2947_v63 = vsel %vm2927_vm10, %v2922_v32, %v3676_v1 }
 0xa6e   :  { %2958 = vrot.lane.b32.xlu0 %v2947_v63, %s3947_s19  ;;  %v2944_v2 = vsel %vm2924_vm15, %v2849_v40, %v3673_v20  ;;  %vm3279_vm15 = vcmp.lt.s32.totalorder %v6709_v18, 164 }
 0xa70   :  { %2954 = vrot.lane.b32.xlu1 %v2945_v16, %s3947_s19 }
 0xa74   :  { %2952 = vrot.lane.b32.xlu1 %v2944_v2, %s3947_s19 }
 0xade   :  { %v2957_v27 = vpop.permute.xlu1 %2956 }
 0xae0   :  { %v2959_v21 = vpop.permute.xlu0 %2958 }
 0xae1   :  { %v2962_v5 = vsel %vm52_vm1, %v2957_v27, %v2959_v21  ;;  %v2970_v53 = vmax.f32 %v2947_v63, %v2959_v21 }
 0xae2   :  { %v2969_v4 = vmax.f32 %v2946_v23, %v2962_v5  ;;  %v2955_v10 = vpop.permute.xlu1 %2954 }
 0xae3   :  { %v2961_v11 = vsel %vm52_vm1, %v2955_v10, %v2957_v27 }
 0xae4   :  { %v2968_v15 = vmax.f32 %v2945_v16, %v2961_v11  ;;  %2979 = vrot.lane.b32.xlu1 %v2969_v4, %s3947_s19 }
 0xae6   :  { %2977 = vrot.lane.b32.xlu0 %v2968_v15, %s3947_s19  ;;  %v2953_v13 = vpop.permute.xlu1 %2952 }
 0xae7   :  { %v2960_v35 = vsel %vm52_vm1, %v2953_v13, %v2955_v10 }
 0xae8   :  { %v2967_v22 = vmax.f32 %v2944_v2, %v2960_v35  ;;  %2981 = vrot.lane.b32.xlu1 %v2970_v53, %s3947_s19  ;;  %v3091_v35 = vld [vmem:[%s6551_s1 + $0xc0] sm:$0xff] }
 0xaea   :  { %2975 = vrot.lane.b32.xlu0 %v2967_v22, %s3947_s19  ;;  %v3954_v22 = vmov 0  }
 0xb56   :  { %v2980_v38 = vpop.permute.xlu1 %2979 }
 0xb58   :  { %v2978_v55 = vpop.permute.xlu0 %2977 }
 0xb59   :  { %v2984_v49 = vsel %vm52_vm1, %v2978_v55, %v2980_v38 }
 0xb5a   :  { %v2991_v24 = vmax.f32 %v2945_v16, %v2984_v49  ;;  %v2982_v60 = vpop.permute.xlu1 %2981 }
 0xb5b   :  { %v2985_v45 = vsel %vm52_vm1, %v2980_v38, %v2982_v60  ;;  %v2993_v34 = vmax.f32 %v2947_v63, %v2982_v60  ;;  %v3092_v38 = vld [vmem:[%s6551_s1 + $0xd0] sm:$0x7f] }
 0xb5c   :  { %v6249_v19 = vmul.f32 %v3677_v0, %v2991_v24  ;;  %v6251_v54 = vmax.f32 %v2946_v23, %v2985_v45  ;;  %v2976_v61 = vpop.permute.xlu0 %2975 }
 0xb5d   :  { %v6253_v33 = vmul.f32 %v3678_v26, %v2993_v34  ;;  %v2983_v59 = vsel %vm52_vm1, %v2976_v61, %v2978_v55 }
 0xb5e   :  { %v3011_v52 = vmul.f32 %v6249_v19, %v6249_v19  ;;  %v3012_v43 = vmul.f32 %v6251_v54, %v6251_v54  ;;  %v6260_v28 = vmax.f32 %v2944_v2, %v2983_v59 }
 0xb5f   :  { %v3013_v41 = vmul.f32 %v6253_v33, %v6253_v33 }
 0xb60   :  { %v3019_v25 = vrot.slane %v3011_v52, 3  ;;  %v3010_v12 = vmul.f32 %v6260_v28, %v6260_v28  ;;  %v3020_v40 = vrot.slane %v3012_v43, 3 }
 0xb61   :  { %v3021_v44 = vrot.slane %v3013_v41, 3 }
 0xb62   :  { %v3018_v58 = vrot.slane %v3010_v12, 3  ;;  %v3039_v31 = vsel %vm3037_vm5, %v3019_v25, 0.0  ;;  %v3027_v7 = vsel %vm1332_vm14, %v6249_v19, %v3019_v25  ;;  %v3041_v37 = vsel %vm3037_vm5, %v3020_v40, 0.0 }
 0xb63   :  { %v3029_v17 = vsel %vm1332_vm14, %v6253_v33, %v3021_v44  ;;  %v3028_v29 = vsel %vm1332_vm14, %v6251_v54, %v3020_v40  ;;  %v3044_v3 = vsel %vm3043_vm6, %v3021_v44, 0.0  ;;  %v6304_v44 = vld [vmem:[%s6551_s1 + $0xc8] ss:$0 sm:$0xff] }
 0xb64   :  { %v3026_v46 = vsel %vm1332_vm14, %v6260_v28, %v3018_v58  ;;  %v3038_v36 = vsel %vm3037_vm5, %v3018_v58, 0.0  ;;  %v3033_v56 = vsel %vm3032_vm7, %v3029_v17, 0.0 }
 0xb65   :  { %v3040_v62 = vadd.f32 %v3039_v31, %v3038_v36  ;;  %v3030_v32 = vadd.f32 %v3027_v7, %v3026_v46 }
 0xb67   :  { %v3042_v39 = vadd.f32 %v3041_v37, %v3040_v62  ;;  %v3031_v14 = vadd.f32 %v3030_v32, %v3028_v29 }
 0xb69   :  { %v3045_v51 = vadd.f32 %v3044_v3, %v3042_v39  ;;  %v3034_v57 = vadd.f32 %v3033_v56, %v3031_v14 }
 0xb6b   :  { %3046 = vadd.xlane.f32.xlu1 %v3045_v51  ;;  %3035 = vadd.xlane.f32.xlu0 %v3034_v57 }
 0xbf4   :  { %v3036_v23 = vpop.xlane.xlu0 %3035  ;;  %v3047_v6 = vpop.xlane.xlu1 %3046 }
 0xbf5   :  { %v3048_v1 = vmul.f32 0.0029761905, %v3036_v23  ;;  %v3049_v63 = vmul.f32 0.0029761905, %v3047_v6 }
 0xbf7   :  { %v3050_v8 = vmul.f32 %v3048_v1, %v3048_v1  ;;  %v3071_v55 = vsub.f32 %v6251_v54, %v3048_v1  ;;  %v3069_v43 = vsub.f32 %v6260_v28, %v3048_v1 }
 0xbf9   :  { %v3052_v16 = vrot.slane %v3050_v8, 3 }
 0xbfb   :  { %v3054_v20 = vsub.f32 %v3048_v1, %v3052_v16  ;;  %v3055_v2 = vsub.f32 %v3049_v63, %v3052_v16 }
 0xbfd   :  { %v3056_v27 = vadd.f32 1e-05, %v3054_v20  ;;  %v3057_v21 = vadd.f32 1e-05, %v3055_v2 }
 0xbff   :  { %3894 = vrsqrt.f32 %v3056_v27 }
 0xc00   :  { %3896 = vrsqrt.f32 %v3057_v21 }
 0xc0c   :  { %v3895_v5 = vpop.eup %3894 }
 0xc0d   :  { %v3897_v4 = vpop.eup %3896  ;;  %v3062_v10 = vrot.slane %v3895_v5, 5 }
 0xc0e   :  { %v3063_v11 = vrot.slane %v3897_v4, 5 }
 0xc10   :  { %v3064_v15 = vsel %vm1053_vm11, %v3062_v10, %v3063_v11  ;;  %vm3186_vm11 = vcmask 932864  }
 0xc11   :  { %3065 = vrot.lane.b32.xlu0 %v3064_v15, %s3952_s27 }
 0xc15   :  { %3083 = vperm.xlu0 %3766, %v6171_v9  }
 0xc19   :  { %3768 = vset.pattern.permute.xlu0 %v6712_v48  ;;  %v3070_v48 = vsub.f32 %v6249_v19, %v3048_v1 }
 0xc83   :  { %v3066_v53 = vpop.permute.xlu0 %3065 }
 0xc84   :  { %v3068_v13 = vmul.f32 %v3066_v53, %v6171_v9  ;;  %v3072_v9 = vsub.f32 %v6253_v33, %v3048_v1 }
 0xc86   :  { %3075 = vperm.xlu1 %3765, %v3068_v13  }
 0xc8a   :  { %3767 = vset.pattern.permute.xlu1 %v3954_v22 }
 0xc8b   :  { %3145 = vperm.xlu1 %3767, %v3091_v35  }
 0xc8f   :  { %3150 = vperm.xlu1 %3767, %v3092_v38  }
 0xc90   :  { %v3084_v49 = vpop.permute.xlu0 %3083 }
 0xc93   :  { %3769 = vset.pattern.permute.xlu1 %v6710_v47 }
 0xd01   :  { %v3076_v0 = vpop.permute.xlu1 %3075 }
 0xd02   :  { %v3079_v24 = vmul.f32 %v3076_v0, %v3070_v48  ;;  %v3080_v26 = vmul.f32 %v3076_v0, %v3071_v55  ;;  %v3081_v60 = vmul.f32 %v3076_v0, %v3072_v9  ;;  %v3078_v47 = vmul.f32 %v3076_v0, %v3069_v43 }
 0xd04   :  { %v3087_v45 = vadd.f32 %v3084_v49, %v3079_v24  ;;  %v3088_v34 = vadd.f32 %v3084_v49, %v3080_v26  ;;  %v3089_v61 = vadd.f32 %v3084_v49, %v3081_v60  ;;  %v3086_v33 = vadd.f32 %v3084_v49, %v3078_v47 }
 0xd06   :  { %v3099_v59 = vrot.slane %v3088_v34, 3  ;;  %v3098_v52 = vrot.slane %v3087_v45, 3  ;;  %v3117_v19 = vrot.slane %v3087_v45, 6  ;;  %v3100_v54 = vrot.slane %v3089_v61, 3  ;;  %v3146_v40 = vpop.permute.xlu1 %3145 }
 0xd07   :  { %v3119_v41 = vrot.slane %v3089_v61, 6  ;;  %v3118_v25 = vrot.slane %v3088_v34, 6  ;;  %v3116_v12 = vrot.slane %v3086_v33, 6  ;;  %v3097_v28 = vrot.slane %v3086_v33, 3 }
 0xd08   :  { %3105 = vrot.lane.b32.xlu1 %v3099_v59, %s3947_s19  ;;  %3103 = vrot.lane.b32.xlu0 %v3098_v52, %s3947_s19 }
 0xd0a   :  { %v3151_v58 = vpop.permute.xlu1 %3150 }
 0xd0c   :  { %3122 = vrot.lane.b32.xlu1 %v3117_v19, %s3948_s20  ;;  %3107 = vrot.lane.b32.xlu0 %v3100_v54, %s3947_s19 }
 0xd10   :  { %3126 = vrot.lane.b32.xlu1 %v3119_v41, %s3948_s20  ;;  %3124 = vrot.lane.b32.xlu0 %v3118_v25, %s3948_s20 }
 0xd14   :  { %3120 = vrot.lane.b32.xlu1 %v3116_v12, %s3948_s20  ;;  %3101 = vrot.lane.b32.xlu0 %v3097_v28, %s3947_s19 }
 0xd18   :  { %3199 = vperm.xlu0 %3768, %v6304_v44  }
 0xd1c   :  { %3771 = vset.pattern.permute.xlu0 %v6711_v42 }
 0xd7a   :  { %v3106_v46 = vpop.permute.xlu1 %3105  ;;  %v3104_v36 = vpop.permute.xlu0 %3103 }
 0xd7b   :  { %v3110_v62 = vsel %vm52_vm1, %v3104_v36, %v3106_v46 }
 0xd7c   :  { %v3136_v37 = vsel %vm1332_vm14, %v3087_v45, %v3110_v62 }
 0xd7d   :  { %v3154_v16 = vmul.f32 %v3146_v40, %v3136_v37 }
 0xd7e   :  { %v3123_v31 = vpop.permute.xlu1 %3122  ;;  %v3108_v7 = vpop.permute.xlu0 %3107 }
 0xd7f   :  { %v3138_v17 = vsel %vm1332_vm14, %v3089_v61, %v3108_v7  ;;  %v3111_v32 = vsel %vm52_vm1, %v3106_v46, %v3108_v7 }
 0xd80   :  { %v3156_v29 = vmul.f32 %v3146_v40, %v3138_v17  ;;  %v3137_v3 = vsel %vm1332_vm14, %v3088_v34, %v3111_v32 }
 0xd81   :  { %v3155_v20 = vmul.f32 %v3146_v40, %v3137_v3 }
 0xd82   :  { %v3127_v39 = vpop.permute.xlu1 %3126  ;;  %v3125_v14 = vpop.permute.xlu0 %3124  ;;  %v3187_v2 = vsel %vm3186_vm11, %v3156_v29, 0.0 }
 0xd83   :  { %v3142_v56 = vsel %vm3037_vm5, %v3108_v7, %v3127_v39  ;;  %v3129_v51 = vsel %vm68_vm0, %v3123_v31, %v3125_v14  ;;  %v3130_v57 = vsel %vm68_vm0, %v3125_v14, %v3127_v39 }
 0xd84   :  { %v3160_v23 = vmul.f32 %v3151_v58, %v3142_v56  ;;  %v3140_v1 = vsel %vm3037_vm5, %v3110_v62, %v3129_v51  ;;  %v3141_v6 = vsel %vm3037_vm5, %v3111_v32, %v3130_v57 }
 0xd85   :  { %v3158_v8 = vmul.f32 %v3151_v58, %v3140_v1  ;;  %v3159_v63 = vmul.f32 %v3151_v58, %v3141_v6 }
 0xd86   :  { %v3189_v27 = vsel %vm3188_vm8, %v3160_v23, 0.0  ;;  %v3121_v21 = vpop.permute.xlu1 %3120  ;;  %v3102_v5 = vpop.permute.xlu0 %3101 }
 0xd87   :  { %v3190_v4 = vadd.f32 %v3189_v27, %v3187_v2  ;;  %v3170_v10 = vsel %vm3161_vm12, %v3158_v8, 0.0  ;;  %v3178_v11 = vsel %vm3161_vm12, %v3159_v63, 0.0  ;;  %v3128_v15 = vsel %vm68_vm0, %v3121_v21, %v3123_v31 }
 0xd88   :  { %v3171_v53 = vadd.f32 %v3170_v10, %v3154_v16  ;;  %v3179_v13 = vadd.f32 %v3178_v11, %v3155_v20  ;;  %v3109_v35 = vsel %vm52_vm1, %v3102_v5, %v3104_v36 }
 0xd89   :  { %v3191_v22 = vrot.slane %v3190_v4, 4  ;;  %v3135_v38 = vsel %vm1332_vm14, %v3086_v33, %v3109_v35  ;;  %v3139_v48 = vsel %vm3037_vm5, %v3109_v35, %v3128_v15 }
 0xd8a   :  { %v3172_v55 = vrot.slane %v3171_v53, 4  ;;  %v3180_v9 = vrot.slane %v3179_v13, 4  ;;  %v3153_v0 = vmul.f32 %v3146_v40, %v3135_v38  ;;  %v3157_v49 = vmul.f32 %v3151_v58, %v3139_v48 }
 0xd8b   :  { %v3192_v24 = vadd.f32 %v3191_v22, %v3190_v4 }
 0xd8c   :  { %v3173_v26 = vadd.f32 %v3172_v55, %v3171_v53  ;;  %v3181_v60 = vadd.f32 %v3180_v9, %v3179_v13  ;;  %v3162_v45 = vsel %vm3161_vm12, %v3157_v49, 0.0 }
 0xd8d   :  { %v3193_v34 = vrot.slane %v3192_v24, 2  ;;  %v3163_v61 = vadd.f32 %v3162_v45, %v3153_v0 }
 0xd8e   :  { %v3174_v59 = vrot.slane %v3173_v26, 2  ;;  %v3182_v52 = vrot.slane %v3181_v60, 2 }
 0xd8f   :  { %v3164_v43 = vrot.slane %v3163_v61, 4  ;;  %v3194_v47 = vadd.f32 %v3193_v34, %v3192_v24 }
 0xd90   :  { %v3175_v19 = vadd.f32 %v3174_v59, %v3173_v26  ;;  %v3183_v54 = vadd.f32 %v3182_v52, %v3181_v60  ;;  %v3683_v60 = vsel %vm3277_vm13, 1.0, %v6707_v50  ;;  %v3684_v52 = vsel %vm3279_vm15, 1.0, %v6707_v50 }
 0xd91   :  { %v3165_v33 = vadd.f32 %v3164_v43, %v3163_v61  ;;  %v3195_v41 = vrot.slane %v3194_v47, 1 }
 0xd92   :  { %v3176_v25 = vrot.slane %v3175_v19, 1  ;;  %v3184_v12 = vrot.slane %v3183_v54, 1 }
 0xd93   :  { %v3166_v28 = vrot.slane %v3165_v33, 2  ;;  %v3196_v40 = vadd.f32 %v3195_v41, %v3194_v47  ;;  %v3200_v58 = vpop.permute.xlu0 %3199 }
 0xd94   :  { %v3177_v46 = vadd.f32 %v3176_v25, %v3175_v19  ;;  %v3185_v36 = vadd.f32 %v3184_v12, %v3183_v54 }
 0xd95   :  { %v3167_v31 = vadd.f32 %v3166_v28, %v3165_v33  ;;  %v3205_v7 = vadd.f32 %v3200_v58, %v3196_v40 }
 0xd96   :  { %v3203_v62 = vadd.f32 %v3200_v58, %v3177_v46  ;;  %v3204_v17 = vadd.f32 %v3200_v58, %v3185_v36 }
 0xd97   :  { %v3168_v32 = vrot.slane %v3167_v31, 1  ;;  %v3213_v37 = vmin.f32 %v3205_v7, 0.0  ;;  %vm3209_vm0 = vcmp.gt.f32.partialorder %v3205_v7, 0.0 }
 0xd98   :  { %v3211_v29 = vmin.f32 %v3203_v62, 0.0  ;;  %v3212_v39 = vmin.f32 %v3204_v17, 0.0  ;;  %vm3207_vm14 = vcmp.gt.f32.partialorder %v3203_v62, 0.0  ;;  %vm3208_vm9 = vcmp.gt.f32.partialorder %v3204_v17, 0.0 }
 0xd99   :  { %v3169_v14 = vadd.f32 %v3168_v32, %v3167_v31  ;;  %v3220_v3 = vmul.f32 1.442695, %v3213_v37 }
 0xd9a   :  { %v3216_v56 = vmul.f32 1.442695, %v3211_v29  ;;  %v3218_v51 = vmul.f32 1.442695, %v3212_v39 }
 0xd9b   :  { %v3202_v57 = vadd.f32 %v3200_v58, %v3169_v14  ;;  %3898 = vpow2.f32 %v3220_v3 }
 0xd9c   :  { %3900 = vpow2.f32 %v3216_v56 }
 0xd9d   :  { %v3210_v23 = vmin.f32 %v3202_v57, 0.0  ;;  %3902 = vpow2.f32 %v3218_v51  ;;  %vm3206_vm10 = vcmp.gt.f32.partialorder %v3202_v57, 0.0 }
 0xd9f   :  { %v3214_v1 = vmul.f32 1.442695, %v3210_v23 }
 0xda1   :  { %3904 = vpow2.f32 %v3214_v1 }
 0xda8   :  { %v3899_v6 = vpop.eup %3898 }
 0xda9   :  { %v3901_v8 = vpop.eup %3900  ;;  %v3682_v63 = vadd.f32 -1.0, %v3899_v6 }
 0xdaa   :  { %v3903_v16 = vpop.eup %3902  ;;  %v3680_v20 = vadd.f32 -1.0, %v3901_v8 }
 0xdab   :  { %v3229_v2 = vsel %vm3209_vm0, %v3205_v7, %v3682_v63  ;;  %v3681_v21 = vadd.f32 -1.0, %v3903_v16  ;;  %v3380_v63 = vld [vmem:[%s6552_s2 + $0x78] sm:$0xff]  ;;  %v3379_v16 = vld [vmem:[%s6552_s2 + $0x70] sm:$0xff] }
 0xdac   :  { %3240 = vrot.lane.b32.xlu0 %v3229_v2, %s3947_s19  ;;  %v3227_v27 = vsel %vm3207_vm14, %v3203_v62, %v3680_v20  ;;  %3396 = vmatpush1.msra.mxu0 %v3380_v63  ;;  %v3378_v20 = vld [vmem:[%s6552_s2 + $0x68] sm:$0xff] }
 0xdad   :  { %3236 = vrot.lane.b32.xlu1 %v3227_v27, %s3947_s19  ;;  %v3228_v4 = vsel %vm3208_vm9, %v3204_v17, %v3681_v21  ;;  %3397 = vmatprep.subr.mxu0 %v6707_v50  ;;  %v3377_v21 = vld [vmem:[%s6552_s2 + $0x60] sm:$0xff] }
 0xdae   :  { %v3905_v5 = vpop.eup %3904  ;;  %3398 = vmatpush1.msra.mxu0 %v3379_v16 }
 0xdaf   :  { %v3679_v10 = vadd.f32 -1.0, %v3905_v5  ;;  %3399 = vmatprep.subr.mxu0 %v6707_v50  ;;  %v3376_v5 = vld [vmem:[%s6552_s2 + $0x58] sm:$0xff] }
 0xdb0   :  { %3400 = vmatpush1.msra.mxu0 %v3378_v20 }
 0xdb1   :  { %3238 = vrot.lane.b32.xlu1 %v3228_v4, %s3947_s19  ;;  %v3226_v11 = vsel %vm3206_vm10, %v3202_v57, %v3679_v10  ;;  %3401 = vmatprep.subr.mxu0 %v6707_v50  ;;  %v3374_v10 = vld [vmem:[%s6552_s2 + $0x48] sm:$0xff] }
 0xdb2   :  { %3402 = vmatpush1.msra.mxu0 %v3377_v21 }
 0xdb3   :  { %3403 = vmatprep.subr.mxu0 %v6707_v50 }
 0xdb4   :  { %3404 = vmatpush1.msra.mxu0 %v3376_v5 }
 0xdb5   :  { %3234 = vrot.lane.b32.xlu1 %v3226_v11, %s3947_s19  ;;  %3405 = vmatprep.subr.mxu0 %v6707_v50 }
 0xe1e   :  { %v3241_v53 = vpop.permute.xlu0 %3240 }
 0xe1f   :  { %v3237_v15 = vpop.permute.xlu1 %3236  ;;  %v3252_v0 = vmax.f32 %v3229_v2, %v3241_v53 }
 0xe23   :  { %v3239_v13 = vpop.permute.xlu1 %3238 }
 0xe24   :  { %v3243_v35 = vsel %vm52_vm1, %v3237_v15, %v3239_v13  ;;  %v3244_v22 = vsel %vm52_vm1, %v3239_v13, %v3241_v53  ;;  %v3371_v53 = vld [vmem:[%s6552_s2 + $0x30] sm:$0xff]  ;;  %v3370_v13 = vld [vmem:[%s6552_s2 + $0x28] sm:$0xff] }
 0xe25   :  { %v3250_v38 = vmax.f32 %v3227_v27, %v3243_v35  ;;  %v3251_v48 = vmax.f32 %v3228_v4, %v3244_v22  ;;  %v3369_v35 = vld [vmem:[%s6552_s2 + $0x20] sm:$0xff]  ;;  %v3368_v22 = vld [vmem:[%s6552_s2 + $0x18] sm:$0xff] }
 0xe27   :  { %3259 = vrot.lane.b32.xlu0 %v3250_v38, %s3947_s19  ;;  %3261 = vrot.lane.b32.xlu1 %v3251_v48, %s3947_s19  ;;  %v3235_v55 = vpop.permute.xlu1 %3234  ;;  %v3367_v38 = vld [vmem:[%s6552_s2 + $0x10] sm:$0xff]  ;;  %v3366_v48 = vld [vmem:[%s6552_s2 + $0x8] sm:$0xff] }
 0xe28   :  { %v3242_v9 = vsel %vm52_vm1, %v3235_v55, %v3237_v15  ;;  %v3372_v15 = vld [vmem:[%s6552_s2 + $0x38] sm:$0xff]  ;;  %v3365_v55 = vld [vmem:[%s6552_s2] sm:$0xff] }
 0xe29   :  { %v3249_v49 = vmax.f32 %v3226_v11, %v3242_v9  ;;  %v3385_v9 = vld [vmem:[%s6552_s2 + $0xa0] sm:$0xff] }
 0xe2b   :  { %3263 = vrot.lane.b32.xlu1 %v3252_v0, %s3947_s19  ;;  %3257 = vrot.lane.b32.xlu0 %v3249_v49, %s3947_s19 }
 0xe99   :  { %v3260_v24 = vpop.permute.xlu0 %3259  ;;  %v3262_v26 = vpop.permute.xlu1 %3261 }
 0xe9a   :  { %v3266_v45 = vsel %vm52_vm1, %v3260_v24, %v3262_v26 }
 0xe9b   :  { %v3273_v34 = vmax.f32 %v3227_v27, %v3266_v45  ;;  %v3381_v45 = vld [vmem:[%s6552_s2 + $0x80] sm:$0xff] }
 0xe9d   :  { %v6342_v61 = vmul.f32 %v3683_v60, %v3273_v34  ;;  %v3258_v59 = vpop.permute.xlu0 %3257  ;;  %v3264_v43 = vpop.permute.xlu1 %3263  ;;  %v3382_v60 = vld [vmem:[%s6552_s2 + $0x88] sm:$0xff]  ;;  %v3486_v34 = vld [vmem:[%s6552_s2 + $0x120] sm:$0xff] }
 0xe9e   :  { %v3265_v47 = vsel %vm52_vm1, %v3258_v59, %v3260_v24  ;;  %v3267_v19 = vsel %vm52_vm1, %v3262_v26, %v3264_v43  ;;  %v3275_v30 = vmax.f32 %v3229_v2, %v3264_v43  ;;  %vm3317_vm1 = vcmask 910336   ;;  %v3384_v24 = vld [vmem:[%s6552_s2 + $0x98] sm:$0xff]  ;;  %v3383_v26 = vld [vmem:[%s6552_s2 + $0x90] sm:$0xff]  ;;  %3707 = vmatpush3.msra.mxu1 %v3486_v34  ;;  %v3483_v59 = vld [vmem:[%s6552_s2 + $0x108] sm:$0xff] }
 0xe9f   :  { %v3293_v54 = vmul.f32 %v6342_v61, %v6342_v61  ;;  %v6349_v33 = vmax.f32 %v3226_v11, %v3265_v47  ;;  %v6351_v41 = vmax.f32 %v3228_v4, %v3267_v19  ;;  %v3375_v4 = vld [vmem:[%s6552_s2 + $0x50] sm:$0xff]  ;;  %v3373_v11 = vld [vmem:[%s6552_s2 + $0x40] sm:$0xff]  ;;  %3708 = vmatprep.subr.mxu1 %v6707_v50 }
 0xea0   :  { %v6353_v18 = vmul.f32 %v3684_v52, %v3275_v30  ;;  %3406 = vmatpush1.msra.mxu0 %v3375_v4 }
 0xea1   :  { %v3301_v25 = vrot.slane %v3293_v54, 7  ;;  %v3292_v12 = vmul.f32 %v6349_v33, %v6349_v33  ;;  %v3294_v28 = vmul.f32 %v6351_v41, %v6351_v41  ;;  %3407 = vmatprep.subr.mxu0 %v6707_v50 }
 0xea2   :  { %v3295_v40 = vmul.f32 %v6353_v18, %v6353_v18  ;;  %3408 = vmatpush1.msra.mxu0 %v3374_v10 }
 0xea3   :  { %v3309_v58 = vsel %vm1987_vm2, %v6342_v61, %v3301_v25  ;;  %v3300_v46 = vrot.slane %v3292_v12, 7  ;;  %v3302_v36 = vrot.slane %v3294_v28, 7  ;;  %3409 = vmatprep.subr.mxu0 %v6707_v50 }
 0xea4   :  { %v3303_v31 = vrot.slane %v3295_v40, 7  ;;  %v3313_v32 = vsel %vm3037_vm5, %v3309_v58, 0.0  ;;  %3410 = vmatpush1.msra.mxu0 %v3373_v11 }
 0xea5   :  { %v3308_v7 = vsel %vm1987_vm2, %v6349_v33, %v3300_v46  ;;  %v3310_v62 = vsel %vm1987_vm2, %v6351_v41, %v3302_v36  ;;  %3411 = vmatprep.subr.mxu0 %v6707_v50 }
 0xea6   :  { %v3312_v17 = vsel %vm3037_vm5, %v3308_v7, 0.0  ;;  %v3311_v37 = vsel %vm1987_vm2, %v6353_v18, %v3303_v31  ;;  %v3315_v39 = vsel %vm3037_vm5, %v3310_v62, 0.0  ;;  %3412 = vmatpush1.msra.mxu0 %v3372_v15  ;;  %vm3562_vm5 = vcmask 33792  }
 0xea7   :  { %v3314_v29 = vadd.f32 %v3313_v32, %v3312_v17  ;;  %v3318_v3 = vsel %vm3317_vm1, %v3311_v37, 0.0  ;;  %3413 = vmatprep.subr.mxu0 %v6707_v50  ;;  %v3480_v17 = vld [vmem:[%s6552_s2 + $0xf0] sm:$0xff]  ;;  %v3479_v32 = vld [vmem:[%s6552_s2 + $0xe8] sm:$0xff]  ;;  %v3478_v37 = vld [vmem:[%s6552_s2 + $0xe0] sm:$0xff] }
 0xea8   :  { %3414 = vmatpush1.msra.mxu0 %v3371_v53 }
 0xea9   :  { %v3316_v14 = vadd.f32 %v3315_v39, %v3314_v29  ;;  %3415 = vmatprep.subr.mxu0 %v6707_v50  ;;  %v3477_v29 = vld [vmem:[%s6552_s2 + $0xd8] sm:$0xff]  ;;  %v3476_v39 = vld [vmem:[%s6552_s2 + $0xd0] sm:$0xff] }
 0xeaa   :  { %3416 = vmatpush1.msra.mxu0 %v3370_v13 }
 0xeab   :  { %v3319_v56 = vadd.f32 %v3318_v3, %v3316_v14  ;;  %3417 = vmatprep.subr.mxu0 %v6707_v50  ;;  %v3475_v14 = vld [vmem:[%s6552_s2 + $0xc8] sm:$0xff]  ;;  %v3474_v3 = vld [vmem:[%s6552_s2 + $0xc0] sm:$0xff] }
 0xeac   :  { %3418 = vmatpush1.msra.mxu0 %v3369_v35 }
 0xead   :  { %3320 = vadd.xlane.f32.xlu0 %v3319_v56  ;;  %3419 = vmatprep.subr.mxu0 %v6707_v50  ;;  %v3473_v56 = vld [vmem:[%s6552_s2 + $0xb8] sm:$0xff] }
 0xeae   :  { %3420 = vmatpush1.msra.mxu0 %v3368_v22 }
 0xeaf   :  { %3421 = vmatprep.subr.mxu0 %v6707_v50 }
 0xeb0   :  { %3422 = vmatpush1.msra.mxu0 %v3367_v38 }
 0xeb1   :  { %3423 = vmatprep.subr.mxu0 %v6707_v50 }
 0xeb2   :  { %3424 = vmatpush1.msra.mxu0 %v3366_v48 }
 0xeb3   :  { %3425 = vmatprep.subr.mxu0 %v6707_v50 }
 0xeb4   :  { %3426 = vmatpush1.msra.mxu0 %v3365_v55 }
 0xeb5   :  { %3449 = vmatprep.subr.mxu0 %v6707_v50 }
 0xeb6   :  { %3450 = vmatpush2.msra.mxu0 %v3385_v9 }
 0xeb7   :  { %3451 = vmatprep.subr.mxu0 %v6707_v50 }
 0xeb8   :  { %3452 = vmatpush2.msra.mxu0 %v3384_v24 }
 0xeb9   :  { %3453 = vmatprep.subr.mxu0 %v6707_v50 }
 0xeba   :  { %3454 = vmatpush2.msra.mxu0 %v3383_v26 }
 0xebb   :  { %3455 = vmatprep.subr.mxu0 %v6707_v50 }
 0xebc   :  { %3456 = vmatpush2.msra.mxu0 %v3382_v60 }
 0xebd   :  { %3457 = vmatprep.subr.mxu0 %v6707_v50 }
 0xebe   :  { %3458 = vmatpush2.msra.mxu0 %v3381_v45 }
 0xf36   :  { %v3321_v51 = vpop.xlane.xlu0 %3320 }
 0xf37   :  { %v6372_v57 = vmul.f32 0.0030487804, %v3321_v51  ;;  %v3472_v51 = vld [vmem:[%s6552_s2 + $0xb0] sm:$0xff] }
 0xf39   :  { %v3323_v23 = vmul.f32 %v6372_v57, %v6372_v57  ;;  %v3338_v43 = vsub.f32 %v6351_v41, %v6372_v57  ;;  %v3339_v47 = vsub.f32 %v6353_v18, %v6372_v57  ;;  %v3336_v19 = vsub.f32 %v6349_v33, %v6372_v57  ;;  %v3481_v33 = vld [vmem:[%s6552_s2 + $0xf8] sm:$0xff] }
 0xf3a   :  { %v3337_v30 = vsub.f32 %v6342_v61, %v6372_v57  ;;  %v3482_v61 = vld [vmem:[%s6552_s2 + $0x100] sm:$0xff] }
 0xf3b   :  { %v3325_v1 = vrot.slane %v3323_v23, 7  ;;  %v3685_v23 = vld [vmem:[%s6553_s3] ss:$0 sm:$0xff] }
 0xf3d   :  { %v3327_v6 = vsub.f32 %v6372_v57, %v3325_v1  ;;  %v3471_v57 = vld [vmem:[%s6552_s2 + $0xa8] sm:$0xff] }
 0xf3f   :  { %v3328_v8 = vadd.f32 1e-05, %v3327_v6 }
 0xf41   :  { %3906 = vrsqrt.f32 %v3328_v8 }
 0xf4e   :  { %v3907_v2 = vpop.eup %3906 }
 0xf4f   :  { %v3331_v27 = vrot.slane %v3907_v2, 1 }
 0xf51   :  { %3332 = vrot.lane.b32.xlu1 %v3331_v27, %s3952_s27 }
 0xfc3   :  { %v3333_v0 = vpop.permute.xlu1 %3332 }
 0xfc4   :  { %v3335_v49 = vmul.f32 %v3333_v0, %v6304_v44 }
 0xfc6   :  { %3342 = vperm.xlu1 %3769, %v3335_v49  }
 0xfca   :  { %3770 = vset.pattern.permute.xlu1 %v6711_v42  ;;  %v3485_v42 = vld [vmem:[%s6552_s2 + $0x118] sm:$0xff] }
 0xfcb   :  { %3350 = vperm.xlu1 %3770, %v6304_v44   ;;  %v3484_v44 = vld [vmem:[%s6552_s2 + $0x110] sm:$0xff]  ;;  %3709 = vmatpush3.msra.mxu1 %v3485_v42 }
 0xfcc   :  { %3710 = vmatprep.subr.mxu1 %v6707_v50 }
 0xfcd   :  { %3711 = vmatpush3.msra.mxu1 %v3484_v44 }
 0xfce   :  { %3712 = vmatprep.subr.mxu1 %v6707_v50 }
 0xfcf   :  { %3713 = vmatpush3.msra.mxu1 %v3483_v59 }
 0xfd0   :  { %3714 = vmatprep.subr.mxu1 %v6707_v50 }
 0xfd1   :  { %3715 = vmatpush3.msra.mxu1 %v3482_v61 }
 0xfd2   :  { %3716 = vmatprep.subr.mxu1 %v6707_v50 }
 0xfd3   :  { %3717 = vmatpush3.msra.mxu1 %v3481_v33 }
 0xfd4   :  { %3718 = vmatprep.subr.mxu1 %v6707_v50 }
 0xfd5   :  { %3719 = vmatpush3.msra.mxu1 %v3480_v17 }
 0xfd6   :  { %3720 = vmatprep.subr.mxu1 %v6707_v50 }
 0xfd7   :  { %3721 = vmatpush3.msra.mxu1 %v3479_v32 }
 0xfd8   :  { %3722 = vmatprep.subr.mxu1 %v6707_v50 }
 0xfd9   :  { %3723 = vmatpush3.msra.mxu1 %v3478_v37 }
 0xfda   :  { %3724 = vmatprep.subr.mxu1 %v6707_v50 }
 0xfdb   :  { %3725 = vmatpush3.msra.mxu1 %v3477_v29 }
 0xfdc   :  { %3726 = vmatprep.subr.mxu1 %v6707_v50 }
 0xfdd   :  { %3727 = vmatpush3.msra.mxu1 %v3476_v39 }
 0xfde   :  { %3728 = vmatprep.subr.mxu1 %v6707_v50 }
 0xfdf   :  { %3729 = vmatpush3.msra.mxu1 %v3475_v14 }
 0xfe0   :  { %3730 = vmatprep.subr.mxu1 %v6707_v50 }
 0xfe1   :  { %3731 = vmatpush3.msra.mxu1 %v3474_v3 }
 0xfe2   :  { %3732 = vmatprep.subr.mxu1 %v6707_v50 }
 0xfe3   :  { %3733 = vmatpush3.msra.mxu1 %v3473_v56 }
 0xfe4   :  { %3734 = vmatprep.subr.mxu1 %v6707_v50 }
 0xfe5   :  { %3735 = vmatpush3.msra.mxu1 %v3472_v51 }
 0xfe6   :  { %3736 = vmatprep.subr.mxu1 %v6707_v50  ;;  %v3688_v50 = vld [vmem:[%s6553_s3 + $0x1] ss:$0 sm:$0xff]  ;;  %s3925_s3 = scalar_lea.vmem %s3582_s16, 32 }
 0xfe7   :  { %3737 = vmatpush3.msra.mxu1 %v3471_v57  ;;  %p3926_p0 = scmp.ne.s32.totalorder %s3582_s16, %s3925_s3  ;;  %p3931_p2 = scmp.lt.s32.totalorder %s3925_s3, %s3925_s3 }
 0xfe9   :  { %p3932_p3 = por %p3931_p2, %p3930_p1 }
 0xfeb   :  { %p3933_p4 = pnand %p3932_p3, %p3926_p0 }
0x1041   :  { %v3343_v52 = vpop.permute.xlu1 %3342 }
0x1042   :  { %v3347_v54 = vmul.f32 %v3343_v52, %v3338_v43  ;;  %v3348_v25 = vmul.f32 %v3343_v52, %v3339_v47  ;;  %v3345_v28 = vmul.f32 %v3343_v52, %v3336_v19  ;;  %v3346_v40 = vmul.f32 %v3343_v52, %v3337_v30 }
0x1046   :  { %v3351_v12 = vpop.permute.xlu1 %3350 }
0x1047   :  { %v3355_v58 = vadd.f32 %v3351_v12, %v3347_v54  ;;  %v3356_v46 = vadd.f32 %v3351_v12, %v3348_v25  ;;  %v3353_v36 = vadd.f32 %v3351_v12, %v3345_v28  ;;  %v3354_v31 = vadd.f32 %v3351_v12, %v3346_v40 }
0x1049   :  { %v3359_v41 = vrot.slane %v3355_v58, 7  ;;  %v3360_v7 = vrot.slane %v3356_v46, 7 }
0x104b   :  { %v3364_v18 = vsel %vm1987_vm2, %v3354_v31, %v3360_v7  ;;  %v3363_v62 = vsel %vm1987_vm2, %v3353_v36, %v3359_v41 }
0x104c   :  { %3686 = vmatprep.mubr.msk.f32.mxu0 %vm3391_vm3, %v3364_v18 }
0x104d   :  { %3460 = vmatmul.mubr.f32.vlgmr.msra.gmra.mxu0 %v3363_v62 }
0x110d   :  { %v3461_v1 = vpop.f32.mrf.mxu0 }
0x110e   :  { %v3462_v6 = vadd.f32 %v3685_v23, %v3461_v1 }
0x110f   :  { %v3463_v8 = vpop.f32.mrf.mxu0 }
0x1110   :  { %v3466_v63 = vmin.f32 %v3462_v6, 0.0  ;;  %vm3465_vm2 = vcmp.gt.f32.partialorder %v3462_v6, 0.0 }
0x1112   :  { %v3467_v16 = vmul.f32 1.442695, %v3466_v63 }
0x1114   :  { %3908 = vpow2.f32 %v3467_v16 }
0x1121   :  { %v3909_v20 = vpop.eup %3908 }
0x1122   :  { %v3687_v2 = vadd.f32 -1.0, %v3909_v20 }
0x1124   :  { %v3470_v27 = vsel %vm3465_vm2, %v3462_v6, %v3687_v2 }
0x1125   :  { %3739 = vmatmul.mubr.f32.vlgmr.msra.gmra.mxu1 %v3470_v27 }
0x11e5   :  { %v3558_v21 = vpop.f32.mrf.mxu1 }
0x11e6   :  { %v3559_v5 = vadd.f32 %v3688_v50, %v3558_v21 }
0x11e7   :  { %v3740_v4 = vpop.f32.mrf.mxu1 }
0x11e8   :  { %v3563_v10 = vsel %vm3562_vm5, %v3559_v5, -inf }
0x11e9   :  { %3564 = vmax.xlane.f32.xlu1 %v3563_v10 }
0x1272   :  { %v3565_v11 = vpop.xlane.xlu1 %3564 }
0x1273   :  { %v3566_v15 = vsub.f32 %v3559_v5, %v3565_v11 }
0x1275   :  { %v3567_v53 = vmul.f32 1.442695, %v3566_v15 }
0x1277   :  { %3910 = vpow2.f32 %v3567_v53 }
0x1284   :  { %v3911_v13 = vpop.eup %3910 }
0x1285   :  { %v3569_v35 = vsel %vm3562_vm5, %v3911_v13, 0.0 }
0x1286   :  { %3570 = vadd.xlane.f32.xlu0 %v3569_v35 }
0x130f   :  { %v3571_v22 = vpop.xlane.xlu0 %3570 }
0x1310   :  { %3912 = vrcp.f32 %v3571_v22 }
0x131d   :  { %v3913_v38 = vpop.eup %3912 }
0x131e   :  { %v3573_v48 = vmul.f32 %v3913_v38, %v3911_v13 }
0x1320   :  { %3574 = vst.msk [vmem:[#allocation2] sm:$0x3] %vm3562_vm5, %v3573_v48 }
0x1321   :  { %3936 = shalt.err (!%p3933_p4)
}
0x1322   :  { %3584 = dma.vmem_to_hbm [thread:$0]  %s3582_s16, 32, %s6554_s4, [#allocation3]  }
0x1323   :  { %3945 = dma.done.wait [#allocation3], 32  }
0x1324   :  { %3946 = vsyncadd [#allocation3], 4294967264 }
0x1325   :  { %3588 = vsyncpa [#allocation3], 1 }

</bundles_post_ra>
